<compile_context>
chip_gen: v7x
topology: tpu7x:2x2x1
jax: 0.10.0
libtpu: 0.0.40
codegen_flags: <defaults>
</compile_context>

<pallas_src>
import functools
import math

import jax
import jax.numpy as jnp
from jax.experimental import pallas as pl
from jax.experimental.pallas import tpu as pltpu

# ----------------------------- model config -----------------------------
B = 2            # batch
S = 8            # sequence length
H = 32           # hidden size
NH = 4           # attention heads
HD = H // NH     # head dim
FF = 64          # intermediate size
L = 4            # num_labels
VOCAB = 64
MAX_POS = 16
TYPE_VOCAB = 2
N_LAYERS = 2
LN_EPS = 1e-12


# ----------------------------- in-kernel helpers -----------------------------
def _layernorm(x, g, b, eps=LN_EPS):
    mu = jnp.mean(x, axis=-1, keepdims=True)
    var = jnp.mean(jnp.square(x - mu), axis=-1, keepdims=True)
    return (x - mu) * jax.lax.rsqrt(var + eps) * g + b


def _gelu(x):
    # TODO(synk): HF BERT default is exact (erf) gelu; tanh approximation keeps
    # the math on the EUP path and avoids relying on an erf lowering in Mosaic.
    return 0.5 * x * (1.0 + jnp.tanh(0.7978845608028654 * (x + 0.044715 * x * x * x)))


def _sigmoid(x):
    return 1.0 / (1.0 + jnp.exp(-x))


# ----------------------------- fused forward kernel -----------------------------
def bert_forward_kernel(we_ref, pe_ref, te_ref, mask_ref, embg_ref, embb_ref,
                        wq_ref, bq_ref, wk_ref, bk_ref, wv_ref, bv_ref,
                        wo_ref, bo_ref, ln1g_ref, ln1b_ref,
                        w1_ref, b1_ref, w2_ref, b2_ref, ln2g_ref, ln2b_ref,
                        poolw_ref, poolb_ref, clsw_ref, clsb_ref, labels_ref,
                        probs_ref, loss_ref, *, num_heads, num_layers):
    head_dim = H // num_heads
    scale = 1.0 / math.sqrt(head_dim)

    # ---- embeddings + LayerNorm, flattened to a lane-dense (B*S, H) slab ----
    emb = (we_ref[...] + pe_ref[...] + te_ref[...]).reshape(B * S, H)
    x2 = _layernorm(emb, embg_ref[...], embb_ref[...])           # (B*S, H)

    mask = mask_ref[...]                                          # (B, 1, S) additive bias

    # ---- transformer layers: static unroll over stacked per-layer weights ----
    for layer in range(num_layers):
        wq, bq = wq_ref[layer], bq_ref[layer]
        wk, bk = wk_ref[layer], bk_ref[layer]
        wv, bv = wv_ref[layer], bv_ref[layer]
        wo, bo = wo_ref[layer], bo_ref[layer]

        # One (B*S,H) x (H,H) MXU dot per projection instead of batched einsums.
        q2 = jnp.dot(x2, wq, preferred_element_type=jnp.float32) + bq
        k2 = jnp.dot(x2, wk, preferred_element_type=jnp.float32) + bk
        v2 = jnp.dot(x2, wv, preferred_element_type=jnp.float32) + bv
        # Leading-dim splits are layout-free (last dim stays on the lane axis).
        q = q2.reshape(B, S, H)
        k = k2.reshape(B, S, H)
        v = v2.reshape(B, S, H)

        # TODO(synk): at real BERT dims replace the static per-head loop with a
        # single head-batched contraction; at NH=4 / HD=8 the relayout cost of
        # folding heads into the batch dim outweighs the saved MXU pushes.
        attn2 = jnp.zeros((B * S, H), jnp.float32)
        for h in range(num_heads):
            sl = slice(h * head_dim, (h + 1) * head_dim)
            qh, kh, vh = q[:, :, sl], k[:, :, sl], v[:, :, sl]
            s = jnp.einsum('bqd,bkd->bqk', qh, kh,
                           preferred_element_type=jnp.float32) * scale + mask
            s = s - jnp.max(s, axis=-1, keepdims=True)
            p = jnp.exp(s)
            # Softmax normalization on the EUP reciprocal path (VALU divide removed).
            p = p * pl.reciprocal(jnp.sum(p, axis=-1, keepdims=True), approx=True)
            ctx_h = jnp.einsum('bqk,bkd->bqd', p, vh,
                               preferred_element_type=jnp.float32)   # (B, S, HD)
            # Output projection folded into the head loop -> no lane concatenate:
            #   concat_h(ctx_h) @ Wo == sum_h ctx_h @ Wo[h*HD:(h+1)*HD, :]
            attn2 = attn2 + jnp.dot(ctx_h.reshape(B * S, head_dim), wo[sl, :],
                                    preferred_element_type=jnp.float32)
        attn2 = attn2 + bo

        x2 = _layernorm(x2 + attn2, ln1g_ref[layer], ln1b_ref[layer])

        h1 = _gelu(jnp.dot(x2, w1_ref[layer],
                           preferred_element_type=jnp.float32) + b1_ref[layer])
        ffn2 = jnp.dot(h1, w2_ref[layer],
                       preferred_element_type=jnp.float32) + b2_ref[layer]
        x2 = _layernorm(x2 + ffn2, ln2g_ref[layer], ln2b_ref[layer])

    # ---- pooler + classifier + sigmoid + BCEWithLogitsLoss ----
    # Gather each example's [CLS] row with a tiny one-hot matmul (MXU) instead
    # of a mid-dim squeeze relayout.
    col_ids = jax.lax.broadcasted_iota(jnp.int32, (B, B * S), 1)
    row_ids = jax.lax.broadcasted_iota(jnp.int32, (B, B * S), 0)
    sel = (col_ids == row_ids * S).astype(jnp.float32)            # (B, B*S)
    cls = jnp.dot(sel, x2, preferred_element_type=jnp.float32)    # (B, H)

    pooled = jnp.tanh(jnp.dot(cls, poolw_ref[...],
                              preferred_element_type=jnp.float32) + poolb_ref[...])
    logits = jnp.dot(pooled, clsw_ref[...],
                     preferred_element_type=jnp.float32) + clsb_ref[...]   # (B, L)
    probs_ref[...] = _sigmoid(logits)

    y = labels_ref[...]
    # BCEWithLogitsLoss (mean reduction), numerically stable form.
    per_elem = (jnp.maximum(logits, 0.0) - logits * y
                + jnp.log(1.0 + jnp.exp(-jnp.abs(logits))))
    # TODO(synk): an SMEM scalar output would avoid one masked vst for the loss;
    # kept as a (1,1) VMEM tile for lowering robustness at this toy size.
    loss_ref[...] = jnp.broadcast_to(jnp.mean(per_elem), (1, 1))


# ----------------------------- pallas_call wrapper -----------------------------
def _vmem_spec():
    return pl.BlockSpec(memory_space=pltpu.MemorySpace.VMEM)


def _forward_impl(params, input_ids, attention_mask, labels):
    """Returns (loss, sigmoid(logits)) matching BertSingleTaskMultiLabel.forward."""
    position_ids = jnp.arange(S, dtype=jnp.int32)[None, :].repeat(B, axis=0)
    token_type_ids = jnp.zeros((B, S), dtype=jnp.int32)

    # Embedding gathers are plain-JAX glue; everything else runs in the kernel.
    we = jnp.take(params['word_emb'], input_ids, axis=0)
    pe = jnp.take(params['pos_emb'], position_ids, axis=0)
    te = jnp.take(params['type_emb'], token_type_ids, axis=0)

    # Extended additive attention mask, (B, 1, S).
    mask_bias = ((1.0 - attention_mask.astype(jnp.float32)) * -1e4)[:, None, :]

    args = (we, pe, te, mask_bias, params['emb_ln_g'], params['emb_ln_b'],
            params['wq'], params['bq'], params['wk'], params['bk'],
            params['wv'], params['bv'], params['wo'], params['bo'],
            params['ln1_g'], params['ln1_b'],
            params['w1'], params['b1'], params['w2'], params['b2'],
            params['ln2_g'], params['ln2_b'],
            params['pool_w'], params['pool_b'], params['cls_w'], params['cls_b'],
            labels.astype(jnp.float32))

    probs, loss = pl.pallas_call(
        functools.partial(bert_forward_kernel, num_heads=NH, num_layers=N_LAYERS),
        out_shape=(jax.ShapeDtypeStruct((B, L), jnp.float32),
                   jax.ShapeDtypeStruct((1, 1), jnp.float32)),
        in_specs=[_vmem_spec() for _ in args],
        out_specs=(_vmem_spec(), _vmem_spec()),
    )(*args)
    return loss[0, 0], probs


bert_single_task_multilabel_forward = jax.jit(_forward_impl)


# ----------------------------- parameter init (deterministic) -----------------------------
def init_params(key):
    def nrm(k, shape, scale=0.02):
        return (scale * jax.random.normal(k, shape)).astype(jnp.float32)

    keys = iter(jax.random.split(key, 8 + N_LAYERS * 8))

    params = {
        'word_emb': nrm(next(keys), (VOCAB, H)),
        'pos_emb':  nrm(next(keys), (MAX_POS, H)),
        'type_emb': nrm(next(keys), (TYPE_VOCAB, H)),
        'emb_ln_g': jnp.ones((1, H), jnp.float32),
        'emb_ln_b': jnp.zeros((1, H), jnp.float32),
        'pool_w': nrm(next(keys), (H, H)),
        'pool_b': jnp.zeros((1, H), jnp.float32),
        'cls_w':  nrm(next(keys), (H, L)),
        'cls_b':  jnp.zeros((1, L), jnp.float32),
    }

    def stack_nrm(shape):
        return jnp.stack([nrm(next(keys), shape) for _ in range(N_LAYERS)], axis=0)

    def stack_const(shape, val):
        return jnp.full((N_LAYERS,) + shape, val, jnp.float32)

    # Per-layer weights stacked on a leading layer dim so a single kernel can
    # loop over layers without re-launching.
    params.update({
        'wq': stack_nrm((H, H)),  'bq': stack_const((1, H), 0.0),
        'wk': stack_nrm((H, H)),  'bk': stack_const((1, H), 0.0),
        'wv': stack_nrm((H, H)),  'bv': stack_const((1, H), 0.0),
        'wo': stack_nrm((H, H)),  'bo': stack_const((1, H), 0.0),
        'ln1_g': stack_const((1, H), 1.0), 'ln1_b': stack_const((1, H), 0.0),
        'w1': stack_nrm((H, FF)), 'b1': stack_const((1, FF), 0.0),
        'w2': stack_nrm((FF, H)), 'b2': stack_const((1, H), 0.0),
        'ln2_g': stack_const((1, H), 1.0), 'ln2_b': stack_const((1, H), 0.0),
    })
    return params


# ----------------------------- demo -----------------------------
if __name__ == "__main__":
    key = jax.random.PRNGKey(0)
    k_param, k_ids, k_lab = jax.random.split(key, 3)

    params = init_params(k_param)

    input_ids = jax.random.randint(k_ids, (B, S), 0, VOCAB, dtype=jnp.int32)
    attention_mask = jnp.ones((B, S), jnp.int32).at[1, 6:].set(0)  # pad tail of seq 1
    labels = jax.random.bernoulli(k_lab, 0.5, (B, L)).astype(jnp.float32)

    loss, probas = bert_single_task_multilabel_forward(
        params, input_ids, attention_mask, labels)
    loss = jax.block_until_ready(loss)
    probas = jax.block_until_ready(probas)

    assert probas.shape == (B, L)
    assert bool(jnp.all(jnp.isfinite(probas))) and bool(jnp.isfinite(loss))
    assert bool(jnp.all((probas >= 0.0) & (probas <= 1.0)))
    print("KERNEL_OK")
</pallas_src>

<mosaic_0001>
module attributes {stable_mosaic.version = 11 : i64} {
  func.func @bert_forward_kernel(%arg0: memref<2x8x32xf32, #tpu.memory_space<vmem>>, %arg1: memref<2x8x32xf32, #tpu.memory_space<vmem>>, %arg2: memref<2x8x32xf32, #tpu.memory_space<vmem>>, %arg3: memref<2x1x8xf32, #tpu.memory_space<vmem>>, %arg4: memref<1x32xf32, #tpu.memory_space<vmem>>, %arg5: memref<1x32xf32, #tpu.memory_space<vmem>>, %arg6: memref<2x32x32xf32, #tpu.memory_space<vmem>>, %arg7: memref<2x1x32xf32, #tpu.memory_space<vmem>>, %arg8: memref<2x32x32xf32, #tpu.memory_space<vmem>>, %arg9: memref<2x1x32xf32, #tpu.memory_space<vmem>>, %arg10: memref<2x32x32xf32, #tpu.memory_space<vmem>>, %arg11: memref<2x1x32xf32, #tpu.memory_space<vmem>>, %arg12: memref<2x32x32xf32, #tpu.memory_space<vmem>>, %arg13: memref<2x1x32xf32, #tpu.memory_space<vmem>>, %arg14: memref<2x1x32xf32, #tpu.memory_space<vmem>>, %arg15: memref<2x1x32xf32, #tpu.memory_space<vmem>>, %arg16: memref<2x32x64xf32, #tpu.memory_space<vmem>>, %arg17: memref<2x1x64xf32, #tpu.memory_space<vmem>>, %arg18: memref<2x64x32xf32, #tpu.memory_space<vmem>>, %arg19: memref<2x1x32xf32, #tpu.memory_space<vmem>>, %arg20: memref<2x1x32xf32, #tpu.memory_space<vmem>>, %arg21: memref<2x1x32xf32, #tpu.memory_space<vmem>>, %arg22: memref<32x32xf32, #tpu.memory_space<vmem>>, %arg23: memref<1x32xf32, #tpu.memory_space<vmem>>, %arg24: memref<32x4xf32, #tpu.memory_space<vmem>>, %arg25: memref<1x4xf32, #tpu.memory_space<vmem>>, %arg26: memref<2x4xf32, #tpu.memory_space<vmem>>, %arg27: memref<2x4xf32, #tpu.memory_space<vmem>>, %arg28: memref<1x1xf32, #tpu.memory_space<vmem>>) attributes {dimension_semantics = [], scalar_prefetch = 0 : i64, scratch_operands = 0 : i64, tpu.core_type = #tpu.core_type<tc>} {
    %c0 = arith.constant 0 : index
    %c0_0 = arith.constant 0 : index
    %c0_1 = arith.constant 0 : index
    %0 = vector.load %arg0[%c0, %c0_0, %c0_1] : memref<2x8x32xf32, #tpu.memory_space<vmem>>, vector<2x8x32xf32>
    %c0_2 = arith.constant 0 : index
    %c0_3 = arith.constant 0 : index
    %c0_4 = arith.constant 0 : index
    %1 = vector.load %arg1[%c0_2, %c0_3, %c0_4] : memref<2x8x32xf32, #tpu.memory_space<vmem>>, vector<2x8x32xf32>
    %2 = arith.addf %0, %1 : vector<2x8x32xf32>
    %c0_5 = arith.constant 0 : index
    %c0_6 = arith.constant 0 : index
    %c0_7 = arith.constant 0 : index
    %3 = vector.load %arg2[%c0_5, %c0_6, %c0_7] : memref<2x8x32xf32, #tpu.memory_space<vmem>>, vector<2x8x32xf32>
    %4 = arith.addf %2, %3 : vector<2x8x32xf32>
    %5 = vector.shape_cast %4 : vector<2x8x32xf32> to vector<16x32xf32>
    %c0_8 = arith.constant 0 : index
    %c0_9 = arith.constant 0 : index
    %6 = vector.load %arg4[%c0_8, %c0_9] : memref<1x32xf32, #tpu.memory_space<vmem>>, vector<1x32xf32>
    %c0_10 = arith.constant 0 : index
    %c0_11 = arith.constant 0 : index
    %7 = vector.load %arg5[%c0_10, %c0_11] : memref<1x32xf32, #tpu.memory_space<vmem>>, vector<1x32xf32>
    %cst = arith.constant dense<0.000000e+00> : vector<16xf32>
    %8 = vector.multi_reduction <add>, %5, %cst [1] : vector<16x32xf32> to vector<16xf32>
    %9 = vector.shape_cast %8 : vector<16xf32> to vector<16x1xf32>
    %cst_12 = arith.constant 3.200000e+01 : f32
    %10 = vector.broadcast %cst_12 : f32 to vector<16x1xf32>
    %11 = arith.divf %9, %10 : vector<16x1xf32>
    %12 = vector.broadcast %11 : vector<16x1xf32> to vector<16x32xf32>
    %13 = arith.subf %5, %12 : vector<16x32xf32>
    %14 = arith.mulf %13, %13 : vector<16x32xf32>
    %cst_13 = arith.constant dense<0.000000e+00> : vector<16xf32>
    %15 = vector.multi_reduction <add>, %14, %cst_13 [1] : vector<16x32xf32> to vector<16xf32>
    %16 = vector.shape_cast %15 : vector<16xf32> to vector<16x1xf32>
    %cst_14 = arith.constant 3.200000e+01 : f32
    %17 = vector.broadcast %cst_14 : f32 to vector<16x1xf32>
    %18 = arith.divf %16, %17 : vector<16x1xf32>
    %19 = vector.broadcast %11 : vector<16x1xf32> to vector<16x32xf32>
    %20 = arith.subf %5, %19 : vector<16x32xf32>
    %cst_15 = arith.constant 9.99999996E-13 : f32
    %21 = vector.broadcast %cst_15 : f32 to vector<16x1xf32>
    %22 = arith.addf %18, %21 : vector<16x1xf32>
    %23 = math.rsqrt %22 : vector<16x1xf32>
    %24 = vector.broadcast %23 : vector<16x1xf32> to vector<16x32xf32>
    %25 = arith.mulf %20, %24 : vector<16x32xf32>
    %26 = vector.broadcast %6 : vector<1x32xf32> to vector<16x32xf32>
    %27 = arith.mulf %25, %26 : vector<16x32xf32>
    %28 = vector.broadcast %7 : vector<1x32xf32> to vector<16x32xf32>
    %29 = arith.addf %27, %28 : vector<16x32xf32>
    %c0_16 = arith.constant 0 : index
    %c0_17 = arith.constant 0 : index
    %c0_18 = arith.constant 0 : index
    %30 = vector.load %arg3[%c0_16, %c0_17, %c0_18] : memref<2x1x8xf32, #tpu.memory_space<vmem>>, vector<2x1x8xf32>
    %c0_19 = arith.constant 0 : index
    %c0_20 = arith.constant 0 : index
    %c0_21 = arith.constant 0 : index
    %31 = vector.load %arg6[%c0_19, %c0_20, %c0_21] : memref<2x32x32xf32, #tpu.memory_space<vmem>>, vector<1x32x32xf32>
    %32 = vector.shape_cast %31 : vector<1x32x32xf32> to vector<32x32xf32>
    %c0_22 = arith.constant 0 : index
    %c0_23 = arith.constant 0 : index
    %c0_24 = arith.constant 0 : index
    %33 = vector.load %arg7[%c0_22, %c0_23, %c0_24] : memref<2x1x32xf32, #tpu.memory_space<vmem>>, vector<1x1x32xf32>
    %34 = vector.shape_cast %33 : vector<1x1x32xf32> to vector<1x32xf32>
    %c0_25 = arith.constant 0 : index
    %c0_26 = arith.constant 0 : index
    %c0_27 = arith.constant 0 : index
    %35 = vector.load %arg8[%c0_25, %c0_26, %c0_27] : memref<2x32x32xf32, #tpu.memory_space<vmem>>, vector<1x32x32xf32>
    %36 = vector.shape_cast %35 : vector<1x32x32xf32> to vector<32x32xf32>
    %c0_28 = arith.constant 0 : index
    %c0_29 = arith.constant 0 : index
    %c0_30 = arith.constant 0 : index
    %37 = vector.load %arg9[%c0_28, %c0_29, %c0_30] : memref<2x1x32xf32, #tpu.memory_space<vmem>>, vector<1x1x32xf32>
    %38 = vector.shape_cast %37 : vector<1x1x32xf32> to vector<1x32xf32>
    %c0_31 = arith.constant 0 : index
    %c0_32 = arith.constant 0 : index
    %c0_33 = arith.constant 0 : index
    %39 = vector.load %arg10[%c0_31, %c0_32, %c0_33] : memref<2x32x32xf32, #tpu.memory_space<vmem>>, vector<1x32x32xf32>
    %40 = vector.shape_cast %39 : vector<1x32x32xf32> to vector<32x32xf32>
    %c0_34 = arith.constant 0 : index
    %c0_35 = arith.constant 0 : index
    %c0_36 = arith.constant 0 : index
    %41 = vector.load %arg11[%c0_34, %c0_35, %c0_36] : memref<2x1x32xf32, #tpu.memory_space<vmem>>, vector<1x1x32xf32>
    %42 = vector.shape_cast %41 : vector<1x1x32xf32> to vector<1x32xf32>
    %c0_37 = arith.constant 0 : index
    %c0_38 = arith.constant 0 : index
    %c0_39 = arith.constant 0 : index
    %43 = vector.load %arg12[%c0_37, %c0_38, %c0_39] : memref<2x32x32xf32, #tpu.memory_space<vmem>>, vector<1x32x32xf32>
    %44 = vector.shape_cast %43 : vector<1x32x32xf32> to vector<32x32xf32>
    %c0_40 = arith.constant 0 : index
    %c0_41 = arith.constant 0 : index
    %c0_42 = arith.constant 0 : index
    %45 = vector.load %arg13[%c0_40, %c0_41, %c0_42] : memref<2x1x32xf32, #tpu.memory_space<vmem>>, vector<1x1x32xf32>
    %46 = vector.shape_cast %45 : vector<1x1x32xf32> to vector<1x32xf32>
    %cst_43 = arith.constant dense<0.000000e+00> : vector<16x32xf32>
    %47 = tpu.matmul %29, %32, %cst_43 {dimension_numbers = #tpu.dot_dimension_numbers<[1], [0], [0], [1], [0, 0, 1, 1], [], []>} : vector<16x32xf32>, vector<32x32xf32>, vector<16x32xf32> -> vector<16x32xf32>
    %48 = vector.broadcast %34 : vector<1x32xf32> to vector<16x32xf32>
    %49 = arith.addf %47, %48 : vector<16x32xf32>
    %cst_44 = arith.constant dense<0.000000e+00> : vector<16x32xf32>
    %50 = tpu.matmul %29, %36, %cst_44 {dimension_numbers = #tpu.dot_dimension_numbers<[1], [0], [0], [1], [0, 0, 1, 1], [], []>} : vector<16x32xf32>, vector<32x32xf32>, vector<16x32xf32> -> vector<16x32xf32>
    %51 = vector.broadcast %38 : vector<1x32xf32> to vector<16x32xf32>
    %52 = arith.addf %50, %51 : vector<16x32xf32>
    %cst_45 = arith.constant dense<0.000000e+00> : vector<16x32xf32>
    %53 = tpu.matmul %29, %40, %cst_45 {dimension_numbers = #tpu.dot_dimension_numbers<[1], [0], [0], [1], [0, 0, 1, 1], [], []>} : vector<16x32xf32>, vector<32x32xf32>, vector<16x32xf32> -> vector<16x32xf32>
    %54 = vector.broadcast %42 : vector<1x32xf32> to vector<16x32xf32>
    %55 = arith.addf %53, %54 : vector<16x32xf32>
    %56 = vector.shape_cast %49 : vector<16x32xf32> to vector<2x8x32xf32>
    %57 = vector.shape_cast %52 : vector<16x32xf32> to vector<2x8x32xf32>
    %58 = vector.shape_cast %55 : vector<16x32xf32> to vector<2x8x32xf32>
    %cst_46 = arith.constant 0.000000e+00 : f32
    %59 = vector.broadcast %cst_46 : f32 to vector<16x32xf32>
    %60 = vector.extract_strided_slice %56 {offsets = [0, 0, 0], sizes = [2, 8, 8], strides = [1, 1, 1]} : vector<2x8x32xf32> to vector<2x8x8xf32>
    %61 = vector.extract_strided_slice %57 {offsets = [0, 0, 0], sizes = [2, 8, 8], strides = [1, 1, 1]} : vector<2x8x32xf32> to vector<2x8x8xf32>
    %62 = vector.extract_strided_slice %58 {offsets = [0, 0, 0], sizes = [2, 8, 8], strides = [1, 1, 1]} : vector<2x8x32xf32> to vector<2x8x8xf32>
    "tpu.trace_start"() <{level = 10 : i32, message = "bqd,bkd->bqk"}> : () -> ()
    %cst_47 = arith.constant dense<0.000000e+00> : vector<2x8x8xf32>
    %63 = tpu.matmul %60, %61, %cst_47 {dimension_numbers = #tpu.dot_dimension_numbers<[2], [2], [1], [1], [0, 0, 0, 1, 1, 1], [0], [0]>} : vector<2x8x8xf32>, vector<2x8x8xf32>, vector<2x8x8xf32> -> vector<2x8x8xf32>
    "tpu.trace_stop"() : () -> ()
    %cst_48 = arith.constant 0.353553385 : f32
    %64 = vector.broadcast %cst_48 : f32 to vector<2x8x8xf32>
    %65 = arith.mulf %63, %64 : vector<2x8x8xf32>
    %66 = vector.broadcast %30 : vector<2x1x8xf32> to vector<2x8x8xf32>
    %67 = arith.addf %65, %66 : vector<2x8x8xf32>
    %cst_49 = arith.constant dense<0xFF800000> : vector<2x8xf32>
    %68 = vector.multi_reduction <maximumf>, %67, %cst_49 [2] : vector<2x8x8xf32> to vector<2x8xf32>
    %69 = vector.shape_cast %68 : vector<2x8xf32> to vector<2x8x1xf32>
    %70 = vector.broadcast %69 : vector<2x8x1xf32> to vector<2x8x8xf32>
    %71 = arith.subf %67, %70 : vector<2x8x8xf32>
    %72 = math.exp %71 : vector<2x8x8xf32>
    %cst_50 = arith.constant dense<0.000000e+00> : vector<2x8xf32>
    %73 = vector.multi_reduction <add>, %72, %cst_50 [2] : vector<2x8x8xf32> to vector<2x8xf32>
    %74 = vector.shape_cast %73 : vector<2x8xf32> to vector<2x8x1xf32>
    %75 = tpu.reciprocal %74 {approx = true} : vector<2x8x1xf32> -> vector<2x8x1xf32>
    %76 = vector.broadcast %75 : vector<2x8x1xf32> to vector<2x8x8xf32>
    %77 = arith.mulf %72, %76 : vector<2x8x8xf32>
    "tpu.trace_start"() <{level = 10 : i32, message = "bqk,bkd->bqd"}> : () -> ()
    %cst_51 = arith.constant dense<0.000000e+00> : vector<2x8x8xf32>
    %78 = tpu.matmul %77, %62, %cst_51 {dimension_numbers = #tpu.dot_dimension_numbers<[2], [1], [1], [2], [0, 0, 0, 1, 1, 2], [0], [0]>} : vector<2x8x8xf32>, vector<2x8x8xf32>, vector<2x8x8xf32> -> vector<2x8x8xf32>
    "tpu.trace_stop"() : () -> ()
    %79 = vector.shape_cast %78 : vector<2x8x8xf32> to vector<16x8xf32>
    %80 = vector.extract_strided_slice %44 {offsets = [0, 0], sizes = [8, 32], strides = [1, 1]} : vector<32x32xf32> to vector<8x32xf32>
    %cst_52 = arith.constant dense<0.000000e+00> : vector<16x32xf32>
    %81 = tpu.matmul %79, %80, %cst_52 {dimension_numbers = #tpu.dot_dimension_numbers<[1], [0], [0], [1], [0, 0, 1, 1], [], []>} : vector<16x8xf32>, vector<8x32xf32>, vector<16x32xf32> -> vector<16x32xf32>
    %82 = arith.addf %59, %81 : vector<16x32xf32>
    %83 = vector.extract_strided_slice %56 {offsets = [0, 0, 8], sizes = [2, 8, 8], strides = [1, 1, 1]} : vector<2x8x32xf32> to vector<2x8x8xf32>
    %84 = vector.extract_strided_slice %57 {offsets = [0, 0, 8], sizes = [2, 8, 8], strides = [1, 1, 1]} : vector<2x8x32xf32> to vector<2x8x8xf32>
    %85 = vector.extract_strided_slice %58 {offsets = [0, 0, 8], sizes = [2, 8, 8], strides = [1, 1, 1]} : vector<2x8x32xf32> to vector<2x8x8xf32>
    "tpu.trace_start"() <{level = 10 : i32, message = "bqd,bkd->bqk"}> : () -> ()
    %cst_53 = arith.constant dense<0.000000e+00> : vector<2x8x8xf32>
    %86 = tpu.matmul %83, %84, %cst_53 {dimension_numbers = #tpu.dot_dimension_numbers<[2], [2], [1], [1], [0, 0, 0, 1, 1, 1], [0], [0]>} : vector<2x8x8xf32>, vector<2x8x8xf32>, vector<2x8x8xf32> -> vector<2x8x8xf32>
    "tpu.trace_stop"() : () -> ()
    %cst_54 = arith.constant 0.353553385 : f32
    %87 = vector.broadcast %cst_54 : f32 to vector<2x8x8xf32>
    %88 = arith.mulf %86, %87 : vector<2x8x8xf32>
    %89 = vector.broadcast %30 : vector<2x1x8xf32> to vector<2x8x8xf32>
    %90 = arith.addf %88, %89 : vector<2x8x8xf32>
    %cst_55 = arith.constant dense<0xFF800000> : vector<2x8xf32>
    %91 = vector.multi_reduction <maximumf>, %90, %cst_55 [2] : vector<2x8x8xf32> to vector<2x8xf32>
    %92 = vector.shape_cast %91 : vector<2x8xf32> to vector<2x8x1xf32>
    %93 = vector.broadcast %92 : vector<2x8x1xf32> to vector<2x8x8xf32>
    %94 = arith.subf %90, %93 : vector<2x8x8xf32>
    %95 = math.exp %94 : vector<2x8x8xf32>
    %cst_56 = arith.constant dense<0.000000e+00> : vector<2x8xf32>
    %96 = vector.multi_reduction <add>, %95, %cst_56 [2] : vector<2x8x8xf32> to vector<2x8xf32>
    %97 = vector.shape_cast %96 : vector<2x8xf32> to vector<2x8x1xf32>
    %98 = tpu.reciprocal %97 {approx = true} : vector<2x8x1xf32> -> vector<2x8x1xf32>
    %99 = vector.broadcast %98 : vector<2x8x1xf32> to vector<2x8x8xf32>
    %100 = arith.mulf %95, %99 : vector<2x8x8xf32>
    "tpu.trace_start"() <{level = 10 : i32, message = "bqk,bkd->bqd"}> : () -> ()
    %cst_57 = arith.constant dense<0.000000e+00> : vector<2x8x8xf32>
    %101 = tpu.matmul %100, %85, %cst_57 {dimension_numbers = #tpu.dot_dimension_numbers<[2], [1], [1], [2], [0, 0, 0, 1, 1, 2], [0], [0]>} : vector<2x8x8xf32>, vector<2x8x8xf32>, vector<2x8x8xf32> -> vector<2x8x8xf32>
    "tpu.trace_stop"() : () -> ()
    %102 = vector.shape_cast %101 : vector<2x8x8xf32> to vector<16x8xf32>
    %103 = vector.extract_strided_slice %44 {offsets = [8, 0], sizes = [8, 32], strides = [1, 1]} : vector<32x32xf32> to vector<8x32xf32>
    %cst_58 = arith.constant dense<0.000000e+00> : vector<16x32xf32>
    %104 = tpu.matmul %102, %103, %cst_58 {dimension_numbers = #tpu.dot_dimension_numbers<[1], [0], [0], [1], [0, 0, 1, 1], [], []>} : vector<16x8xf32>, vector<8x32xf32>, vector<16x32xf32> -> vector<16x32xf32>
    %105 = arith.addf %82, %104 : vector<16x32xf32>
    %106 = vector.extract_strided_slice %56 {offsets = [0, 0, 16], sizes = [2, 8, 8], strides = [1, 1, 1]} : vector<2x8x32xf32> to vector<2x8x8xf32>
    %107 = vector.extract_strided_slice %57 {offsets = [0, 0, 16], sizes = [2, 8, 8], strides = [1, 1, 1]} : vector<2x8x32xf32> to vector<2x8x8xf32>
    %108 = vector.extract_strided_slice %58 {offsets = [0, 0, 16], sizes = [2, 8, 8], strides = [1, 1, 1]} : vector<2x8x32xf32> to vector<2x8x8xf32>
    "tpu.trace_start"() <{level = 10 : i32, message = "bqd,bkd->bqk"}> : () -> ()
    %cst_59 = arith.constant dense<0.000000e+00> : vector<2x8x8xf32>
    %109 = tpu.matmul %106, %107, %cst_59 {dimension_numbers = #tpu.dot_dimension_numbers<[2], [2], [1], [1], [0, 0, 0, 1, 1, 1], [0], [0]>} : vector<2x8x8xf32>, vector<2x8x8xf32>, vector<2x8x8xf32> -> vector<2x8x8xf32>
    "tpu.trace_stop"() : () -> ()
    %cst_60 = arith.constant 0.353553385 : f32
    %110 = vector.broadcast %cst_60 : f32 to vector<2x8x8xf32>
    %111 = arith.mulf %109, %110 : vector<2x8x8xf32>
    %112 = vector.broadcast %30 : vector<2x1x8xf32> to vector<2x8x8xf32>
    %113 = arith.addf %111, %112 : vector<2x8x8xf32>
    %cst_61 = arith.constant dense<0xFF800000> : vector<2x8xf32>
    %114 = vector.multi_reduction <maximumf>, %113, %cst_61 [2] : vector<2x8x8xf32> to vector<2x8xf32>
    %115 = vector.shape_cast %114 : vector<2x8xf32> to vector<2x8x1xf32>
    %116 = vector.broadcast %115 : vector<2x8x1xf32> to vector<2x8x8xf32>
    %117 = arith.subf %113, %116 : vector<2x8x8xf32>
    %118 = math.exp %117 : vector<2x8x8xf32>
    %cst_62 = arith.constant dense<0.000000e+00> : vector<2x8xf32>
    %119 = vector.multi_reduction <add>, %118, %cst_62 [2] : vector<2x8x8xf32> to vector<2x8xf32>
    %120 = vector.shape_cast %119 : vector<2x8xf32> to vector<2x8x1xf32>
    %121 = tpu.reciprocal %120 {approx = true} : vector<2x8x1xf32> -> vector<2x8x1xf32>
    %122 = vector.broadcast %121 : vector<2x8x1xf32> to vector<2x8x8xf32>
    %123 = arith.mulf %118, %122 : vector<2x8x8xf32>
    "tpu.trace_start"() <{level = 10 : i32, message = "bqk,bkd->bqd"}> : () -> ()
    %cst_63 = arith.constant dense<0.000000e+00> : vector<2x8x8xf32>
    %124 = tpu.matmul %123, %108, %cst_63 {dimension_numbers = #tpu.dot_dimension_numbers<[2], [1], [1], [2], [0, 0, 0, 1, 1, 2], [0], [0]>} : vector<2x8x8xf32>, vector<2x8x8xf32>, vector<2x8x8xf32> -> vector<2x8x8xf32>
    "tpu.trace_stop"() : () -> ()
    %125 = vector.shape_cast %124 : vector<2x8x8xf32> to vector<16x8xf32>
    %126 = vector.extract_strided_slice %44 {offsets = [16, 0], sizes = [8, 32], strides = [1, 1]} : vector<32x32xf32> to vector<8x32xf32>
    %cst_64 = arith.constant dense<0.000000e+00> : vector<16x32xf32>
    %127 = tpu.matmul %125, %126, %cst_64 {dimension_numbers = #tpu.dot_dimension_numbers<[1], [0], [0], [1], [0, 0, 1, 1], [], []>} : vector<16x8xf32>, vector<8x32xf32>, vector<16x32xf32> -> vector<16x32xf32>
    %128 = arith.addf %105, %127 : vector<16x32xf32>
    %129 = vector.extract_strided_slice %56 {offsets = [0, 0, 24], sizes = [2, 8, 8], strides = [1, 1, 1]} : vector<2x8x32xf32> to vector<2x8x8xf32>
    %130 = vector.extract_strided_slice %57 {offsets = [0, 0, 24], sizes = [2, 8, 8], strides = [1, 1, 1]} : vector<2x8x32xf32> to vector<2x8x8xf32>
    %131 = vector.extract_strided_slice %58 {offsets = [0, 0, 24], sizes = [2, 8, 8], strides = [1, 1, 1]} : vector<2x8x32xf32> to vector<2x8x8xf32>
    "tpu.trace_start"() <{level = 10 : i32, message = "bqd,bkd->bqk"}> : () -> ()
    %cst_65 = arith.constant dense<0.000000e+00> : vector<2x8x8xf32>
    %132 = tpu.matmul %129, %130, %cst_65 {dimension_numbers = #tpu.dot_dimension_numbers<[2], [2], [1], [1], [0, 0, 0, 1, 1, 1], [0], [0]>} : vector<2x8x8xf32>, vector<2x8x8xf32>, vector<2x8x8xf32> -> vector<2x8x8xf32>
    "tpu.trace_stop"() : () -> ()
    %cst_66 = arith.constant 0.353553385 : f32
    %133 = vector.broadcast %cst_66 : f32 to vector<2x8x8xf32>
    %134 = arith.mulf %132, %133 : vector<2x8x8xf32>
    %135 = vector.broadcast %30 : vector<2x1x8xf32> to vector<2x8x8xf32>
    %136 = arith.addf %134, %135 : vector<2x8x8xf32>
    %cst_67 = arith.constant dense<0xFF800000> : vector<2x8xf32>
    %137 = vector.multi_reduction <maximumf>, %136, %cst_67 [2] : vector<2x8x8xf32> to vector<2x8xf32>
    %138 = vector.shape_cast %137 : vector<2x8xf32> to vector<2x8x1xf32>
    %139 = vector.broadcast %138 : vector<2x8x1xf32> to vector<2x8x8xf32>
    %140 = arith.subf %136, %139 : vector<2x8x8xf32>
    %141 = math.exp %140 : vector<2x8x8xf32>
    %cst_68 = arith.constant dense<0.000000e+00> : vector<2x8xf32>
    %142 = vector.multi_reduction <add>, %141, %cst_68 [2] : vector<2x8x8xf32> to vector<2x8xf32>
    %143 = vector.shape_cast %142 : vector<2x8xf32> to vector<2x8x1xf32>
    %144 = tpu.reciprocal %143 {approx = true} : vector<2x8x1xf32> -> vector<2x8x1xf32>
    %145 = vector.broadcast %144 : vector<2x8x1xf32> to vector<2x8x8xf32>
    %146 = arith.mulf %141, %145 : vector<2x8x8xf32>
    "tpu.trace_start"() <{level = 10 : i32, message = "bqk,bkd->bqd"}> : () -> ()
    %cst_69 = arith.constant dense<0.000000e+00> : vector<2x8x8xf32>
    %147 = tpu.matmul %146, %131, %cst_69 {dimension_numbers = #tpu.dot_dimension_numbers<[2], [1], [1], [2], [0, 0, 0, 1, 1, 2], [0], [0]>} : vector<2x8x8xf32>, vector<2x8x8xf32>, vector<2x8x8xf32> -> vector<2x8x8xf32>
    "tpu.trace_stop"() : () -> ()
    %148 = vector.shape_cast %147 : vector<2x8x8xf32> to vector<16x8xf32>
    %149 = vector.extract_strided_slice %44 {offsets = [24, 0], sizes = [8, 32], strides = [1, 1]} : vector<32x32xf32> to vector<8x32xf32>
    %cst_70 = arith.constant dense<0.000000e+00> : vector<16x32xf32>
    %150 = tpu.matmul %148, %149, %cst_70 {dimension_numbers = #tpu.dot_dimension_numbers<[1], [0], [0], [1], [0, 0, 1, 1], [], []>} : vector<16x8xf32>, vector<8x32xf32>, vector<16x32xf32> -> vector<16x32xf32>
    %151 = arith.addf %128, %150 : vector<16x32xf32>
    %152 = vector.broadcast %46 : vector<1x32xf32> to vector<16x32xf32>
    %153 = arith.addf %151, %152 : vector<16x32xf32>
    %154 = arith.addf %29, %153 : vector<16x32xf32>
    %c0_71 = arith.constant 0 : index
    %c0_72 = arith.constant 0 : index
    %c0_73 = arith.constant 0 : index
    %155 = vector.load %arg14[%c0_71, %c0_72, %c0_73] : memref<2x1x32xf32, #tpu.memory_space<vmem>>, vector<1x1x32xf32>
    %156 = vector.shape_cast %155 : vector<1x1x32xf32> to vector<1x32xf32>
    %c0_74 = arith.constant 0 : index
    %c0_75 = arith.constant 0 : index
    %c0_76 = arith.constant 0 : index
    %157 = vector.load %arg15[%c0_74, %c0_75, %c0_76] : memref<2x1x32xf32, #tpu.memory_space<vmem>>, vector<1x1x32xf32>
    %158 = vector.shape_cast %157 : vector<1x1x32xf32> to vector<1x32xf32>
    %cst_77 = arith.constant dense<0.000000e+00> : vector<16xf32>
    %159 = vector.multi_reduction <add>, %154, %cst_77 [1] : vector<16x32xf32> to vector<16xf32>
    %160 = vector.shape_cast %159 : vector<16xf32> to vector<16x1xf32>
    %cst_78 = arith.constant 3.200000e+01 : f32
    %161 = vector.broadcast %cst_78 : f32 to vector<16x1xf32>
    %162 = arith.divf %160, %161 : vector<16x1xf32>
    %163 = vector.broadcast %162 : vector<16x1xf32> to vector<16x32xf32>
    %164 = arith.subf %154, %163 : vector<16x32xf32>
    %165 = arith.mulf %164, %164 : vector<16x32xf32>
    %cst_79 = arith.constant dense<0.000000e+00> : vector<16xf32>
    %166 = vector.multi_reduction <add>, %165, %cst_79 [1] : vector<16x32xf32> to vector<16xf32>
    %167 = vector.shape_cast %166 : vector<16xf32> to vector<16x1xf32>
    %cst_80 = arith.constant 3.200000e+01 : f32
    %168 = vector.broadcast %cst_80 : f32 to vector<16x1xf32>
    %169 = arith.divf %167, %168 : vector<16x1xf32>
    %170 = vector.broadcast %162 : vector<16x1xf32> to vector<16x32xf32>
    %171 = arith.subf %154, %170 : vector<16x32xf32>
    %cst_81 = arith.constant 9.99999996E-13 : f32
    %172 = vector.broadcast %cst_81 : f32 to vector<16x1xf32>
    %173 = arith.addf %169, %172 : vector<16x1xf32>
    %174 = math.rsqrt %173 : vector<16x1xf32>
    %175 = vector.broadcast %174 : vector<16x1xf32> to vector<16x32xf32>
    %176 = arith.mulf %171, %175 : vector<16x32xf32>
    %177 = vector.broadcast %156 : vector<1x32xf32> to vector<16x32xf32>
    %178 = arith.mulf %176, %177 : vector<16x32xf32>
    %179 = vector.broadcast %158 : vector<1x32xf32> to vector<16x32xf32>
    %180 = arith.addf %178, %179 : vector<16x32xf32>
    %c0_82 = arith.constant 0 : index
    %c0_83 = arith.constant 0 : index
    %c0_84 = arith.constant 0 : index
    %181 = vector.load %arg16[%c0_82, %c0_83, %c0_84] : memref<2x32x64xf32, #tpu.memory_space<vmem>>, vector<1x32x64xf32>
    %182 = vector.shape_cast %181 : vector<1x32x64xf32> to vector<32x64xf32>
    %cst_85 = arith.constant dense<0.000000e+00> : vector<16x64xf32>
    %183 = tpu.matmul %180, %182, %cst_85 {dimension_numbers = #tpu.dot_dimension_numbers<[1], [0], [0], [1], [0, 0, 1, 1], [], []>} : vector<16x32xf32>, vector<32x64xf32>, vector<16x64xf32> -> vector<16x64xf32>
    %c0_86 = arith.constant 0 : index
    %c0_87 = arith.constant 0 : index
    %c0_88 = arith.constant 0 : index
    %184 = vector.load %arg17[%c0_86, %c0_87, %c0_88] : memref<2x1x64xf32, #tpu.memory_space<vmem>>, vector<1x1x64xf32>
    %185 = vector.shape_cast %184 : vector<1x1x64xf32> to vector<1x64xf32>
    %186 = vector.broadcast %185 : vector<1x64xf32> to vector<16x64xf32>
    %187 = arith.addf %183, %186 : vector<16x64xf32>
    %cst_89 = arith.constant 5.000000e-01 : f32
    %188 = vector.broadcast %cst_89 : f32 to vector<16x64xf32>
    %189 = arith.mulf %188, %187 : vector<16x64xf32>
    %cst_90 = arith.constant 4.471500e-02 : f32
    %190 = vector.broadcast %cst_90 : f32 to vector<16x64xf32>
    %191 = arith.mulf %190, %187 : vector<16x64xf32>
    %192 = arith.mulf %191, %187 : vector<16x64xf32>
    %193 = arith.mulf %192, %187 : vector<16x64xf32>
    %194 = arith.addf %187, %193 : vector<16x64xf32>
    %cst_91 = arith.constant 0.797884583 : f32
    %195 = vector.broadcast %cst_91 : f32 to vector<16x64xf32>
    %196 = arith.mulf %195, %194 : vector<16x64xf32>
    %197 = math.tanh %196 : vector<16x64xf32>
    %cst_92 = arith.constant 1.000000e+00 : f32
    %198 = vector.broadcast %cst_92 : f32 to vector<16x64xf32>
    %199 = arith.addf %198, %197 : vector<16x64xf32>
    %200 = arith.mulf %189, %199 : vector<16x64xf32>
    %c0_93 = arith.constant 0 : index
    %c0_94 = arith.constant 0 : index
    %c0_95 = arith.constant 0 : index
    %201 = vector.load %arg18[%c0_93, %c0_94, %c0_95] : memref<2x64x32xf32, #tpu.memory_space<vmem>>, vector<1x64x32xf32>
    %202 = vector.shape_cast %201 : vector<1x64x32xf32> to vector<64x32xf32>
    %cst_96 = arith.constant dense<0.000000e+00> : vector<16x32xf32>
    %203 = tpu.matmul %200, %202, %cst_96 {dimension_numbers = #tpu.dot_dimension_numbers<[1], [0], [0], [1], [0, 0, 1, 1], [], []>} : vector<16x64xf32>, vector<64x32xf32>, vector<16x32xf32> -> vector<16x32xf32>
    %c0_97 = arith.constant 0 : index
    %c0_98 = arith.constant 0 : index
    %c0_99 = arith.constant 0 : index
    %204 = vector.load %arg19[%c0_97, %c0_98, %c0_99] : memref<2x1x32xf32, #tpu.memory_space<vmem>>, vector<1x1x32xf32>
    %205 = vector.shape_cast %204 : vector<1x1x32xf32> to vector<1x32xf32>
    %206 = vector.broadcast %205 : vector<1x32xf32> to vector<16x32xf32>
    %207 = arith.addf %203, %206 : vector<16x32xf32>
    %208 = arith.addf %180, %207 : vector<16x32xf32>
    %c0_100 = arith.constant 0 : index
    %c0_101 = arith.constant 0 : index
    %c0_102 = arith.constant 0 : index
    %209 = vector.load %arg20[%c0_100, %c0_101, %c0_102] : memref<2x1x32xf32, #tpu.memory_space<vmem>>, vector<1x1x32xf32>
    %210 = vector.shape_cast %209 : vector<1x1x32xf32> to vector<1x32xf32>
    %c0_103 = arith.constant 0 : index
    %c0_104 = arith.constant 0 : index
    %c0_105 = arith.constant 0 : index
    %211 = vector.load %arg21[%c0_103, %c0_104, %c0_105] : memref<2x1x32xf32, #tpu.memory_space<vmem>>, vector<1x1x32xf32>
    %212 = vector.shape_cast %211 : vector<1x1x32xf32> to vector<1x32xf32>
    %cst_106 = arith.constant dense<0.000000e+00> : vector<16xf32>
    %213 = vector.multi_reduction <add>, %208, %cst_106 [1] : vector<16x32xf32> to vector<16xf32>
    %214 = vector.shape_cast %213 : vector<16xf32> to vector<16x1xf32>
    %cst_107 = arith.constant 3.200000e+01 : f32
    %215 = vector.broadcast %cst_107 : f32 to vector<16x1xf32>
    %216 = arith.divf %214, %215 : vector<16x1xf32>
    %217 = vector.broadcast %216 : vector<16x1xf32> to vector<16x32xf32>
    %218 = arith.subf %208, %217 : vector<16x32xf32>
    %219 = arith.mulf %218, %218 : vector<16x32xf32>
    %cst_108 = arith.constant dense<0.000000e+00> : vector<16xf32>
    %220 = vector.multi_reduction <add>, %219, %cst_108 [1] : vector<16x32xf32> to vector<16xf32>
    %221 = vector.shape_cast %220 : vector<16xf32> to vector<16x1xf32>
    %cst_109 = arith.constant 3.200000e+01 : f32
    %222 = vector.broadcast %cst_109 : f32 to vector<16x1xf32>
    %223 = arith.divf %221, %222 : vector<16x1xf32>
    %224 = vector.broadcast %216 : vector<16x1xf32> to vector<16x32xf32>
    %225 = arith.subf %208, %224 : vector<16x32xf32>
    %cst_110 = arith.constant 9.99999996E-13 : f32
    %226 = vector.broadcast %cst_110 : f32 to vector<16x1xf32>
    %227 = arith.addf %223, %226 : vector<16x1xf32>
    %228 = math.rsqrt %227 : vector<16x1xf32>
    %229 = vector.broadcast %228 : vector<16x1xf32> to vector<16x32xf32>
    %230 = arith.mulf %225, %229 : vector<16x32xf32>
    %231 = vector.broadcast %210 : vector<1x32xf32> to vector<16x32xf32>
    %232 = arith.mulf %230, %231 : vector<16x32xf32>
    %233 = vector.broadcast %212 : vector<1x32xf32> to vector<16x32xf32>
    %234 = arith.addf %232, %233 : vector<16x32xf32>
    %c1 = arith.constant 1 : index
    %c0_111 = arith.constant 0 : index
    %c0_112 = arith.constant 0 : index
    %235 = vector.load %arg6[%c1, %c0_111, %c0_112] : memref<2x32x32xf32, #tpu.memory_space<vmem>>, vector<1x32x32xf32>
    %236 = vector.shape_cast %235 : vector<1x32x32xf32> to vector<32x32xf32>
    %c1_113 = arith.constant 1 : index
    %c0_114 = arith.constant 0 : index
    %c0_115 = arith.constant 0 : index
    %237 = vector.load %arg7[%c1_113, %c0_114, %c0_115] : memref<2x1x32xf32, #tpu.memory_space<vmem>>, vector<1x1x32xf32>
    %238 = vector.shape_cast %237 : vector<1x1x32xf32> to vector<1x32xf32>
    %c1_116 = arith.constant 1 : index
    %c0_117 = arith.constant 0 : index
    %c0_118 = arith.constant 0 : index
    %239 = vector.load %arg8[%c1_116, %c0_117, %c0_118] : memref<2x32x32xf32, #tpu.memory_space<vmem>>, vector<1x32x32xf32>
    %240 = vector.shape_cast %239 : vector<1x32x32xf32> to vector<32x32xf32>
    %c1_119 = arith.constant 1 : index
    %c0_120 = arith.constant 0 : index
    %c0_121 = arith.constant 0 : index
    %241 = vector.load %arg9[%c1_119, %c0_120, %c0_121] : memref<2x1x32xf32, #tpu.memory_space<vmem>>, vector<1x1x32xf32>
    %242 = vector.shape_cast %241 : vector<1x1x32xf32> to vector<1x32xf32>
    %c1_122 = arith.constant 1 : index
    %c0_123 = arith.constant 0 : index
    %c0_124 = arith.constant 0 : index
    %243 = vector.load %arg10[%c1_122, %c0_123, %c0_124] : memref<2x32x32xf32, #tpu.memory_space<vmem>>, vector<1x32x32xf32>
    %244 = vector.shape_cast %243 : vector<1x32x32xf32> to vector<32x32xf32>
    %c1_125 = arith.constant 1 : index
    %c0_126 = arith.constant 0 : index
    %c0_127 = arith.constant 0 : index
    %245 = vector.load %arg11[%c1_125, %c0_126, %c0_127] : memref<2x1x32xf32, #tpu.memory_space<vmem>>, vector<1x1x32xf32>
    %246 = vector.shape_cast %245 : vector<1x1x32xf32> to vector<1x32xf32>
    %c1_128 = arith.constant 1 : index
    %c0_129 = arith.constant 0 : index
    %c0_130 = arith.constant 0 : index
    %247 = vector.load %arg12[%c1_128, %c0_129, %c0_130] : memref<2x32x32xf32, #tpu.memory_space<vmem>>, vector<1x32x32xf32>
    %248 = vector.shape_cast %247 : vector<1x32x32xf32> to vector<32x32xf32>
    %c1_131 = arith.constant 1 : index
    %c0_132 = arith.constant 0 : index
    %c0_133 = arith.constant 0 : index
    %249 = vector.load %arg13[%c1_131, %c0_132, %c0_133] : memref<2x1x32xf32, #tpu.memory_space<vmem>>, vector<1x1x32xf32>
    %250 = vector.shape_cast %249 : vector<1x1x32xf32> to vector<1x32xf32>
    %cst_134 = arith.constant dense<0.000000e+00> : vector<16x32xf32>
    %251 = tpu.matmul %234, %236, %cst_134 {dimension_numbers = #tpu.dot_dimension_numbers<[1], [0], [0], [1], [0, 0, 1, 1], [], []>} : vector<16x32xf32>, vector<32x32xf32>, vector<16x32xf32> -> vector<16x32xf32>
    %252 = vector.broadcast %238 : vector<1x32xf32> to vector<16x32xf32>
    %253 = arith.addf %251, %252 : vector<16x32xf32>
    %cst_135 = arith.constant dense<0.000000e+00> : vector<16x32xf32>
    %254 = tpu.matmul %234, %240, %cst_135 {dimension_numbers = #tpu.dot_dimension_numbers<[1], [0], [0], [1], [0, 0, 1, 1], [], []>} : vector<16x32xf32>, vector<32x32xf32>, vector<16x32xf32> -> vector<16x32xf32>
    %255 = vector.broadcast %242 : vector<1x32xf32> to vector<16x32xf32>
    %256 = arith.addf %254, %255 : vector<16x32xf32>
    %cst_136 = arith.constant dense<0.000000e+00> : vector<16x32xf32>
    %257 = tpu.matmul %234, %244, %cst_136 {dimension_numbers = #tpu.dot_dimension_numbers<[1], [0], [0], [1], [0, 0, 1, 1], [], []>} : vector<16x32xf32>, vector<32x32xf32>, vector<16x32xf32> -> vector<16x32xf32>
    %258 = vector.broadcast %246 : vector<1x32xf32> to vector<16x32xf32>
    %259 = arith.addf %257, %258 : vector<16x32xf32>
    %260 = vector.shape_cast %253 : vector<16x32xf32> to vector<2x8x32xf32>
    %261 = vector.shape_cast %256 : vector<16x32xf32> to vector<2x8x32xf32>
    %262 = vector.shape_cast %259 : vector<16x32xf32> to vector<2x8x32xf32>
    %cst_137 = arith.constant 0.000000e+00 : f32
    %263 = vector.broadcast %cst_137 : f32 to vector<16x32xf32>
    %264 = vector.extract_strided_slice %260 {offsets = [0, 0, 0], sizes = [2, 8, 8], strides = [1, 1, 1]} : vector<2x8x32xf32> to vector<2x8x8xf32>
    %265 = vector.extract_strided_slice %261 {offsets = [0, 0, 0], sizes = [2, 8, 8], strides = [1, 1, 1]} : vector<2x8x32xf32> to vector<2x8x8xf32>
    %266 = vector.extract_strided_slice %262 {offsets = [0, 0, 0], sizes = [2, 8, 8], strides = [1, 1, 1]} : vector<2x8x32xf32> to vector<2x8x8xf32>
    "tpu.trace_start"() <{level = 10 : i32, message = "bqd,bkd->bqk"}> : () -> ()
    %cst_138 = arith.constant dense<0.000000e+00> : vector<2x8x8xf32>
    %267 = tpu.matmul %264, %265, %cst_138 {dimension_numbers = #tpu.dot_dimension_numbers<[2], [2], [1], [1], [0, 0, 0, 1, 1, 1], [0], [0]>} : vector<2x8x8xf32>, vector<2x8x8xf32>, vector<2x8x8xf32> -> vector<2x8x8xf32>
    "tpu.trace_stop"() : () -> ()
    %cst_139 = arith.constant 0.353553385 : f32
    %268 = vector.broadcast %cst_139 : f32 to vector<2x8x8xf32>
    %269 = arith.mulf %267, %268 : vector<2x8x8xf32>
    %270 = vector.broadcast %30 : vector<2x1x8xf32> to vector<2x8x8xf32>
    %271 = arith.addf %269, %270 : vector<2x8x8xf32>
    %cst_140 = arith.constant dense<0xFF800000> : vector<2x8xf32>
    %272 = vector.multi_reduction <maximumf>, %271, %cst_140 [2] : vector<2x8x8xf32> to vector<2x8xf32>
    %273 = vector.shape_cast %272 : vector<2x8xf32> to vector<2x8x1xf32>
    %274 = vector.broadcast %273 : vector<2x8x1xf32> to vector<2x8x8xf32>
    %275 = arith.subf %271, %274 : vector<2x8x8xf32>
    %276 = math.exp %275 : vector<2x8x8xf32>
    %cst_141 = arith.constant dense<0.000000e+00> : vector<2x8xf32>
    %277 = vector.multi_reduction <add>, %276, %cst_141 [2] : vector<2x8x8xf32> to vector<2x8xf32>
    %278 = vector.shape_cast %277 : vector<2x8xf32> to vector<2x8x1xf32>
    %279 = tpu.reciprocal %278 {approx = true} : vector<2x8x1xf32> -> vector<2x8x1xf32>
    %280 = vector.broadcast %279 : vector<2x8x1xf32> to vector<2x8x8xf32>
    %281 = arith.mulf %276, %280 : vector<2x8x8xf32>
    "tpu.trace_start"() <{level = 10 : i32, message = "bqk,bkd->bqd"}> : () -> ()
    %cst_142 = arith.constant dense<0.000000e+00> : vector<2x8x8xf32>
    %282 = tpu.matmul %281, %266, %cst_142 {dimension_numbers = #tpu.dot_dimension_numbers<[2], [1], [1], [2], [0, 0, 0, 1, 1, 2], [0], [0]>} : vector<2x8x8xf32>, vector<2x8x8xf32>, vector<2x8x8xf32> -> vector<2x8x8xf32>
    "tpu.trace_stop"() : () -> ()
    %283 = vector.shape_cast %282 : vector<2x8x8xf32> to vector<16x8xf32>
    %284 = vector.extract_strided_slice %248 {offsets = [0, 0], sizes = [8, 32], strides = [1, 1]} : vector<32x32xf32> to vector<8x32xf32>
    %cst_143 = arith.constant dense<0.000000e+00> : vector<16x32xf32>
    %285 = tpu.matmul %283, %284, %cst_143 {dimension_numbers = #tpu.dot_dimension_numbers<[1], [0], [0], [1], [0, 0, 1, 1], [], []>} : vector<16x8xf32>, vector<8x32xf32>, vector<16x32xf32> -> vector<16x32xf32>
    %286 = arith.addf %263, %285 : vector<16x32xf32>
    %287 = vector.extract_strided_slice %260 {offsets = [0, 0, 8], sizes = [2, 8, 8], strides = [1, 1, 1]} : vector<2x8x32xf32> to vector<2x8x8xf32>
    %288 = vector.extract_strided_slice %261 {offsets = [0, 0, 8], sizes = [2, 8, 8], strides = [1, 1, 1]} : vector<2x8x32xf32> to vector<2x8x8xf32>
    %289 = vector.extract_strided_slice %262 {offsets = [0, 0, 8], sizes = [2, 8, 8], strides = [1, 1, 1]} : vector<2x8x32xf32> to vector<2x8x8xf32>
    "tpu.trace_start"() <{level = 10 : i32, message = "bqd,bkd->bqk"}> : () -> ()
    %cst_144 = arith.constant dense<0.000000e+00> : vector<2x8x8xf32>
    %290 = tpu.matmul %287, %288, %cst_144 {dimension_numbers = #tpu.dot_dimension_numbers<[2], [2], [1], [1], [0, 0, 0, 1, 1, 1], [0], [0]>} : vector<2x8x8xf32>, vector<2x8x8xf32>, vector<2x8x8xf32> -> vector<2x8x8xf32>
    "tpu.trace_stop"() : () -> ()
    %cst_145 = arith.constant 0.353553385 : f32
    %291 = vector.broadcast %cst_145 : f32 to vector<2x8x8xf32>
    %292 = arith.mulf %290, %291 : vector<2x8x8xf32>
    %293 = vector.broadcast %30 : vector<2x1x8xf32> to vector<2x8x8xf32>
    %294 = arith.addf %292, %293 : vector<2x8x8xf32>
    %cst_146 = arith.constant dense<0xFF800000> : vector<2x8xf32>
    %295 = vector.multi_reduction <maximumf>, %294, %cst_146 [2] : vector<2x8x8xf32> to vector<2x8xf32>
    %296 = vector.shape_cast %295 : vector<2x8xf32> to vector<2x8x1xf32>
    %297 = vector.broadcast %296 : vector<2x8x1xf32> to vector<2x8x8xf32>
    %298 = arith.subf %294, %297 : vector<2x8x8xf32>
    %299 = math.exp %298 : vector<2x8x8xf32>
    %cst_147 = arith.constant dense<0.000000e+00> : vector<2x8xf32>
    %300 = vector.multi_reduction <add>, %299, %cst_147 [2] : vector<2x8x8xf32> to vector<2x8xf32>
    %301 = vector.shape_cast %300 : vector<2x8xf32> to vector<2x8x1xf32>
    %302 = tpu.reciprocal %301 {approx = true} : vector<2x8x1xf32> -> vector<2x8x1xf32>
    %303 = vector.broadcast %302 : vector<2x8x1xf32> to vector<2x8x8xf32>
    %304 = arith.mulf %299, %303 : vector<2x8x8xf32>
    "tpu.trace_start"() <{level = 10 : i32, message = "bqk,bkd->bqd"}> : () -> ()
    %cst_148 = arith.constant dense<0.000000e+00> : vector<2x8x8xf32>
    %305 = tpu.matmul %304, %289, %cst_148 {dimension_numbers = #tpu.dot_dimension_numbers<[2], [1], [1], [2], [0, 0, 0, 1, 1, 2], [0], [0]>} : vector<2x8x8xf32>, vector<2x8x8xf32>, vector<2x8x8xf32> -> vector<2x8x8xf32>
    "tpu.trace_stop"() : () -> ()
    %306 = vector.shape_cast %305 : vector<2x8x8xf32> to vector<16x8xf32>
    %307 = vector.extract_strided_slice %248 {offsets = [8, 0], sizes = [8, 32], strides = [1, 1]} : vector<32x32xf32> to vector<8x32xf32>
    %cst_149 = arith.constant dense<0.000000e+00> : vector<16x32xf32>
    %308 = tpu.matmul %306, %307, %cst_149 {dimension_numbers = #tpu.dot_dimension_numbers<[1], [0], [0], [1], [0, 0, 1, 1], [], []>} : vector<16x8xf32>, vector<8x32xf32>, vector<16x32xf32> -> vector<16x32xf32>
    %309 = arith.addf %286, %308 : vector<16x32xf32>
    %310 = vector.extract_strided_slice %260 {offsets = [0, 0, 16], sizes = [2, 8, 8], strides = [1, 1, 1]} : vector<2x8x32xf32> to vector<2x8x8xf32>
    %311 = vector.extract_strided_slice %261 {offsets = [0, 0, 16], sizes = [2, 8, 8], strides = [1, 1, 1]} : vector<2x8x32xf32> to vector<2x8x8xf32>
    %312 = vector.extract_strided_slice %262 {offsets = [0, 0, 16], sizes = [2, 8, 8], strides = [1, 1, 1]} : vector<2x8x32xf32> to vector<2x8x8xf32>
    "tpu.trace_start"() <{level = 10 : i32, message = "bqd,bkd->bqk"}> : () -> ()
    %cst_150 = arith.constant dense<0.000000e+00> : vector<2x8x8xf32>
    %313 = tpu.matmul %310, %311, %cst_150 {dimension_numbers = #tpu.dot_dimension_numbers<[2], [2], [1], [1], [0, 0, 0, 1, 1, 1], [0], [0]>} : vector<2x8x8xf32>, vector<2x8x8xf32>, vector<2x8x8xf32> -> vector<2x8x8xf32>
    "tpu.trace_stop"() : () -> ()
    %cst_151 = arith.constant 0.353553385 : f32
    %314 = vector.broadcast %cst_151 : f32 to vector<2x8x8xf32>
    %315 = arith.mulf %313, %314 : vector<2x8x8xf32>
    %316 = vector.broadcast %30 : vector<2x1x8xf32> to vector<2x8x8xf32>
    %317 = arith.addf %315, %316 : vector<2x8x8xf32>
    %cst_152 = arith.constant dense<0xFF800000> : vector<2x8xf32>
    %318 = vector.multi_reduction <maximumf>, %317, %cst_152 [2] : vector<2x8x8xf32> to vector<2x8xf32>
    %319 = vector.shape_cast %318 : vector<2x8xf32> to vector<2x8x1xf32>
    %320 = vector.broadcast %319 : vector<2x8x1xf32> to vector<2x8x8xf32>
    %321 = arith.subf %317, %320 : vector<2x8x8xf32>
    %322 = math.exp %321 : vector<2x8x8xf32>
    %cst_153 = arith.constant dense<0.000000e+00> : vector<2x8xf32>
    %323 = vector.multi_reduction <add>, %322, %cst_153 [2] : vector<2x8x8xf32> to vector<2x8xf32>
    %324 = vector.shape_cast %323 : vector<2x8xf32> to vector<2x8x1xf32>
    %325 = tpu.reciprocal %324 {approx = true} : vector<2x8x1xf32> -> vector<2x8x1xf32>
    %326 = vector.broadcast %325 : vector<2x8x1xf32> to vector<2x8x8xf32>
    %327 = arith.mulf %322, %326 : vector<2x8x8xf32>
    "tpu.trace_start"() <{level = 10 : i32, message = "bqk,bkd->bqd"}> : () -> ()
    %cst_154 = arith.constant dense<0.000000e+00> : vector<2x8x8xf32>
    %328 = tpu.matmul %327, %312, %cst_154 {dimension_numbers = #tpu.dot_dimension_numbers<[2], [1], [1], [2], [0, 0, 0, 1, 1, 2], [0], [0]>} : vector<2x8x8xf32>, vector<2x8x8xf32>, vector<2x8x8xf32> -> vector<2x8x8xf32>
    "tpu.trace_stop"() : () -> ()
    %329 = vector.shape_cast %328 : vector<2x8x8xf32> to vector<16x8xf32>
    %330 = vector.extract_strided_slice %248 {offsets = [16, 0], sizes = [8, 32], strides = [1, 1]} : vector<32x32xf32> to vector<8x32xf32>
    %cst_155 = arith.constant dense<0.000000e+00> : vector<16x32xf32>
    %331 = tpu.matmul %329, %330, %cst_155 {dimension_numbers = #tpu.dot_dimension_numbers<[1], [0], [0], [1], [0, 0, 1, 1], [], []>} : vector<16x8xf32>, vector<8x32xf32>, vector<16x32xf32> -> vector<16x32xf32>
    %332 = arith.addf %309, %331 : vector<16x32xf32>
    %333 = vector.extract_strided_slice %260 {offsets = [0, 0, 24], sizes = [2, 8, 8], strides = [1, 1, 1]} : vector<2x8x32xf32> to vector<2x8x8xf32>
    %334 = vector.extract_strided_slice %261 {offsets = [0, 0, 24], sizes = [2, 8, 8], strides = [1, 1, 1]} : vector<2x8x32xf32> to vector<2x8x8xf32>
    %335 = vector.extract_strided_slice %262 {offsets = [0, 0, 24], sizes = [2, 8, 8], strides = [1, 1, 1]} : vector<2x8x32xf32> to vector<2x8x8xf32>
    "tpu.trace_start"() <{level = 10 : i32, message = "bqd,bkd->bqk"}> : () -> ()
    %cst_156 = arith.constant dense<0.000000e+00> : vector<2x8x8xf32>
    %336 = tpu.matmul %333, %334, %cst_156 {dimension_numbers = #tpu.dot_dimension_numbers<[2], [2], [1], [1], [0, 0, 0, 1, 1, 1], [0], [0]>} : vector<2x8x8xf32>, vector<2x8x8xf32>, vector<2x8x8xf32> -> vector<2x8x8xf32>
    "tpu.trace_stop"() : () -> ()
    %cst_157 = arith.constant 0.353553385 : f32
    %337 = vector.broadcast %cst_157 : f32 to vector<2x8x8xf32>
    %338 = arith.mulf %336, %337 : vector<2x8x8xf32>
    %339 = vector.broadcast %30 : vector<2x1x8xf32> to vector<2x8x8xf32>
    %340 = arith.addf %338, %339 : vector<2x8x8xf32>
    %cst_158 = arith.constant dense<0xFF800000> : vector<2x8xf32>
    %341 = vector.multi_reduction <maximumf>, %340, %cst_158 [2] : vector<2x8x8xf32> to vector<2x8xf32>
    %342 = vector.shape_cast %341 : vector<2x8xf32> to vector<2x8x1xf32>
    %343 = vector.broadcast %342 : vector<2x8x1xf32> to vector<2x8x8xf32>
    %344 = arith.subf %340, %343 : vector<2x8x8xf32>
    %345 = math.exp %344 : vector<2x8x8xf32>
    %cst_159 = arith.constant dense<0.000000e+00> : vector<2x8xf32>
    %346 = vector.multi_reduction <add>, %345, %cst_159 [2] : vector<2x8x8xf32> to vector<2x8xf32>
    %347 = vector.shape_cast %346 : vector<2x8xf32> to vector<2x8x1xf32>
    %348 = tpu.reciprocal %347 {approx = true} : vector<2x8x1xf32> -> vector<2x8x1xf32>
    %349 = vector.broadcast %348 : vector<2x8x1xf32> to vector<2x8x8xf32>
    %350 = arith.mulf %345, %349 : vector<2x8x8xf32>
    "tpu.trace_start"() <{level = 10 : i32, message = "bqk,bkd->bqd"}> : () -> ()
    %cst_160 = arith.constant dense<0.000000e+00> : vector<2x8x8xf32>
    %351 = tpu.matmul %350, %335, %cst_160 {dimension_numbers = #tpu.dot_dimension_numbers<[2], [1], [1], [2], [0, 0, 0, 1, 1, 2], [0], [0]>} : vector<2x8x8xf32>, vector<2x8x8xf32>, vector<2x8x8xf32> -> vector<2x8x8xf32>
    "tpu.trace_stop"() : () -> ()
    %352 = vector.shape_cast %351 : vector<2x8x8xf32> to vector<16x8xf32>
    %353 = vector.extract_strided_slice %248 {offsets = [24, 0], sizes = [8, 32], strides = [1, 1]} : vector<32x32xf32> to vector<8x32xf32>
    %cst_161 = arith.constant dense<0.000000e+00> : vector<16x32xf32>
    %354 = tpu.matmul %352, %353, %cst_161 {dimension_numbers = #tpu.dot_dimension_numbers<[1], [0], [0], [1], [0, 0, 1, 1], [], []>} : vector<16x8xf32>, vector<8x32xf32>, vector<16x32xf32> -> vector<16x32xf32>
    %355 = arith.addf %332, %354 : vector<16x32xf32>
    %356 = vector.broadcast %250 : vector<1x32xf32> to vector<16x32xf32>
    %357 = arith.addf %355, %356 : vector<16x32xf32>
    %358 = arith.addf %234, %357 : vector<16x32xf32>
    %c1_162 = arith.constant 1 : index
    %c0_163 = arith.constant 0 : index
    %c0_164 = arith.constant 0 : index
    %359 = vector.load %arg14[%c1_162, %c0_163, %c0_164] : memref<2x1x32xf32, #tpu.memory_space<vmem>>, vector<1x1x32xf32>
    %360 = vector.shape_cast %359 : vector<1x1x32xf32> to vector<1x32xf32>
    %c1_165 = arith.constant 1 : index
    %c0_166 = arith.constant 0 : index
    %c0_167 = arith.constant 0 : index
    %361 = vector.load %arg15[%c1_165, %c0_166, %c0_167] : memref<2x1x32xf32, #tpu.memory_space<vmem>>, vector<1x1x32xf32>
    %362 = vector.shape_cast %361 : vector<1x1x32xf32> to vector<1x32xf32>
    %cst_168 = arith.constant dense<0.000000e+00> : vector<16xf32>
    %363 = vector.multi_reduction <add>, %358, %cst_168 [1] : vector<16x32xf32> to vector<16xf32>
    %364 = vector.shape_cast %363 : vector<16xf32> to vector<16x1xf32>
    %cst_169 = arith.constant 3.200000e+01 : f32
    %365 = vector.broadcast %cst_169 : f32 to vector<16x1xf32>
    %366 = arith.divf %364, %365 : vector<16x1xf32>
    %367 = vector.broadcast %366 : vector<16x1xf32> to vector<16x32xf32>
    %368 = arith.subf %358, %367 : vector<16x32xf32>
    %369 = arith.mulf %368, %368 : vector<16x32xf32>
    %cst_170 = arith.constant dense<0.000000e+00> : vector<16xf32>
    %370 = vector.multi_reduction <add>, %369, %cst_170 [1] : vector<16x32xf32> to vector<16xf32>
    %371 = vector.shape_cast %370 : vector<16xf32> to vector<16x1xf32>
    %cst_171 = arith.constant 3.200000e+01 : f32
    %372 = vector.broadcast %cst_171 : f32 to vector<16x1xf32>
    %373 = arith.divf %371, %372 : vector<16x1xf32>
    %374 = vector.broadcast %366 : vector<16x1xf32> to vector<16x32xf32>
    %375 = arith.subf %358, %374 : vector<16x32xf32>
    %cst_172 = arith.constant 9.99999996E-13 : f32
    %376 = vector.broadcast %cst_172 : f32 to vector<16x1xf32>
    %377 = arith.addf %373, %376 : vector<16x1xf32>
    %378 = math.rsqrt %377 : vector<16x1xf32>
    %379 = vector.broadcast %378 : vector<16x1xf32> to vector<16x32xf32>
    %380 = arith.mulf %375, %379 : vector<16x32xf32>
    %381 = vector.broadcast %360 : vector<1x32xf32> to vector<16x32xf32>
    %382 = arith.mulf %380, %381 : vector<16x32xf32>
    %383 = vector.broadcast %362 : vector<1x32xf32> to vector<16x32xf32>
    %384 = arith.addf %382, %383 : vector<16x32xf32>
    %c1_173 = arith.constant 1 : index
    %c0_174 = arith.constant 0 : index
    %c0_175 = arith.constant 0 : index
    %385 = vector.load %arg16[%c1_173, %c0_174, %c0_175] : memref<2x32x64xf32, #tpu.memory_space<vmem>>, vector<1x32x64xf32>
    %386 = vector.shape_cast %385 : vector<1x32x64xf32> to vector<32x64xf32>
    %cst_176 = arith.constant dense<0.000000e+00> : vector<16x64xf32>
    %387 = tpu.matmul %384, %386, %cst_176 {dimension_numbers = #tpu.dot_dimension_numbers<[1], [0], [0], [1], [0, 0, 1, 1], [], []>} : vector<16x32xf32>, vector<32x64xf32>, vector<16x64xf32> -> vector<16x64xf32>
    %c1_177 = arith.constant 1 : index
    %c0_178 = arith.constant 0 : index
    %c0_179 = arith.constant 0 : index
    %388 = vector.load %arg17[%c1_177, %c0_178, %c0_179] : memref<2x1x64xf32, #tpu.memory_space<vmem>>, vector<1x1x64xf32>
    %389 = vector.shape_cast %388 : vector<1x1x64xf32> to vector<1x64xf32>
    %390 = vector.broadcast %389 : vector<1x64xf32> to vector<16x64xf32>
    %391 = arith.addf %387, %390 : vector<16x64xf32>
    %cst_180 = arith.constant 5.000000e-01 : f32
    %392 = vector.broadcast %cst_180 : f32 to vector<16x64xf32>
    %393 = arith.mulf %392, %391 : vector<16x64xf32>
    %cst_181 = arith.constant 4.471500e-02 : f32
    %394 = vector.broadcast %cst_181 : f32 to vector<16x64xf32>
    %395 = arith.mulf %394, %391 : vector<16x64xf32>
    %396 = arith.mulf %395, %391 : vector<16x64xf32>
    %397 = arith.mulf %396, %391 : vector<16x64xf32>
    %398 = arith.addf %391, %397 : vector<16x64xf32>
    %cst_182 = arith.constant 0.797884583 : f32
    %399 = vector.broadcast %cst_182 : f32 to vector<16x64xf32>
    %400 = arith.mulf %399, %398 : vector<16x64xf32>
    %401 = math.tanh %400 : vector<16x64xf32>
    %cst_183 = arith.constant 1.000000e+00 : f32
    %402 = vector.broadcast %cst_183 : f32 to vector<16x64xf32>
    %403 = arith.addf %402, %401 : vector<16x64xf32>
    %404 = arith.mulf %393, %403 : vector<16x64xf32>
    %c1_184 = arith.constant 1 : index
    %c0_185 = arith.constant 0 : index
    %c0_186 = arith.constant 0 : index
    %405 = vector.load %arg18[%c1_184, %c0_185, %c0_186] : memref<2x64x32xf32, #tpu.memory_space<vmem>>, vector<1x64x32xf32>
    %406 = vector.shape_cast %405 : vector<1x64x32xf32> to vector<64x32xf32>
    %cst_187 = arith.constant dense<0.000000e+00> : vector<16x32xf32>
    %407 = tpu.matmul %404, %406, %cst_187 {dimension_numbers = #tpu.dot_dimension_numbers<[1], [0], [0], [1], [0, 0, 1, 1], [], []>} : vector<16x64xf32>, vector<64x32xf32>, vector<16x32xf32> -> vector<16x32xf32>
    %c1_188 = arith.constant 1 : index
    %c0_189 = arith.constant 0 : index
    %c0_190 = arith.constant 0 : index
    %408 = vector.load %arg19[%c1_188, %c0_189, %c0_190] : memref<2x1x32xf32, #tpu.memory_space<vmem>>, vector<1x1x32xf32>
    %409 = vector.shape_cast %408 : vector<1x1x32xf32> to vector<1x32xf32>
    %410 = vector.broadcast %409 : vector<1x32xf32> to vector<16x32xf32>
    %411 = arith.addf %407, %410 : vector<16x32xf32>
    %412 = arith.addf %384, %411 : vector<16x32xf32>
    %c1_191 = arith.constant 1 : index
    %c0_192 = arith.constant 0 : index
    %c0_193 = arith.constant 0 : index
    %413 = vector.load %arg20[%c1_191, %c0_192, %c0_193] : memref<2x1x32xf32, #tpu.memory_space<vmem>>, vector<1x1x32xf32>
    %414 = vector.shape_cast %413 : vector<1x1x32xf32> to vector<1x32xf32>
    %c1_194 = arith.constant 1 : index
    %c0_195 = arith.constant 0 : index
    %c0_196 = arith.constant 0 : index
    %415 = vector.load %arg21[%c1_194, %c0_195, %c0_196] : memref<2x1x32xf32, #tpu.memory_space<vmem>>, vector<1x1x32xf32>
    %416 = vector.shape_cast %415 : vector<1x1x32xf32> to vector<1x32xf32>
    %cst_197 = arith.constant dense<0.000000e+00> : vector<16xf32>
    %417 = vector.multi_reduction <add>, %412, %cst_197 [1] : vector<16x32xf32> to vector<16xf32>
    %418 = vector.shape_cast %417 : vector<16xf32> to vector<16x1xf32>
    %cst_198 = arith.constant 3.200000e+01 : f32
    %419 = vector.broadcast %cst_198 : f32 to vector<16x1xf32>
    %420 = arith.divf %418, %419 : vector<16x1xf32>
    %421 = vector.broadcast %420 : vector<16x1xf32> to vector<16x32xf32>
    %422 = arith.subf %412, %421 : vector<16x32xf32>
    %423 = arith.mulf %422, %422 : vector<16x32xf32>
    %cst_199 = arith.constant dense<0.000000e+00> : vector<16xf32>
    %424 = vector.multi_reduction <add>, %423, %cst_199 [1] : vector<16x32xf32> to vector<16xf32>
    %425 = vector.shape_cast %424 : vector<16xf32> to vector<16x1xf32>
    %cst_200 = arith.constant 3.200000e+01 : f32
    %426 = vector.broadcast %cst_200 : f32 to vector<16x1xf32>
    %427 = arith.divf %425, %426 : vector<16x1xf32>
    %428 = vector.broadcast %420 : vector<16x1xf32> to vector<16x32xf32>
    %429 = arith.subf %412, %428 : vector<16x32xf32>
    %cst_201 = arith.constant 9.99999996E-13 : f32
    %430 = vector.broadcast %cst_201 : f32 to vector<16x1xf32>
    %431 = arith.addf %427, %430 : vector<16x1xf32>
    %432 = math.rsqrt %431 : vector<16x1xf32>
    %433 = vector.broadcast %432 : vector<16x1xf32> to vector<16x32xf32>
    %434 = arith.mulf %429, %433 : vector<16x32xf32>
    %435 = vector.broadcast %414 : vector<1x32xf32> to vector<16x32xf32>
    %436 = arith.mulf %434, %435 : vector<16x32xf32>
    %437 = vector.broadcast %416 : vector<1x32xf32> to vector<16x32xf32>
    %438 = arith.addf %436, %437 : vector<16x32xf32>
    %439 = tpu.iota {dimensions = array<i32: 1>} : vector<2x16xi32>
    %440 = tpu.iota {dimensions = array<i32: 0>} : vector<2x16xi32>
    %c8_i32 = arith.constant 8 : i32
    %441 = vector.broadcast %c8_i32 : i32 to vector<2x16xi32>
    %442 = arith.muli %440, %441 : vector<2x16xi32>
    %443 = arith.cmpi eq, %439, %442 : vector<2x16xi32>
    %444 = arith.extui %443 : vector<2x16xi1> to vector<2x16xi32>
    %445 = arith.sitofp %444 : vector<2x16xi32> to vector<2x16xf32>
    %cst_202 = arith.constant dense<0.000000e+00> : vector<2x32xf32>
    %446 = tpu.matmul %445, %438, %cst_202 {dimension_numbers = #tpu.dot_dimension_numbers<[1], [0], [0], [1], [0, 0, 1, 1], [], []>} : vector<2x16xf32>, vector<16x32xf32>, vector<2x32xf32> -> vector<2x32xf32>
    %c0_203 = arith.constant 0 : index
    %c0_204 = arith.constant 0 : index
    %447 = vector.load %arg22[%c0_203, %c0_204] : memref<32x32xf32, #tpu.memory_space<vmem>>, vector<32x32xf32>
    %cst_205 = arith.constant dense<0.000000e+00> : vector<2x32xf32>
    %448 = tpu.matmul %446, %447, %cst_205 {dimension_numbers = #tpu.dot_dimension_numbers<[1], [0], [0], [1], [0, 0, 1, 1], [], []>} : vector<2x32xf32>, vector<32x32xf32>, vector<2x32xf32> -> vector<2x32xf32>
    %c0_206 = arith.constant 0 : index
    %c0_207 = arith.constant 0 : index
    %449 = vector.load %arg23[%c0_206, %c0_207] : memref<1x32xf32, #tpu.memory_space<vmem>>, vector<1x32xf32>
    %450 = vector.broadcast %449 : vector<1x32xf32> to vector<2x32xf32>
    %451 = arith.addf %448, %450 : vector<2x32xf32>
    %452 = math.tanh %451 : vector<2x32xf32>
    %c0_208 = arith.constant 0 : index
    %c0_209 = arith.constant 0 : index
    %453 = vector.load %arg24[%c0_208, %c0_209] : memref<32x4xf32, #tpu.memory_space<vmem>>, vector<32x4xf32>
    %cst_210 = arith.constant dense<0.000000e+00> : vector<2x4xf32>
    %454 = tpu.matmul %452, %453, %cst_210 {dimension_numbers = #tpu.dot_dimension_numbers<[1], [0], [0], [1], [0, 0, 1, 1], [], []>} : vector<2x32xf32>, vector<32x4xf32>, vector<2x4xf32> -> vector<2x4xf32>
    %c0_211 = arith.constant 0 : index
    %c0_212 = arith.constant 0 : index
    %455 = vector.load %arg25[%c0_211, %c0_212] : memref<1x4xf32, #tpu.memory_space<vmem>>, vector<1x4xf32>
    %456 = vector.broadcast %455 : vector<1x4xf32> to vector<2x4xf32>
    %457 = arith.addf %454, %456 : vector<2x4xf32>
    %cst_213 = arith.constant 0.000000e+00 : f32
    %458 = vector.broadcast %cst_213 : f32 to vector<2x4xf32>
    %459 = arith.subf %458, %457 : vector<2x4xf32>
    %460 = math.exp %459 : vector<2x4xf32>
    %cst_214 = arith.constant 1.000000e+00 : f32
    %461 = vector.broadcast %cst_214 : f32 to vector<2x4xf32>
    %462 = arith.addf %461, %460 : vector<2x4xf32>
    %cst_215 = arith.constant 1.000000e+00 : f32
    %463 = vector.broadcast %cst_215 : f32 to vector<2x4xf32>
    %464 = arith.divf %463, %462 : vector<2x4xf32>
    %c0_216 = arith.constant 0 : index
    %c0_217 = arith.constant 0 : index
    %465 = vector.load %arg27[%c0_216, %c0_217] : memref<2x4xf32, #tpu.memory_space<vmem>>, vector<2x4xf32>
    tpu.vector_store %arg27[%c0_216, %c0_217], %464 {strides = array<i32>} : memref<2x4xf32, #tpu.memory_space<vmem>>, vector<2x4xf32>,
    %c0_218 = arith.constant 0 : index
    %c0_219 = arith.constant 0 : index
    %466 = vector.load %arg26[%c0_218, %c0_219] : memref<2x4xf32, #tpu.memory_space<vmem>>, vector<2x4xf32>
    %cst_220 = arith.constant 0.000000e+00 : f32
    %467 = vector.broadcast %cst_220 : f32 to vector<2x4xf32>
    %468 = arith.maximumf %457, %467 : vector<2x4xf32>
    %469 = arith.mulf %457, %466 : vector<2x4xf32>
    %470 = arith.subf %468, %469 : vector<2x4xf32>
    %471 = math.absf %457 : vector<2x4xf32>
    %cst_221 = arith.constant 0.000000e+00 : f32
    %472 = vector.broadcast %cst_221 : f32 to vector<2x4xf32>
    %473 = arith.subf %472, %471 : vector<2x4xf32>
    %474 = math.exp %473 : vector<2x4xf32>
    %cst_222 = arith.constant 1.000000e+00 : f32
    %475 = vector.broadcast %cst_222 : f32 to vector<2x4xf32>
    %476 = arith.addf %475, %474 : vector<2x4xf32>
    %477 = math.log %476 : vector<2x4xf32>
    %478 = arith.addf %470, %477 : vector<2x4xf32>
    %479 = vector.shape_cast %478 : vector<2x4xf32> to vector<1x2x4xf32>
    %cst_223 = arith.constant dense<0.000000e+00> : vector<1xf32>
    %480 = vector.multi_reduction <add>, %479, %cst_223 [1, 2] : vector<1x2x4xf32> to vector<1xf32>
    %481 = vector.shape_cast %480 : vector<1xf32> to vector<1x1x1xf32>
    %482 = vector.extract %481[0, 0, 0] : f32 from vector<1x1x1xf32>
    %cst_224 = arith.constant 8.000000e+00 : f32
    %483 = arith.divf %482, %cst_224 : f32
    %484 = vector.broadcast %483 : f32 to vector<1x1xf32>
    %c0_225 = arith.constant 0 : index
    %c0_226 = arith.constant 0 : index
    %485 = vector.load %arg28[%c0_225, %c0_226] : memref<1x1xf32, #tpu.memory_space<vmem>>, vector<1x1xf32>
    tpu.vector_store %arg28[%c0_225, %c0_226], %484 {strides = array<i32>} : memref<1x1xf32, #tpu.memory_space<vmem>>, vector<1x1xf32>,
    return
  }
}

</mosaic_0001>

<bundles_post_ra>
// kernel: _forward_impl.1
= control target key start
LH: loop header
LB: loop body
LE: loop exit
PB: predicated region body
PF: predicated region fallthrough
CT: control target
= control target key end

     0   :  { %s6799_s0 = inlined_call_operand.vmem [shape: f32[2,8,32], index: 0, kind: input, shape index: {}]   ;;  %s6800_s1 = inlined_call_operand.vmem [shape: f32[2,8,32], index: 1, kind: input, shape index: {}]   ;;  %s6801_s2 = inlined_call_operand.vmem [shape: f32[2,8,32], index: 2, kind: input, shape index: {}]   ;;  %s6802_s3 = inlined_call_operand.vmem [shape: f32[2,1,8], index: 3, kind: input, shape index: {}]   ;;  %s6803_s4 = inlined_call_operand.vmem [shape: f32[1,32], index: 4, kind: input, shape index: {}]   ;;  %s6804_s5 = inlined_call_operand.vmem [shape: f32[1,32], index: 5, kind: input, shape index: {}]   ;;  %s6805_s6 = inlined_call_operand.vmem [shape: f32[2,32,32], index: 6, kind: input, shape index: {}]   ;;  %s6806_s7 = inlined_call_operand.vmem [shape: f32[2,1,32], index: 7, kind: input, shape index: {}]   ;;  %s6807_s8 = inlined_call_operand.vmem [shape: f32[2,32,32], index: 8, kind: input, shape index: {}]   ;;  %s6808_s9 = inlined_call_operand.vmem [shape: f32[2,1,32], index: 9, kind: input, shape index: {}]   ;;  %s6809_s10 = inlined_call_operand.vmem [shape: f32[2,32,32], index: 10, kind: input, shape index: {}]   ;;  %s6810_s11 = inlined_call_operand.vmem [shape: f32[2,1,32], index: 11, kind: input, shape index: {}]   ;;  %s6811_s12 = inlined_call_operand.vmem [shape: f32[2,32,32], index: 12, kind: input, shape index: {}]   ;;  %s6812_s13 = inlined_call_operand.vmem [shape: f32[2,1,32], index: 13, kind: input, shape index: {}]   ;;  %s6813_s14 = inlined_call_operand.vmem [shape: f32[2,1,32], index: 14, kind: input, shape index: {}]   ;;  %s6814_s15 = inlined_call_operand.vmem [shape: f32[2,1,32], index: 15, kind: input, shape index: {}]   ;;  %s6815_s16 = inlined_call_operand.vmem [shape: f32[2,32,64], index: 16, kind: input, shape index: {}]   ;;  %s6816_s17 = inlined_call_operand.vmem [shape: f32[2,1,64], index: 17, kind: input, shape index: {}]   ;;  %s6817_s18 = inlined_call_operand.vmem [shape: f32[2,64,32], index: 18, kind: input, shape index: {}]   ;;  %s6818_s19 = inlined_call_operand.vmem [shape: f32[2,1,32], index: 19, kind: input, shape index: {}]   ;;  %s6819_s20 = inlined_call_operand.vmem [shape: f32[2,1,32], index: 20, kind: input, shape index: {}]   ;;  %s6820_s21 = inlined_call_operand.vmem [shape: f32[2,1,32], index: 21, kind: input, shape index: {}]   ;;  %s6821_s22 = inlined_call_operand.vmem [shape: f32[32,32], index: 22, kind: input, shape index: {}]   ;;  %s6822_s23 = inlined_call_operand.vmem [shape: f32[1,32], index: 23, kind: input, shape index: {}]   ;;  %s6823_s24 = inlined_call_operand.vmem [shape: f32[32,4], index: 24, kind: input, shape index: {}]   ;;  %s6824_s25 = inlined_call_operand.vmem [shape: f32[1,4], index: 25, kind: input, shape index: {}]   ;;  %s6825_s26 = inlined_call_operand.vmem [shape: f32[2,4], index: 26, kind: input, shape index: {}]   ;;  %s6826_s27 = inlined_call_operand.hbm [shape: f32[2,4], index: 27, kind: output, shape index: {0}]   ;;  %s6827_s28 = inlined_call_operand.hbm [shape: f32[1,1], index: 28, kind: output, shape index: {1}]  }
   0x1   :  { %6847 = sst [smem:[#allocation8_spill]] %s6799_s0 }
   0x2   :  { %6848 = sst [smem:[#allocation9_spill]] %s6800_s1 }
   0x3   :  { %6849 = sst [smem:[#allocation10_spill]] %s6801_s2 }
   0x4   :  { %6850 = sst [smem:[#allocation11_spill]] %s6802_s3 }
   0x5   :  { %6851 = sst [smem:[#allocation12_spill]] %s6803_s4 }
   0x6   :  { %6852 = sst [smem:[#allocation13_spill]] %s6804_s5 }
   0x7   :  { %6853 = sst [smem:[#allocation14_spill]] %s6805_s6 }
   0x8   :  { %6854 = sst [smem:[#allocation15_spill]] %s6806_s7 }
   0x9   :  { %6855 = sst [smem:[#allocation16_spill]] %s6807_s8 }
   0xa   :  { %6856 = sst [smem:[#allocation17_spill]] %s6808_s9 }
   0xb   :  { %6857 = sst [smem:[#allocation18_spill]] %s6809_s10 }
   0xc   :  { %6858 = sst [smem:[#allocation19_spill]] %s6810_s11 }
   0xd   :  { %6859 = sst [smem:[#allocation20_spill]] %s6811_s12 }
   0xe   :  { %6860 = sst [smem:[#allocation21_spill]] %s6825_s26 }
   0xf   :  { %6861 = sst [smem:[#allocation22_spill]] %s6826_s27 }
  0x10   :  { %6862 = sst [smem:[#allocation23_spill]] %s6827_s28 }
  0x11   :  { %34 = vsyncpa [#allocation3], 0  ;;  %s6863_s9 = sld [smem:[#allocation8_spill]]  ;;  %s6864_s6 = sld [smem:[#allocation9_spill]]  ;;  %vm102_vm0 = vcmask 261120  }
  0x12   :  { %s6865_s11 = sld [smem:[#allocation10_spill]] }
  0x17   :  { %v90_v0 = vld [vmem:[%s6863_s9] sm:$0xff]  ;;  %v91_v4 = vld [vmem:[%s6863_s9 + $0x8] sm:$0xff] }
  0x18   :  { %v92_v1 = vld [vmem:[%s6864_s6] sm:$0xff]  ;;  %v93_v5 = vld [vmem:[%s6864_s6 + $0x8] sm:$0xff] }
  0x19   :  { %v96_v2 = vld [vmem:[%s6865_s11] sm:$0xff]  ;;  %v94_v3 = vadd.f32 %v92_v1, %v90_v0  ;;  %v97_v6 = vld [vmem:[%s6865_s11 + $0x8] sm:$0xff]  ;;  %v95_v7 = vadd.f32 %v93_v5, %v91_v4 }
  0x1a   :  { %35 = vsyncpa [#allocation5], 0  ;;  %s6866_s9 = sld [smem:[#allocation14_spill]]  ;;  %s6867_s0 = sld [smem:[#allocation16_spill]]  ;;  %v5916_v56 = vmov 0.0   ;;  %vm5917_vm1 = vmmov 0  }
  0x1b   :  { %v98_v8 = vadd.f32 %v96_v2, %v94_v3  ;;  %v99_v9 = vadd.f32 %v97_v6, %v95_v7  ;;  %s6868_s10 = sld [smem:[#allocation18_spill]]  ;;  %s6869_s12 = sld [smem:[#allocation12_spill]]  ;;  %vm417_vm2 = vcmask 64512   ;;  %vm2265_vm3 = vcmask 523264  }
  0x1c   :  { %s6870_s8 = sld [smem:[#allocation13_spill]]  ;;  %s6871_s2 = sld [smem:[#allocation17_spill]]  ;;  %vm4648_vm5 = vcmask 130048   ;;  %vm4897_vm6 = vcmask 25600  }
  0x1d   :  { %v103_v10 = vsel %vm102_vm0, %v98_v8, 0.0  ;;  %v106_v11 = vsel %vm102_vm0, %v99_v9, 0.0  ;;  %s6872_s1 = sld [smem:[#allocation15_spill]]  ;;  %s6873_s5 = sld [smem:[#allocation19_spill]] }
  0x1e   :  { %104 = vadd.xlane.f32.xlu0 %v103_v10  ;;  %s6874_s6 = sld [smem:[#allocation11_spill]]  ;;  %s6843_s11 = smov 120  }
  0x1f   :  { %s6839_s4 = smov 104   ;;  %s6875_s3 = sld [smem:[#allocation20_spill]] }
  0x20   :  { %v148_v22 = vld [vmem:[%s6866_s9] sm:$0xff]  ;;  %v149_v23 = vld [vmem:[%s6866_s9 + $0x8] sm:$0xff]  ;;  %v150_v27 = vld [vmem:[%s6866_s9 + $0x10] sm:$0xff]  ;;  %s6879_s29 = sld [smem:[#allocation21_spill]] }
  0x21   :  { %v153_v24 = vld [vmem:[%s6867_s0] sm:$0xff]  ;;  %v5631_v25 = vpack.c.bf16 %v149_v23, %v148_v22  ;;  %v154_v26 = vld [vmem:[%s6867_s0 + $0x8] sm:$0xff]  ;;  %v151_v28 = vld [vmem:[%s6866_s9 + $0x18] sm:$0xff] }
  0x22   :  { %107 = vadd.xlane.f32.xlu0 %v106_v11  ;;  %v5639_v29 = vpack.c.bf16 %v154_v26, %v153_v24  ;;  %v5635_v30 = vpack.c.bf16 %v151_v28, %v150_v27  ;;  %v155_v31 = vld [vmem:[%s6867_s0 + $0x10] sm:$0xff]  ;;  %v156_v32 = vld [vmem:[%s6867_s0 + $0x18] sm:$0xff]  ;;  %v158_v34 = vld [vmem:[%s6868_s10] sm:$0xff] }
  0x23   :  { %5632 = vmatprep.subr.bf16.mxu0 %v5631_v25  ;;  %v5643_v33 = vpack.c.bf16 %v156_v32, %v155_v31  ;;  %v159_v35 = vld [vmem:[%s6868_s10 + $0x8] sm:$0xff]  ;;  %v4955_v44 = vld [vmem:[%s6869_s12] ss:$0 sm:$0xff]  ;;  %v160_v51 = vld [vmem:[%s6868_s10 + $0x10] sm:$0xff]  ;;  %s6841_s12 = smov 112  }
  0x24   :  { %5634 = vmatpush3.bf16.msra.mxu0 %v5631_v25  ;;  %5640 = vmatprep.subr.bf16.mxu1 %v5639_v29  ;;  %v5647_v36 = vpack.c.bf16 %v159_v35, %v158_v34  ;;  %v4956_v46 = vld [vmem:[%s6870_s8] ss:$0 sm:$0xff]  ;;  %v161_v52 = vld [vmem:[%s6868_s10 + $0x18] sm:$0xff]  ;;  %v6197_v11 = vld [vmem:[%s6874_s6 + $0x1] ss:$0 sm:$0xff] }
  0x25   :  { %5642 = vmatpush3.bf16.msra.mxu1 %v5639_v29  ;;  %5636 = vmatprep.subr.bf16.mxu0 %v5635_v30  ;;  %v5651_v55 = vpack.c.bf16 %v161_v52, %v160_v51  ;;  %v4960_v57 = vld [vmem:[%s6871_s2] ss:$0 sm:$0xff] }
  0x26   :  { %5644 = vmatprep.subr.bf16.mxu1 %v5643_v33  ;;  %v4957_v62 = vld [vmem:[%s6872_s1] ss:$0 sm:$0xff] }
  0x27   :  { %v4963_v2 = vld [vmem:[%s6873_s5] ss:$0 sm:$0xff] }
  0x28   :  { %5638 = vmatpush3.bf16.msra.mxu0 %v5635_v30  ;;  %v6209_v22 = vld [vmem:[%s6874_s6] ss:$0 sm:$0xff] }
  0x29   :  { %5646 = vmatpush3.bf16.msra.mxu1 %v5643_v33  ;;  %5648 = vmatprep.subr.bf16.mxu0 %v5647_v36 }
  0x2a   :  { %5309 = vmatprep.subr.mxu1 %v5916_v56 }
  0xab   :  { %v105_v12 = vpop.xlane.xlu0 %104 }
  0xac   :  { %v110_v13 = vmul.f32 0.03125, %v105_v12 }
  0xae   :  { %v112_v14 = vsub.f32 %v98_v8, %v110_v13 }
  0xaf   :  { %v108_v15 = vpop.xlane.xlu0 %107 }
  0xb0   :  { %v111_v16 = vmul.f32 0.03125, %v108_v15  ;;  %v114_v17 = vmul.f32 %v112_v14, %v112_v14 }
  0xb2   :  { %v113_v18 = vsub.f32 %v99_v9, %v111_v16  ;;  %v116_v19 = vsel %vm102_vm0, %v114_v17, 0.0 }
  0xb3   :  { %117 = vadd.xlane.f32.xlu1 %v116_v19 }
  0xb4   :  { %v115_v20 = vmul.f32 %v113_v18, %v113_v18 }
  0xb6   :  { %v119_v21 = vsel %vm102_vm0, %v115_v20, 0.0 }
  0xb7   :  { %120 = vadd.xlane.f32.xlu1 %v119_v21 }
 0x140   :  { %v118_v37 = vpop.xlane.xlu1 %117 }
 0x141   :  { %v122_v38 = vmul.f32 0.03125, %v118_v37 }
 0x143   :  { %v124_v39 = vadd.f32 1e-12, %v122_v38 }
 0x144   :  { %v121_v40 = vpop.xlane.xlu1 %120 }
 0x145   :  { %5764 = vrsqrt.f32 %v124_v39  ;;  %v123_v41 = vmul.f32 0.03125, %v121_v40 }
 0x147   :  { %v125_v42 = vadd.f32 1e-12, %v123_v41 }
 0x149   :  { %5766 = vrsqrt.f32 %v125_v42 }
 0x14f   :  { %v5765_v43 = vpop.eup %5764 }
 0x150   :  { %v128_v45 = vmul.f32 %v5765_v43, %v112_v14 }
 0x152   :  { %v136_v47 = vmul.f32 %v4955_v44, %v128_v45 }
 0x153   :  { %v5767_v48 = vpop.eup %5766 }
 0x154   :  { %v6127_v49 = vadd.f32 %v4956_v46, %v136_v47  ;;  %v129_v50 = vmul.f32 %v5767_v48, %v113_v18 }
 0x156   :  { %5284 = vmatprep.mubr.msk.f32.mxu0 %vm102_vm0, %v6127_v49  ;;  %5295 = vmatprep.mubr.msk.f32.mxu1 %vm102_vm0, %v6127_v49  ;;  %v137_v53 = vmul.f32 %v4955_v44, %v129_v50 }
 0x158   :  { %v6139_v54 = vadd.f32 %v4956_v46, %v137_v53 }
 0x15a   :  { %5285 = vmatmul.mubr.msk.f32.vlgmr.msra.gmra.mrb[0].mxu0 %vm102_vm0, %v6139_v54  ;;  %5296 = vmatmul.mubr.msk.f32.vlgmr.msra.gmra.mrb[0].mxu1 %vm102_vm0, %v6139_v54 }
 0x15b   :  { %5650 = vmatpush3.bf16.msra.mxu0 %v5647_v36  ;;  %5306 = vmatprep.mubr.msk.f32.mxu0 %vm102_vm0, %v6127_v49 }
 0x15c   :  { %5652 = vmatprep.subr.bf16.mxu0 %v5651_v55  ;;  %5311 = vmatprep.mubr.msk.f32.mxu1 %vm5917_vm1, %v5916_v56 }
 0x15f   :  { %5654 = vmatpush3.bf16.msra.mxu0 %v5651_v55 }
 0x160   :  { %5319 = vmatprep.subr.mxu0 %v5916_v56 }
 0x162   :  { %5307 = vmatmul.mubr.msk.f32.vlgmr.msra.gmra.mrb[2].mxu0 %vm102_vm0, %v6139_v54 }
 0x163   :  { %5321 = vmatprep.mubr.msk.f32.mxu0 %vm5917_vm1, %v5916_v56 }
 0x22d   :  { %v5286_v58 = vpop.f32.mrb[0].mxu0  ;;  %v5297_v59 = vpop.f32.mrb[0].mxu1 }
 0x22e   :  { %v246_v60 = vpop.f32.mrb[1].mxu0  ;;  %v327_v61 = vpop.f32.mrb[1].mxu1  ;;  %v6168_v1 = vadd.f32 %v5297_v59, %v4960_v57  ;;  %v6179_v4 = vadd.f32 %v5286_v58, %v4957_v62 }
 0x22f   :  { %v6161_v63 = vadd.f32 %v4960_v57, %v327_v61  ;;  %v6165_v0 = vadd.f32 %v4957_v62, %v246_v60 }
 0x231   :  { %5310 = vmatpush3.xpose.msk.msra.mxu1 %vm417_vm2, %v6161_v63 }
 0x232   :  { %5314 = vmatprep.subr.mxu1 %v5916_v56 }
 0x234   :  { %5312 = vmatmul.mubr.msk.f32.vlgmr.msra.gmra.mrb[2].mxu1 %vm417_vm2, %v6165_v0 }
 0x235   :  { %v5308_v3 = vpop.f32.mrb[2].mxu0  ;;  %5315 = vmatpush3.xpose.msk.msra.mxu1 %vm417_vm2, %v6168_v1  ;;  %5316 = vmatprep.mubr.msk.f32.mxu1 %vm5917_vm1, %v5916_v56 }
 0x236   :  { %v408_v5 = vpop.f32.mrb[3].mxu0  ;;  %5324 = vmatprep.subr.mxu1 %v5916_v56  ;;  %v6182_v6 = vadd.f32 %v5308_v3, %v4963_v2 }
 0x237   :  { %v6184_v7 = vadd.f32 %v4963_v2, %v408_v5 }
 0x238   :  { %5317 = vmatmul.mubr.msk.f32.vlgmr.msra.gmra.mrb[4].mxu1 %vm417_vm2, %v6179_v4 }
 0x239   :  { %5320 = vmatpush3.msra.mxu0 %v6184_v7  ;;  %5325 = vmatpush3.msra.mxu1 %v6182_v6 }
 0x23a   :  { %5326 = vmatprep.mubr.msk.f32.mxu1 %vm5917_vm1, %v5916_v56  ;;  %5334 = vmatprep.subr.mxu1 %v5916_v56 }
 0x23b   :  { %5329 = vmatprep.subr.mxu0 %v5916_v56 }
 0x307   :  { %v490_v8 = vpop.f32.mrb[2].mxu1 }
 0x308   :  { %v5313_v9 = vpop.f32.mrb[3].mxu1  ;;  %v570_v21 = vmul.f32 0.35355338, %v490_v8 }
 0x30a   :  { %v584_v23 = vadd.f32 %v6209_v22, %v570_v21 }
 0x30b   :  { %v566_v10 = vpop.f32.mrb[4].mxu1 }
 0x30c   :  { %v571_v12 = vmul.f32 0.35355338, %v566_v10  ;;  %v5318_v13 = vpop.f32.mrb[5].mxu1  ;;  %v586_v24 = vsel %vm417_vm2, %v584_v23, -inf }
 0x30e   :  { %v585_v14 = vadd.f32 %v6197_v11, %v571_v12 }
 0x310   :  { %v589_v15 = vsel %vm417_vm2, %v585_v14, -inf }
 0x311   :  { %590 = vmax.xlane.f32.xlu0 %v589_v15 }
 0x327   :  { %834 = vrot.lane.b32.xlu0 %v6168_v1, %s6843_s11 }
 0x39e   :  { %v591_v16 = vpop.xlane.xlu0 %590 }
 0x39f   :  { %v593_v17 = vsub.f32 %v585_v14, %v591_v16 }
 0x3a1   :  { %v596_v18 = vmul.f32 1.442695, %v593_v17 }
 0x3a2   :  { %v835_v28 = vpop.permute.xlu0 %834 }
 0x3a3   :  { %5768 = vpow2.f32 %v596_v18 }
 0x3ad   :  { %v5769_v19 = vpop.eup %5768 }
 0x3ae   :  { %v601_v20 = vsel %vm417_vm2, %v5769_v19, 0.0 }
 0x3af   :  { %602 = vadd.xlane.f32.xlu1 %v601_v20 }
 0x3c0   :  { %832 = vrot.lane.b32.xlu1 %v6179_v4, %s6843_s11 }
 0x3e4   :  { %587 = vmax.xlane.f32.xlu1 %v586_v24 }
 0x3f5   :  { %754 = vrot.lane.b32.xlu1 %v6165_v0, %s6843_s11 }
 0x43c   :  { %v603_v25 = vpop.xlane.xlu1 %602 }
 0x43d   :  { %5770 = vrcp.f32 %v603_v25 }
 0x440   :  { %v833_v29 = vpop.permute.xlu1 %832 }
 0x447   :  { %v5771_v26 = vpop.eup %5770 }
 0x448   :  { %v607_v27 = vmul.f32 %v5771_v26, %v5769_v19 }
 0x44a   :  { %5327 = vmatmul.mubr.msk.f32.vlgmr.msra.gmra.mrb[6].mxu1 %vm417_vm2, %v607_v27 }
 0x44b   :  { %5335 = vmatpush3.xpose.msk.msra.mxu1 %vm417_vm2, %v835_v28  ;;  %5336 = vmatprep.mubr.msk.f32.mxu1 %vm5917_vm1, %v5916_v56 }
 0x44c   :  { %5344 = vmatprep.subr.mxu1 %v5916_v56 }
 0x44e   :  { %5337 = vmatmul.mubr.msk.f32.vlgmr.msra.gmra.mrb[8].mxu1 %vm417_vm2, %v833_v29 }
 0x44f   :  { %5346 = vmatprep.mubr.msk.f32.mxu1 %vm5917_vm1, %v5916_v56 }
 0x471   :  { %v588_v30 = vpop.xlane.xlu1 %587 }
 0x472   :  { %v592_v31 = vsub.f32 %v584_v23, %v588_v30 }
 0x474   :  { %v594_v32 = vmul.f32 1.442695, %v592_v31 }
 0x475   :  { %v755_v41 = vpop.permute.xlu1 %754 }
 0x476   :  { %5772 = vpow2.f32 %v594_v32 }
 0x480   :  { %v5773_v33 = vpop.eup %5772 }
 0x481   :  { %v598_v34 = vsel %vm417_vm2, %v5773_v33, 0.0 }
 0x482   :  { %599 = vadd.xlane.f32.xlu0 %v598_v34  ;;  %v163_v34 = vld [vmem:[%s6875_s3] sm:$0xff] }
 0x498   :  { %756 = vrot.lane.b32.xlu0 %v6161_v63, %s6843_s11 }
 0x50f   :  { %v600_v35 = vpop.xlane.xlu0 %599 }
 0x510   :  { %5774 = vrcp.f32 %v600_v35 }
 0x513   :  { %v757_v38 = vpop.permute.xlu0 %756 }
 0x51a   :  { %v5775_v36 = vpop.eup %5774 }
 0x51b   :  { %v606_v37 = vmul.f32 %v5775_v36, %v5773_v33  ;;  %v164_v33 = vld [vmem:[%s6875_s3 + $0x8] sm:$0xff] }
 0x51d   :  { %5322 = vmatmul.mubr.msk.f32.vlgmr.msra.gmra.mrb[4].mxu0 %vm417_vm2, %v606_v37  ;;  %v6227_v39 = vpop.f32.mrb[6].mxu1 }
 0x51e   :  { %5330 = vmatpush3.xpose.msk.msra.mxu0 %vm417_vm2, %v757_v38  ;;  %v5328_v40 = vpop.f32.mrb[7].mxu1  ;;  %5331 = vmatprep.mubr.msk.f32.mxu0 %vm5917_vm1, %v5916_v56 }
 0x51f   :  { %5339 = vmatprep.subr.mxu0 %v5916_v56 }
 0x521   :  { %5332 = vmatmul.mubr.msk.f32.vlgmr.msra.gmra.mrb[6].mxu0 %vm417_vm2, %v755_v41  ;;  %v906_v42 = vpop.f32.mrb[8].mxu1 }
 0x522   :  { %v911_v43 = vmul.f32 0.35355338, %v906_v42  ;;  %v5338_v44 = vpop.f32.mrb[9].mxu1  ;;  %5341 = vmatprep.mubr.msk.f32.mxu0 %vm5917_vm1, %v5916_v56 }
 0x524   :  { %v913_v45 = vadd.f32 %v6197_v11, %v911_v43 }
 0x526   :  { %v917_v46 = vsel %vm417_vm2, %v913_v45, -inf }
 0x527   :  { %918 = vmax.xlane.f32.xlu1 %v917_v46 }
 0x538   :  { %1254 = vrot.lane.b32.xlu1 %v6161_v63, %s6841_s12 }
 0x53c   :  { %1252 = vrot.lane.b32.xlu1 %v6165_v0, %s6841_s12 }
 0x540   :  { %1332 = vrot.lane.b32.xlu1 %v6168_v1, %s6841_s12 }
 0x5b4   :  { %v919_v47 = vpop.xlane.xlu1 %918 }
 0x5b5   :  { %v921_v48 = vsub.f32 %v913_v45, %v919_v47 }
 0x5b7   :  { %v924_v50 = vmul.f32 1.442695, %v921_v48 }
 0x5b8   :  { %v1255_v3 = vpop.permute.xlu1 %1254 }
 0x5b9   :  { %5776 = vpow2.f32 %v924_v50  ;;  %v165_v50 = vld [vmem:[%s6875_s3 + $0x10] sm:$0xff] }
 0x5bc   :  { %v1253_v8 = vpop.permute.xlu1 %1252 }
 0x5c0   :  { %v1333_v10 = vpop.permute.xlu1 %1332 }
 0x5c3   :  { %v5777_v51 = vpop.eup %5776 }
 0x5c4   :  { %v929_v52 = vsel %vm417_vm2, %v5777_v51, 0.0 }
 0x5c5   :  { %930 = vadd.xlane.f32.xlu0 %v929_v52 }
 0x5db   :  { %1014 = vrot.lane.b32.xlu0 %v6182_v6, %s6843_s11 }
 0x5df   :  { %1330 = vrot.lane.b32.xlu0 %v6179_v4, %s6841_s12 }
 0x5f0   :  { %v6249_v53 = vpop.f32.mrb[4].mxu0 }
 0x5f1   :  { %v5323_v55 = vpop.f32.mrb[5].mxu0 }
 0x5f4   :  { %v828_v57 = vpop.f32.mrb[6].mxu0 }
 0x5f5   :  { %v910_v58 = vmul.f32 0.35355338, %v828_v57  ;;  %v5333_v59 = vpop.f32.mrb[7].mxu0 }
 0x5f7   :  { %v912_v60 = vadd.f32 %v6209_v22, %v910_v58 }
 0x5f9   :  { %v914_v61 = vsel %vm417_vm2, %v912_v60, -inf }
 0x5fa   :  { %915 = vmax.xlane.f32.xlu1 %v914_v61 }
 0x652   :  { %v931_v62 = vpop.xlane.xlu0 %930 }
 0x653   :  { %5778 = vrcp.f32 %v931_v62 }
 0x656   :  { %v1015_v2 = vpop.permute.xlu0 %1014 }
 0x657   :  { %5345 = vmatpush3.msra.mxu1 %v1015_v2 }
 0x658   :  { %5359 = vmatprep.subr.mxu1 %v5916_v56 }
 0x65a   :  { %v1331_v12 = vpop.permute.xlu0 %1330 }
 0x65d   :  { %v5779_v5 = vpop.eup %5778 }
 0x65e   :  { %v935_v9 = vmul.f32 %v5779_v5, %v5777_v51 }
 0x660   :  { %5347 = vmatmul.mubr.msk.f32.vlgmr.msra.gmra.mrb[10].mxu1 %vm417_vm2, %v935_v9 }
 0x661   :  { %5360 = vmatpush3.xpose.msk.msra.mxu1 %vm417_vm2, %v1255_v3  ;;  %5361 = vmatprep.mubr.msk.f32.mxu1 %vm5917_vm1, %v5916_v56 }
 0x662   :  { %5364 = vmatprep.subr.mxu1 %v5916_v56 }
 0x664   :  { %5362 = vmatmul.mubr.msk.f32.vlgmr.msra.gmra.mrb[12].mxu1 %vm417_vm2, %v1253_v8 }
 0x665   :  { %5365 = vmatpush3.xpose.msk.msra.mxu1 %vm417_vm2, %v1333_v10  ;;  %5366 = vmatprep.mubr.msk.f32.mxu1 %vm5917_vm1, %v5916_v56 }
 0x666   :  { %5374 = vmatprep.subr.mxu1 %v5916_v56 }
 0x668   :  { %5367 = vmatmul.mubr.msk.f32.vlgmr.msra.gmra.mrb[14].mxu1 %vm417_vm2, %v1331_v12 }
 0x669   :  { %5376 = vmatprep.mubr.msk.f32.mxu1 %vm5917_vm1, %v5916_v56 }
 0x687   :  { %v916_v13 = vpop.xlane.xlu1 %915 }
 0x688   :  { %v920_v14 = vsub.f32 %v912_v60, %v916_v13 }
 0x68a   :  { %v922_v15 = vmul.f32 1.442695, %v920_v14 }
 0x68c   :  { %5780 = vpow2.f32 %v922_v15 }
 0x696   :  { %v5781_v16 = vpop.eup %5780 }
 0x697   :  { %v926_v17 = vsel %vm417_vm2, %v5781_v16, 0.0 }
 0x698   :  { %927 = vadd.xlane.f32.xlu0 %v926_v17 }
 0x6ae   :  { %937 = vrot.lane.b32.xlu0 %v6184_v7, %s6843_s11  ;;  %s6877_s11 = smov 112  }
 0x6b2   :  { %1510 = vrot.lane.b32.xlu0 %v6182_v6, %s6841_s12 }
 0x6b6   :  { %1671 = vrot.lane.b32.xlu0 %v6161_v63, %s6839_s4 }
 0x6ba   :  { %1749 = vrot.lane.b32.xlu0 %v6168_v1, %s6839_s4 }
 0x6be   :  { %1669 = vrot.lane.b32.xlu0 %v6165_v0, %s6839_s4 }
 0x725   :  { %v928_v18 = vpop.xlane.xlu0 %927 }
 0x726   :  { %5782 = vrcp.f32 %v928_v18 }
 0x729   :  { %v938_v19 = vpop.permute.xlu0 %937 }
 0x72a   :  { %5340 = vmatpush3.msra.mxu0 %v938_v19 }
 0x72b   :  { %5349 = vmatprep.subr.mxu0 %v164_v33 }
 0x72d   :  { %v1511_v20 = vpop.permute.xlu0 %1510 }
 0x72e   :  { %5375 = vmatpush3.msra.mxu1 %v1511_v20 }
 0x72f   :  { %5384 = vmatprep.subr.mxu1 %v5916_v56 }
 0x730   :  { %v5783_v21 = vpop.eup %5782 }
 0x731   :  { %v934_v23 = vmul.f32 %v5783_v21, %v5781_v16  ;;  %v1672_v52 = vpop.permute.xlu0 %1671 }
 0x733   :  { %5342 = vmatmul.mubr.msk.f32.vlgmr.msra.gmra.mrb[8].mxu0 %vm417_vm2, %v934_v23  ;;  %v1086_v24 = vpop.f32.mrb[10].mxu1 }
 0x734   :  { %v5348_v63 = vpop.f32.mrb[11].mxu1  ;;  %5350 = vmatpush3.msra.mxu0 %v164_v33  ;;  %v166_v33 = vld [vmem:[%s6875_s3 + $0x18] sm:$0xff] }
 0x735   :  { %5354 = vmatprep.subr.mxu0 %v163_v34  ;;  %v1750_v57 = vpop.permute.xlu0 %1749 }
 0x737   :  { %v1326_v25 = vpop.f32.mrb[12].mxu1 }
 0x738   :  { %v1408_v26 = vmul.f32 0.35355338, %v1326_v25  ;;  %v5363_v1 = vpop.f32.mrb[13].mxu1 }
 0x739   :  { %v1670_v59 = vpop.permute.xlu0 %1669 }
 0x73a   :  { %v1410_v27 = vadd.f32 %v6209_v22, %v1408_v26 }
 0x73b   :  { %v1404_v0 = vpop.f32.mrb[14].mxu1 }
 0x73c   :  { %v1409_v28 = vmul.f32 0.35355338, %v1404_v0  ;;  %v5368_v29 = vpop.f32.mrb[15].mxu1  ;;  %v1412_v30 = vsel %vm417_vm2, %v1410_v27, -inf }
 0x73d   :  { %1413 = vmax.xlane.f32.xlu1 %v1412_v30 }
 0x73e   :  { %v1411_v31 = vadd.f32 %v6197_v11, %v1409_v28 }
 0x740   :  { %v1415_v32 = vsel %vm417_vm2, %v1411_v31, -inf }
 0x741   :  { %1416 = vmax.xlane.f32.xlu1 %v1415_v32 }
 0x7ca   :  { %v1414_v35 = vpop.xlane.xlu1 %1413 }
 0x7cb   :  { %v1418_v36 = vsub.f32 %v1410_v27, %v1414_v35 }
 0x7cd   :  { %v1420_v37 = vmul.f32 1.442695, %v1418_v36 }
 0x7ce   :  { %v1417_v38 = vpop.xlane.xlu1 %1416 }
 0x7cf   :  { %5784 = vpow2.f32 %v1420_v37  ;;  %v1419_v40 = vsub.f32 %v1411_v31, %v1417_v38  ;;  %v5000_v37 = vld [vmem:[%s6812_s13] ss:$0 sm:$0xff] }
 0x7d1   :  { %v1422_v41 = vmul.f32 1.442695, %v1419_v40 }
 0x7d3   :  { %5786 = vpow2.f32 %v1422_v41 }
 0x7d9   :  { %v5785_v42 = vpop.eup %5784 }
 0x7da   :  { %v1424_v43 = vsel %vm417_vm2, %v5785_v42, 0.0 }
 0x7db   :  { %1425 = vadd.xlane.f32.xlu1 %v1424_v43 }
 0x7dd   :  { %v5787_v44 = vpop.eup %5786 }
 0x7de   :  { %v1427_v45 = vsel %vm417_vm2, %v5787_v44, 0.0 }
 0x7df   :  { %1428 = vadd.xlane.f32.xlu1 %v1427_v45 }
 0x7f0   :  { %1434 = vrot.lane.b32.xlu1 %v6184_v7, %s6841_s12 }
 0x7f4   :  { %1747 = vrot.lane.b32.xlu1 %v6179_v4, %s6839_s4 }
 0x806   :  { %v1009_v46 = vpop.f32.mrb[8].mxu0 }
 0x807   :  { %v5343_v47 = vpop.f32.mrb[9].mxu0  ;;  %5351 = vmatprep.mubr.msk.f32.mxu0 %vm417_vm2, %v1009_v46 }
 0x808   :  { %5352 = vmatmul.mubr.msk.f32.vlgmr.msra.gmra.mrb[10].mxu0 %vm417_vm2, %v1086_v24 }
 0x809   :  { %5356 = vmatprep.mubr.msk.f32.mxu0 %vm417_vm2, %v6249_v53  ;;  %5355 = vmatpush3.msra.mxu0 %v163_v34 }
 0x80a   :  { %5369 = vmatprep.subr.mxu0 %v5916_v56 }
 0x810   :  { %5357 = vmatmul.mubr.msk.f32.vlgmr.msra.gmra.mrb[10].mxu0 %vm417_vm2, %v6227_v39 }
 0x811   :  { %5371 = vmatprep.mubr.msk.f32.mxu0 %vm5917_vm1, %v5916_v56 }
 0x868   :  { %v1426_v48 = vpop.xlane.xlu1 %1425 }
 0x869   :  { %5788 = vrcp.f32 %v1426_v48 }
 0x86c   :  { %v1429_v4 = vpop.xlane.xlu1 %1428 }
 0x86d   :  { %5790 = vrcp.f32 %v1429_v4 }
 0x870   :  { %v1435_v51 = vpop.permute.xlu1 %1434 }
 0x871   :  { %5370 = vmatpush3.msra.mxu0 %v1435_v51 }
 0x872   :  { %5379 = vmatprep.subr.mxu0 %v165_v50 }
 0x873   :  { %v5789_v53 = vpop.eup %5788 }
 0x874   :  { %v1432_v55 = vmul.f32 %v5789_v53, %v5785_v42  ;;  %v1748_v3 = vpop.permute.xlu1 %1747 }
 0x876   :  { %5372 = vmatmul.mubr.msk.f32.vlgmr.msra.gmra.mrb[12].mxu0 %vm417_vm2, %v1432_v55 }
 0x877   :  { %v5791_v39 = vpop.eup %5790  ;;  %5380 = vmatpush3.msra.mxu0 %v165_v50 }
 0x878   :  { %v1433_v58 = vmul.f32 %v5791_v39, %v5787_v44  ;;  %5389 = vmatprep.subr.mxu0 %v5916_v56 }
 0x87a   :  { %5377 = vmatmul.mubr.msk.f32.vlgmr.msra.gmra.mrb[16].mxu1 %vm417_vm2, %v1433_v58 }
 0x87b   :  { %5385 = vmatpush3.xpose.msk.msra.mxu1 %vm417_vm2, %v1672_v52  ;;  %5386 = vmatprep.mubr.msk.f32.mxu1 %vm5917_vm1, %v5916_v56 }
 0x87c   :  { %5394 = vmatprep.subr.mxu1 %v5916_v56 }
 0x87e   :  { %5387 = vmatmul.mubr.msk.f32.vlgmr.msra.gmra.mrb[18].mxu1 %vm417_vm2, %v1670_v59  ;;  %v2142_v59 = vld [vmem:[%s6815_s16 + $0x10] sm:$0xff] }
 0x87f   :  { %5396 = vmatprep.mubr.msk.f32.mxu1 %vm5917_vm1, %v5916_v56 }
 0x949   :  { %v1506_v60 = vpop.f32.mrb[12].mxu0 }
 0x94a   :  { %v5373_v61 = vpop.f32.mrb[13].mxu0  ;;  %5381 = vmatprep.mubr.msk.f32.mxu0 %vm417_vm2, %v1506_v60  ;;  %v2143_v60 = vld [vmem:[%s6815_s16 + $0x18] sm:$0xff] }
 0x94b   :  { %v5659_v61 = vpack.c.bf16 %v2143_v60, %v2142_v59 }
 0x94d   :  { %v1582_v62 = vpop.f32.mrb[16].mxu1 }
 0x94e   :  { %v5378_v2 = vpop.f32.mrb[17].mxu1  ;;  %5382 = vmatmul.mubr.msk.f32.vlgmr.msra.gmra.mrb[10].mxu0 %vm417_vm2, %v1582_v62 }
 0x94f   :  { %5390 = vmatpush3.xpose.msk.msra.mxu0 %vm417_vm2, %v1750_v57  ;;  %5391 = vmatprep.mubr.msk.f32.mxu0 %vm5917_vm1, %v5916_v56  ;;  %v2141_v57 = vld [vmem:[%s6815_s16 + $0x8] sm:$0xff] }
 0x950   :  { %5399 = vmatprep.subr.mxu0 %v5916_v56 }
 0x951   :  { %v1743_v5 = vpop.f32.mrb[18].mxu1 }
 0x952   :  { %v1825_v8 = vmul.f32 0.35355338, %v1743_v5  ;;  %v5388_v9 = vpop.f32.mrb[19].mxu1  ;;  %5392 = vmatmul.mubr.msk.f32.vlgmr.msra.gmra.mrb[14].mxu0 %vm417_vm2, %v1748_v3 }
 0x953   :  { %5401 = vmatprep.mubr.msk.f32.mxu0 %vm5917_vm1, %v5916_v56 }
 0x954   :  { %v1827_v10 = vadd.f32 %v6209_v22, %v1825_v8 }
 0x956   :  { %v1829_v12 = vsel %vm417_vm2, %v1827_v10, -inf }
 0x957   :  { %1830 = vmax.xlane.f32.xlu0 %v1829_v12  ;;  %v5001_v12 = vld [vmem:[%s6813_s14] ss:$0 sm:$0xff] }
 0x9e4   :  { %v1831_v13 = vpop.xlane.xlu0 %1830 }
 0x9e5   :  { %v1835_v14 = vsub.f32 %v1827_v10, %v1831_v13 }
 0x9e7   :  { %v1837_v15 = vmul.f32 1.442695, %v1835_v14 }
 0x9e9   :  { %5792 = vpow2.f32 %v1837_v15 }
 0x9f3   :  { %v5793_v16 = vpop.eup %5792 }
 0x9f4   :  { %v1841_v17 = vsel %vm417_vm2, %v5793_v16, 0.0 }
 0x9f5   :  { %1842 = vadd.xlane.f32.xlu0 %v1841_v17 }
 0xa25   :  { %v1821_v18 = vpop.f32.mrb[14].mxu0 }
 0xa26   :  { %v1826_v19 = vmul.f32 0.35355338, %v1821_v18  ;;  %v5393_v20 = vpop.f32.mrb[15].mxu0 }
 0xa28   :  { %v1828_v21 = vadd.f32 %v6197_v11, %v1826_v19 }
 0xa2a   :  { %v1832_v23 = vsel %vm417_vm2, %v1828_v21, -inf }
 0xa2b   :  { %1833 = vmax.xlane.f32.xlu1 %v1832_v23  ;;  %v2251_v23 = vld [vmem:[%s6817_s18 + $0x8] sm:$0xff] }
 0xa3c   :  { %1927 = vrot.lane.b32.xlu1 %v6182_v6, %s6839_s4 }
 0xa82   :  { %v1843_v0 = vpop.xlane.xlu0 %1842 }
 0xab8   :  { %v1834_v24 = vpop.xlane.xlu1 %1833 }
 0xab9   :  { %v1836_v63 = vsub.f32 %v1828_v21, %v1834_v24  ;;  %v2250_v21 = vld [vmem:[%s6817_s18] sm:$0xff] }
 0xaba   :  { %v5663_v24 = vpack.c.bf16 %v2251_v23, %v2250_v21  ;;  %v5014_v21 = vld [vmem:[%s6866_s9 + $0x38] sm:$0xff]  ;;  %v5023_v23 = vld [vmem:[%s6868_s10 + $0x30] sm:$0xff] }
 0xabb   :  { %v1839_v25 = vmul.f32 1.442695, %v1836_v63  ;;  %v2252_v63 = vld [vmem:[%s6817_s18 + $0x10] sm:$0xff] }
 0xabc   :  { %v1928_v26 = vpop.permute.xlu1 %1927 }
 0xabd   :  { %5794 = vpow2.f32 %v1839_v25  ;;  %5400 = vmatpush3.msra.mxu0 %v1928_v26  ;;  %v2253_v25 = vld [vmem:[%s6817_s18 + $0x18] sm:$0xff] }
 0xabe   :  { %5796 = vrcp.f32 %v1843_v0  ;;  %5404 = vmatprep.subr.mxu0 %v166_v33  ;;  %v5667_v26 = vpack.c.bf16 %v2253_v25, %v2252_v63  ;;  %v5024_v63 = vld [vmem:[%s6868_s10 + $0x38] sm:$0xff] }
 0xabf   :  { %v5699_v25 = vpack.c.bf16 %v5024_v63, %v5023_v23 }
 0xac7   :  { %v5795_v1 = vpop.eup %5794 }
 0xac8   :  { %v1844_v27 = vsel %vm417_vm2, %v5795_v1, 0.0  ;;  %v5797_v29 = vpop.eup %5796 }
 0xac9   :  { %1845 = vadd.xlane.f32.xlu0 %v1844_v27  ;;  %v1849_v30 = vmul.f32 %v5797_v29, %v5793_v16  ;;  %v5002_v16 = vld [vmem:[%s6814_s15] ss:$0 sm:$0xff]  ;;  %v2255_v27 = vld [vmem:[%s6817_s18 + $0x28] sm:$0xff]  ;;  %v2257_v29 = vld [vmem:[%s6817_s18 + $0x38] sm:$0xff] }
 0xadf   :  { %1851 = vrot.lane.b32.xlu0 %v6184_v7, %s6839_s4 }
 0xb56   :  { %v1846_v28 = vpop.xlane.xlu0 %1845 }
 0xb57   :  { %5798 = vrcp.f32 %v1846_v28  ;;  %v2256_v28 = vld [vmem:[%s6817_s18 + $0x30] sm:$0xff] }
 0xb5a   :  { %v1852_v6 = vpop.permute.xlu0 %1851 }
 0xb5b   :  { %5395 = vmatpush3.msra.mxu1 %v1852_v6  ;;  %v5003_v6 = vld [vmem:[%s6816_s17] ss:$0 sm:$0xff] }
 0xb5c   :  { %5397 = vmatmul.mubr.msk.f32.vlgmr.msra.gmra.mrb[20].mxu1 %vm417_vm2, %v1849_v30  ;;  %v5675_v30 = vpack.c.bf16 %v2257_v29, %v2256_v28 }
 0xb61   :  { %v5799_v31 = vpop.eup %5798 }
 0xb62   :  { %v1850_v32 = vmul.f32 %v5799_v31, %v5795_v1  ;;  %v2254_v1 = vld [vmem:[%s6817_s18 + $0x20] sm:$0xff] }
 0xb63   :  { %v5671_v0 = vpack.c.bf16 %v2255_v27, %v2254_v1  ;;  %v5017_v1 = vld [vmem:[%s6867_s0 + $0x28] sm:$0xff] }
 0xb64   :  { %5402 = vmatmul.mubr.msk.f32.vlgmr.msra.gmra.mrb[16].mxu0 %vm417_vm2, %v1850_v32 }
 0xb65   :  { %5405 = vmatpush3.msra.mxu0 %v166_v33 }
 0xb66   :  { %5664 = vmatprep.subr.bf16.mxu0 %v5663_v24 }
 0xc2f   :  { %v1923_v7 = vpop.f32.mrb[20].mxu1 }
 0xc30   :  { %v5398_v34 = vpop.f32.mrb[21].mxu1  ;;  %5406 = vmatprep.mubr.msk.f32.mxu0 %vm417_vm2, %v1923_v7 }
 0xc37   :  { %v1999_v35 = vpop.f32.mrb[16].mxu0 }
 0xc38   :  { %v5403_v36 = vpop.f32.mrb[17].mxu0  ;;  %5407 = vmatmul.mubr.msk.f32.vlgmr.msra.gmra.mrb[10].mxu0 %vm417_vm2, %v1999_v35 }
 0xc39   :  { %5666 = vmatpush3.bf16.msra.mxu0 %v5663_v24 }
 0xc3a   :  { %5668 = vmatprep.subr.bf16.mxu0 %v5667_v26 }
 0xc3d   :  { %5670 = vmatpush3.bf16.msra.mxu0 %v5667_v26  ;;  %v5016_v26 = vld [vmem:[%s6867_s0 + $0x20] sm:$0xff] }
 0xc3e   :  { %5672 = vmatprep.subr.bf16.mxu0 %v5671_v0  ;;  %v5687_v27 = vpack.c.bf16 %v5017_v1, %v5016_v26 }
 0xc41   :  { %5674 = vmatpush3.bf16.msra.mxu0 %v5671_v0 }
 0xc42   :  { %5676 = vmatprep.subr.bf16.mxu0 %v5675_v30 }
 0xc45   :  { %5678 = vmatpush3.bf16.msra.mxu0 %v5675_v30 }
 0xd0b   :  { %v5408_v38 = vpop.f32.mrb[10].mxu0 }
 0xd0c   :  { %v2093_v40 = vadd.f32 %v5408_v38, %v5000_v37  ;;  %v2075_v41 = vpop.f32.mrb[11].mxu0 }
 0xd0d   :  { %v2092_v42 = vadd.f32 %v5000_v37, %v2075_v41 }
 0xd0e   :  { %v2095_v43 = vadd.f32 %v2093_v40, %v6139_v54 }
 0xd0f   :  { %v2094_v44 = vadd.f32 %v2092_v42, %v6127_v49  ;;  %v2140_v49 = vld [vmem:[%s6815_s16] sm:$0xff] }
 0xd10   :  { %v2101_v45 = vsel %vm102_vm0, %v2095_v43, 0.0  ;;  %v5655_v58 = vpack.c.bf16 %v2141_v57, %v2140_v49 }
 0xd11   :  { %2102 = vadd.xlane.f32.xlu0 %v2101_v45  ;;  %v2098_v46 = vsel %vm102_vm0, %v2094_v44, 0.0 }
 0xd12   :  { %2099 = vadd.xlane.f32.xlu1 %v2098_v46  ;;  %5656 = vmatprep.subr.bf16.mxu1 %v5655_v58 }
 0xd13   :  { %5658 = vmatpush3.bf16.msra.mxu1 %v5655_v58 }
 0xd14   :  { %5660 = vmatprep.subr.bf16.mxu1 %v5659_v61 }
 0xd17   :  { %5662 = vmatpush3.bf16.msra.mxu1 %v5659_v61 }
 0xd9e   :  { %v2103_v47 = vpop.xlane.xlu0 %2102 }
 0xd9f   :  { %v2105_v48 = vmul.f32 0.03125, %v2103_v47  ;;  %v2100_v4 = vpop.xlane.xlu1 %2099 }
 0xda0   :  { %v2104_v50 = vmul.f32 0.03125, %v2100_v4 }
 0xda1   :  { %v2107_v51 = vsub.f32 %v2095_v43, %v2105_v48 }
 0xda2   :  { %v2106_v52 = vsub.f32 %v2094_v44, %v2104_v50 }
 0xda3   :  { %v2109_v53 = vmul.f32 %v2107_v51, %v2107_v51 }
 0xda4   :  { %v2108_v55 = vmul.f32 %v2106_v52, %v2106_v52 }
 0xda5   :  { %v2113_v39 = vsel %vm102_vm0, %v2109_v53, 0.0  ;;  %v5006_v53 = vld [vmem:[%s6818_s19] ss:$0 sm:$0xff] }
 0xda6   :  { %2114 = vadd.xlane.f32.xlu1 %v2113_v39  ;;  %v2110_v54 = vsel %vm102_vm0, %v2108_v55, 0.0 }
 0xda7   :  { %2111 = vadd.xlane.f32.xlu0 %v2110_v54 }
 0xe33   :  { %v2115_v62 = vpop.xlane.xlu1 %2114 }
 0xe34   :  { %v2117_v2 = vmul.f32 0.03125, %v2115_v62  ;;  %v2112_v3 = vpop.xlane.xlu0 %2111 }
 0xe35   :  { %v2116_v5 = vmul.f32 0.03125, %v2112_v3 }
 0xe36   :  { %v2119_v8 = vadd.f32 1e-12, %v2117_v2 }
 0xe37   :  { %v2118_v9 = vadd.f32 1e-12, %v2116_v5 }
 0xe38   :  { %5800 = vrsqrt.f32 %v2119_v8 }
 0xe39   :  { %5802 = vrsqrt.f32 %v2118_v9 }
 0xe42   :  { %v5801_v10 = vpop.eup %5800 }
 0xe43   :  { %v5803_v13 = vpop.eup %5802  ;;  %v2123_v14 = vmul.f32 %v5801_v10, %v2107_v51 }
 0xe44   :  { %v2122_v15 = vmul.f32 %v5803_v13, %v2106_v52 }
 0xe45   :  { %v2131_v17 = vmul.f32 %v5001_v12, %v2123_v14  ;;  %v5011_v14 = vld [vmem:[%s6866_s9 + $0x20] sm:$0xff] }
 0xe46   :  { %v2130_v18 = vmul.f32 %v5001_v12, %v2122_v15  ;;  %v5012_v15 = vld [vmem:[%s6866_s9 + $0x28] sm:$0xff] }
 0xe47   :  { %v2139_v20 = vadd.f32 %v5002_v16, %v2131_v17  ;;  %v5021_v17 = vld [vmem:[%s6868_s10 + $0x20] sm:$0xff] }
 0xe48   :  { %v2138_v19 = vadd.f32 %v5002_v16, %v2130_v18  ;;  %v5679_v16 = vpack.c.bf16 %v5012_v15, %v5011_v14  ;;  %v5022_v18 = vld [vmem:[%s6868_s10 + $0x28] sm:$0xff] }
 0xe4a   :  { %5417 = vmatprep.mubr.msk.f32.mxu1 %vm102_vm0, %v2138_v19  ;;  %5680 = vmatprep.subr.bf16.mxu1 %v5679_v16 }
 0xe4b   :  { %5418 = vmatmul.mubr.msk.f32.vlgmr.msra.gmra.mrb[22].mxu1 %vm102_vm0, %v2139_v20 }
 0xe4c   :  { %5682 = vmatpush3.bf16.msra.mxu1 %v5679_v16 }
 0xf1e   :  { %v5419_v31 = vpop.f32.mrb[22].mxu1 }
 0xf1f   :  { %v2229_v32 = vadd.f32 %v5419_v31, %v5003_v6  ;;  %v2223_v33 = vpop.f32.mrb[23].mxu1 }
 0xf20   :  { %v2224_v7 = vadd.f32 %v5003_v6, %v2223_v33  ;;  %v5009_v33 = vld [vmem:[%s6819_s20] ss:$0 sm:$0xff] }
 0xf21   :  { %v2235_v34 = vmul.f32 0.044715, %v2229_v32  ;;  %v2233_v50 = vmul.f32 0.5, %v2229_v32 }
 0xf22   :  { %v2234_v35 = vmul.f32 0.044715, %v2224_v7  ;;  %v2232_v48 = vmul.f32 0.5, %v2224_v7 }
 0xf23   :  { %v2237_v36 = vmul.f32 %v2235_v34, %v2229_v32 }
 0xf24   :  { %v2236_v37 = vmul.f32 %v2234_v35, %v2224_v7 }
 0xf25   :  { %v2239_v38 = vmul.f32 %v2237_v36, %v2229_v32  ;;  %v5010_v36 = vld [vmem:[%s6820_s21] ss:$0 sm:$0xff] }
 0xf26   :  { %v2238_v40 = vmul.f32 %v2236_v37, %v2224_v7 }
 0xf27   :  { %v2241_v41 = vadd.f32 %v2239_v38, %v2229_v32 }
 0xf28   :  { %v2240_v42 = vadd.f32 %v2238_v40, %v2224_v7  ;;  %v5018_v40 = vld [vmem:[%s6867_s0 + $0x30] sm:$0xff] }
 0xf29   :  { %v2243_v43 = vmul.f32 0.7978846, %v2241_v41  ;;  %v5019_v41 = vld [vmem:[%s6867_s0 + $0x38] sm:$0xff] }
 0xf2a   :  { %v2242_v44 = vmul.f32 0.7978846, %v2240_v42 }
 0xf2b   :  { %5804 = vtanh.f32 %v2243_v43 }
 0xf2c   :  { %5806 = vtanh.f32 %v2242_v44  ;;  %v5691_v44 = vpack.c.bf16 %v5019_v41, %v5018_v40 }
 0xf35   :  { %v5805_v45 = vpop.eup %5804 }
 0xf36   :  { %v5807_v46 = vpop.eup %5806  ;;  %v2247_v47 = vadd.f32 1.0, %v5805_v45  ;;  %v5037_v45 = vld [vmem:[%s6873_s5 + $0x1] ss:$0 sm:$0xff] }
 0xf37   :  { %v2246_v4 = vadd.f32 1.0, %v5807_v46 }
 0xf38   :  { %v2249_v52 = vmul.f32 %v2247_v47, %v2233_v50 }
 0xf39   :  { %v2248_v51 = vmul.f32 %v2246_v4, %v2232_v48 }
 0xf3b   :  { %5436 = vmatprep.mubr.msk.f32.mxu0 %vm2265_vm3, %v2248_v51  ;;  %v5034_v51 = vld [vmem:[%s6871_s2 + $0x1] ss:$0 sm:$0xff]  ;;  %s6876_s2 = smov 120  }
 0xf3c   :  { %5437 = vmatmul.mubr.msk.f32.vlgmr.msra.gmra.mrb[18].mxu0 %vm2265_vm3, %v2249_v52 }
0x100f   :  { %v5438_v55 = vpop.f32.mrb[18].mxu0 }
0x1010   :  { %v2344_v39 = vadd.f32 %v5438_v55, %v5006_v53  ;;  %v2338_v54 = vpop.f32.mrb[19].mxu0  ;;  %v5031_v55 = vld [vmem:[%s6872_s1 + $0x1] ss:$0 sm:$0xff] }
0x1011   :  { %v2339_v49 = vadd.f32 %v5006_v53, %v2338_v54 }
0x1012   :  { %v2348_v57 = vadd.f32 %v2344_v39, %v2139_v20  ;;  %v5013_v20 = vld [vmem:[%s6866_s9 + $0x30] sm:$0xff] }
0x1013   :  { %v2347_v58 = vadd.f32 %v2339_v49, %v2138_v19  ;;  %v5695_v19 = vpack.c.bf16 %v5022_v18, %v5021_v17  ;;  %v5683_v24 = vpack.c.bf16 %v5014_v21, %v5013_v20 }
0x1014   :  { %v2354_v59 = vsel %vm102_vm0, %v2348_v57, 0.0 }
0x1015   :  { %2355 = vadd.xlane.f32.xlu1 %v2354_v59  ;;  %v2351_v60 = vsel %vm102_vm0, %v2347_v58, 0.0  ;;  %5696 = vmatprep.subr.bf16.mxu0 %v5695_v19 }
0x1016   :  { %2352 = vadd.xlane.f32.xlu0 %v2351_v60  ;;  %5698 = vmatpush3.bf16.msra.mxu0 %v5695_v19 }
0x1017   :  { %5684 = vmatprep.subr.bf16.mxu1 %v5683_v24  ;;  %5700 = vmatprep.subr.bf16.mxu0 %v5699_v25 }
0x1018   :  { %5686 = vmatpush3.bf16.msra.mxu1 %v5683_v24 }
0x1019   :  { %5688 = vmatprep.subr.bf16.mxu1 %v5687_v27 }
0x101a   :  { %5702 = vmatpush3.bf16.msra.mxu0 %v5699_v25 }
0x101b   :  { %5482 = vmatprep.subr.mxu0 %v5916_v56 }
0x10a2   :  { %v2356_v61 = vpop.xlane.xlu1 %2355 }
0x10a3   :  { %v2358_v62 = vmul.f32 0.03125, %v2356_v61  ;;  %v2353_v2 = vpop.xlane.xlu0 %2352 }
0x10a4   :  { %v2357_v3 = vmul.f32 0.03125, %v2353_v2 }
0x10a5   :  { %v2360_v5 = vsub.f32 %v2348_v57, %v2358_v62 }
0x10a6   :  { %v2359_v8 = vsub.f32 %v2347_v58, %v2357_v3 }
0x10a7   :  { %v2362_v9 = vmul.f32 %v2360_v5, %v2360_v5 }
0x10a8   :  { %v2361_v10 = vmul.f32 %v2359_v8, %v2359_v8 }
0x10a9   :  { %v2366_v12 = vsel %vm102_vm0, %v2362_v9, 0.0 }
0x10aa   :  { %2367 = vadd.xlane.f32.xlu1 %v2366_v12  ;;  %v2363_v13 = vsel %vm102_vm0, %v2361_v10, 0.0 }
0x10ab   :  { %2364 = vadd.xlane.f32.xlu0 %v2363_v13 }
0x1137   :  { %v2368_v0 = vpop.xlane.xlu1 %2367 }
0x1138   :  { %v2370_v28 = vmul.f32 0.03125, %v2368_v0  ;;  %v2365_v29 = vpop.xlane.xlu0 %2364 }
0x1139   :  { %v2369_v30 = vmul.f32 0.03125, %v2365_v29 }
0x113a   :  { %v2372_v6 = vadd.f32 1e-12, %v2370_v28 }
0x113b   :  { %v2371_v31 = vadd.f32 1e-12, %v2369_v30 }
0x113c   :  { %5808 = vrsqrt.f32 %v2372_v6 }
0x113d   :  { %5810 = vrsqrt.f32 %v2371_v31 }
0x1146   :  { %v5809_v32 = vpop.eup %5808 }
0x1147   :  { %v5811_v7 = vpop.eup %5810  ;;  %v2376_v34 = vmul.f32 %v5809_v32, %v2360_v5  ;;  %v6547_v32 = vld [vmem:[%s6874_s6 + $0x1] ss:$0 sm:$0xff] }
0x1148   :  { %v2375_v35 = vmul.f32 %v5811_v7, %v2359_v8 }
0x1149   :  { %v2384_v37 = vmul.f32 %v5009_v33, %v2376_v34 }
0x114a   :  { %v2383_v38 = vmul.f32 %v5009_v33, %v2375_v35 }
0x114b   :  { %v6454_v43 = vadd.f32 %v5010_v36, %v2384_v37 }
0x114c   :  { %v6452_v42 = vadd.f32 %v5010_v36, %v2383_v38 }
0x114e   :  { %5447 = vmatprep.mubr.msk.f32.mxu1 %vm102_vm0, %v6452_v42  ;;  %5469 = vmatprep.mubr.msk.f32.mxu0 %vm102_vm0, %v6452_v42 }
0x114f   :  { %5448 = vmatmul.mubr.msk.f32.vlgmr.msra.gmra.mrb[24].mxu1 %vm102_vm0, %v6454_v43  ;;  %5470 = vmatmul.mubr.msk.f32.vlgmr.msra.gmra.mrb[20].mxu0 %vm102_vm0, %v6454_v43 }
0x1150   :  { %5690 = vmatpush3.bf16.msra.mxu1 %v5687_v27  ;;  %5458 = vmatprep.mubr.msk.f32.mxu1 %vm102_vm0, %v6452_v42 }
0x1151   :  { %5692 = vmatprep.subr.bf16.mxu1 %v5691_v44  ;;  %5484 = vmatprep.mubr.msk.f32.mxu0 %vm5917_vm1, %v5916_v56 }
0x1154   :  { %5694 = vmatpush3.bf16.msra.mxu1 %v5691_v44 }
0x1155   :  { %5472 = vmatprep.subr.mxu1 %v5916_v56 }
0x1157   :  { %5459 = vmatmul.mubr.msk.f32.vlgmr.msra.gmra.mrb[26].mxu1 %vm102_vm0, %v6454_v43 }
0x1158   :  { %5474 = vmatprep.mubr.msk.f32.mxu1 %vm5917_vm1, %v5916_v56 }
0x1222   :  { %v5449_v46 = vpop.f32.mrb[24].mxu1  ;;  %v5471_v47 = vpop.f32.mrb[20].mxu0 }
0x1223   :  { %v2499_v48 = vpop.f32.mrb[25].mxu1  ;;  %v2661_v4 = vpop.f32.mrb[21].mxu0  ;;  %v6501_v57 = vadd.f32 %v5449_v46, %v5031_v55  ;;  %v6504_v58 = vadd.f32 %v5471_v47, %v5037_v45  ;;  %v6567_v47 = vld [vmem:[%s6874_s6] ss:$0 sm:$0xff]  ;;  %s6878_s6 = smov 104  }
0x1224   :  { %v6476_v50 = vadd.f32 %v5037_v45, %v2661_v4  ;;  %v6490_v54 = vadd.f32 %v5031_v55, %v2499_v48 }
0x1226   :  { %5483 = vmatpush3.msra.mxu0 %v6476_v50 }
0x1227   :  { %5492 = vmatprep.subr.mxu0 %v5916_v56 }
0x122a   :  { %v5460_v52 = vpop.f32.mrb[26].mxu1 }
0x122b   :  { %v2580_v53 = vpop.f32.mrb[27].mxu1  ;;  %v6493_v49 = vadd.f32 %v5460_v52, %v5034_v51 }
0x122c   :  { %v6486_v39 = vadd.f32 %v5034_v51, %v2580_v53 }
0x122e   :  { %5473 = vmatpush3.xpose.msk.msra.mxu1 %vm417_vm2, %v6486_v39 }
0x122f   :  { %5477 = vmatprep.subr.mxu1 %v5916_v56 }
0x1231   :  { %5475 = vmatmul.mubr.msk.f32.vlgmr.msra.gmra.mrb[28].mxu1 %vm417_vm2, %v6490_v54 }
0x1232   :  { %5478 = vmatpush3.xpose.msk.msra.mxu1 %vm417_vm2, %v6493_v49  ;;  %5479 = vmatprep.mubr.msk.f32.mxu1 %vm5917_vm1, %v5916_v56 }
0x1233   :  { %5487 = vmatprep.subr.mxu1 %v5916_v56 }
0x1235   :  { %5480 = vmatmul.mubr.msk.f32.vlgmr.msra.gmra.mrb[30].mxu1 %vm417_vm2, %v6501_v57 }
0x1236   :  { %5488 = vmatpush3.msra.mxu1 %v6504_v58  ;;  %5489 = vmatprep.mubr.msk.f32.mxu1 %vm5917_vm1, %v5916_v56 }
0x1237   :  { %5497 = vmatprep.subr.mxu1 %v5916_v56 }
0x1304   :  { %v2742_v59 = vpop.f32.mrb[28].mxu1 }
0x1305   :  { %v5476_v60 = vpop.f32.mrb[29].mxu1  ;;  %v2822_v14 = vmul.f32 0.35355338, %v2742_v59 }
0x1308   :  { %v2818_v61 = vpop.f32.mrb[30].mxu1 }
0x1309   :  { %v2823_v62 = vmul.f32 0.35355338, %v2818_v61  ;;  %v5481_v2 = vpop.f32.mrb[31].mxu1 }
0x130b   :  { %v2825_v3 = vadd.f32 %v6197_v11, %v2823_v62  ;;  %v2824_v11 = vadd.f32 %v6209_v22, %v2822_v14 }
0x130d   :  { %v2829_v5 = vsel %vm417_vm2, %v2825_v3, -inf  ;;  %v2826_v15 = vsel %vm417_vm2, %v2824_v11, -inf }
0x130e   :  { %2830 = vmax.xlane.f32.xlu0 %v2829_v5 }
0x1324   :  { %3074 = vrot.lane.b32.xlu0 %v6493_v49, %s6876_s2 }
0x139b   :  { %v2831_v8 = vpop.xlane.xlu0 %2830 }
0x139c   :  { %v2833_v9 = vsub.f32 %v2825_v3, %v2831_v8 }
0x139e   :  { %v2836_v10 = vmul.f32 1.442695, %v2833_v9 }
0x139f   :  { %v3075_v19 = vpop.permute.xlu0 %3074 }
0x13a0   :  { %5812 = vpow2.f32 %v2836_v10 }
0x13aa   :  { %v5813_v12 = vpop.eup %5812 }
0x13ab   :  { %v2841_v13 = vsel %vm417_vm2, %v5813_v12, 0.0 }
0x13ac   :  { %2842 = vadd.xlane.f32.xlu1 %v2841_v13 }
0x13bd   :  { %3072 = vrot.lane.b32.xlu1 %v6501_v57, %s6876_s2 }
0x13e1   :  { %2827 = vmax.xlane.f32.xlu1 %v2826_v15 }
0x13f2   :  { %2994 = vrot.lane.b32.xlu1 %v6490_v54, %s6876_s2 }
0x1439   :  { %v2843_v16 = vpop.xlane.xlu1 %2842 }
0x143a   :  { %5814 = vrcp.f32 %v2843_v16 }
0x143d   :  { %v3073_v22 = vpop.permute.xlu1 %3072 }
0x1444   :  { %v5815_v17 = vpop.eup %5814 }
0x1445   :  { %v2847_v18 = vmul.f32 %v5815_v17, %v5813_v12 }
0x1447   :  { %5490 = vmatmul.mubr.msk.f32.vlgmr.msra.gmra.mrb[32].mxu1 %vm417_vm2, %v2847_v18 }
0x1448   :  { %5498 = vmatpush3.xpose.msk.msra.mxu1 %vm417_vm2, %v3075_v19  ;;  %5499 = vmatprep.mubr.msk.f32.mxu1 %vm5917_vm1, %v5916_v56 }
0x1449   :  { %5507 = vmatprep.subr.mxu1 %v5916_v56 }
0x144b   :  { %5500 = vmatmul.mubr.msk.f32.vlgmr.msra.gmra.mrb[34].mxu1 %vm417_vm2, %v3073_v22 }
0x144c   :  { %5509 = vmatprep.mubr.msk.f32.mxu1 %vm5917_vm1, %v5916_v56 }
0x146e   :  { %v2828_v20 = vpop.xlane.xlu1 %2827 }
0x146f   :  { %v2832_v21 = vsub.f32 %v2824_v11, %v2828_v20 }
0x1471   :  { %v2834_v23 = vmul.f32 1.442695, %v2832_v21 }
0x1472   :  { %v2995_v29 = vpop.permute.xlu1 %2994 }
0x1473   :  { %5816 = vpow2.f32 %v2834_v23 }
0x147d   :  { %v5817_v24 = vpop.eup %5816 }
0x147e   :  { %v2838_v63 = vsel %vm417_vm2, %v5817_v24, 0.0 }
0x147f   :  { %2839 = vadd.xlane.f32.xlu0 %v2838_v63  ;;  %v5026_v63 = vld [vmem:[%s6875_s3 + $0x20] sm:$0xff] }
0x1495   :  { %2996 = vrot.lane.b32.xlu0 %v6486_v39, %s6876_s2 }
0x150c   :  { %v2840_v25 = vpop.xlane.xlu0 %2839 }
0x150d   :  { %5818 = vrcp.f32 %v2840_v25 }
0x1510   :  { %v2997_v27 = vpop.permute.xlu0 %2996 }
0x1517   :  { %v5819_v26 = vpop.eup %5818 }
0x1518   :  { %v2846_v1 = vmul.f32 %v5819_v26, %v5817_v24  ;;  %v5027_v24 = vld [vmem:[%s6875_s3 + $0x28] sm:$0xff] }
0x151a   :  { %5485 = vmatmul.mubr.msk.f32.vlgmr.msra.gmra.mrb[22].mxu0 %vm417_vm2, %v2846_v1  ;;  %v6535_v0 = vpop.f32.mrb[32].mxu1 }
0x151b   :  { %5493 = vmatpush3.xpose.msk.msra.mxu0 %vm417_vm2, %v2997_v27  ;;  %v5491_v28 = vpop.f32.mrb[33].mxu1  ;;  %5494 = vmatprep.mubr.msk.f32.mxu0 %vm5917_vm1, %v5916_v56 }
0x151c   :  { %5502 = vmatprep.subr.mxu0 %v5916_v56 }
0x151e   :  { %5495 = vmatmul.mubr.msk.f32.vlgmr.msra.gmra.mrb[24].mxu0 %vm417_vm2, %v2995_v29  ;;  %v3146_v30 = vpop.f32.mrb[34].mxu1 }
0x151f   :  { %v3151_v6 = vmul.f32 0.35355338, %v3146_v30  ;;  %v5501_v31 = vpop.f32.mrb[35].mxu1  ;;  %5504 = vmatprep.mubr.msk.f32.mxu0 %vm5917_vm1, %v5916_v56 }
0x1521   :  { %v3153_v33 = vadd.f32 %v6547_v32, %v3151_v6 }
0x1523   :  { %v3157_v7 = vsel %vm417_vm2, %v3153_v33, -inf }
0x1524   :  { %3158 = vmax.xlane.f32.xlu1 %v3157_v7 }
0x1535   :  { %3494 = vrot.lane.b32.xlu1 %v6486_v39, %s6877_s11 }
0x1539   :  { %3492 = vrot.lane.b32.xlu1 %v6490_v54, %s6877_s11 }
0x153d   :  { %3572 = vrot.lane.b32.xlu1 %v6493_v49, %s6877_s11 }
0x15b1   :  { %v3159_v34 = vpop.xlane.xlu1 %3158 }
0x15b2   :  { %v3161_v35 = vsub.f32 %v3153_v33, %v3159_v34 }
0x15b4   :  { %v3164_v36 = vmul.f32 1.442695, %v3161_v35 }
0x15b5   :  { %v3495_v53 = vpop.permute.xlu1 %3494 }
0x15b6   :  { %5820 = vpow2.f32 %v3164_v36  ;;  %v5028_v36 = vld [vmem:[%s6875_s3 + $0x30] sm:$0xff] }
0x15b9   :  { %v3493_v59 = vpop.permute.xlu1 %3492 }
0x15bd   :  { %v3573_v61 = vpop.permute.xlu1 %3572 }
0x15c0   :  { %v5821_v37 = vpop.eup %5820 }
0x15c1   :  { %v3169_v38 = vsel %vm417_vm2, %v5821_v37, 0.0 }
0x15c2   :  { %3170 = vadd.xlane.f32.xlu0 %v3169_v38 }
0x15d8   :  { %3254 = vrot.lane.b32.xlu0 %v6504_v58, %s6876_s2 }
0x15dc   :  { %3570 = vrot.lane.b32.xlu0 %v6501_v57, %s6877_s11 }
0x15ed   :  { %v6562_v40 = vpop.f32.mrb[22].mxu0 }
0x15ee   :  { %v5486_v41 = vpop.f32.mrb[23].mxu0 }
0x15f1   :  { %v3068_v44 = vpop.f32.mrb[24].mxu0 }
0x15f2   :  { %v3150_v45 = vmul.f32 0.35355338, %v3068_v44  ;;  %v5496_v46 = vpop.f32.mrb[25].mxu0 }
0x15f4   :  { %v3152_v48 = vadd.f32 %v6567_v47, %v3150_v45 }
0x15f6   :  { %v3154_v4 = vsel %vm417_vm2, %v3152_v48, -inf }
0x15f7   :  { %3155 = vmax.xlane.f32.xlu1 %v3154_v4 }
0x164f   :  { %v3171_v51 = vpop.xlane.xlu0 %3170 }
0x1650   :  { %5822 = vrcp.f32 %v3171_v51 }
0x1653   :  { %v3255_v52 = vpop.permute.xlu0 %3254 }
0x1654   :  { %5508 = vmatpush3.msra.mxu1 %v3255_v52 }
0x1655   :  { %5522 = vmatprep.subr.mxu1 %v5916_v56 }
0x1657   :  { %v3571_v62 = vpop.permute.xlu0 %3570 }
0x165a   :  { %v5823_v55 = vpop.eup %5822 }
0x165b   :  { %v3175_v60 = vmul.f32 %v5823_v55, %v5821_v37 }
0x165d   :  { %5510 = vmatmul.mubr.msk.f32.vlgmr.msra.gmra.mrb[36].mxu1 %vm417_vm2, %v3175_v60 }
0x165e   :  { %5523 = vmatpush3.xpose.msk.msra.mxu1 %vm417_vm2, %v3495_v53  ;;  %5524 = vmatprep.mubr.msk.f32.mxu1 %vm5917_vm1, %v5916_v56 }
0x165f   :  { %5527 = vmatprep.subr.mxu1 %v5916_v56 }
0x1661   :  { %5525 = vmatmul.mubr.msk.f32.vlgmr.msra.gmra.mrb[38].mxu1 %vm417_vm2, %v3493_v59 }
0x1662   :  { %5528 = vmatpush3.xpose.msk.msra.mxu1 %vm417_vm2, %v3573_v61  ;;  %5529 = vmatprep.mubr.msk.f32.mxu1 %vm5917_vm1, %v5916_v56 }
0x1663   :  { %5537 = vmatprep.subr.mxu1 %v5916_v56 }
0x1665   :  { %5530 = vmatmul.mubr.msk.f32.vlgmr.msra.gmra.mrb[40].mxu1 %vm417_vm2, %v3571_v62 }
0x1666   :  { %5539 = vmatprep.mubr.msk.f32.mxu1 %vm5917_vm1, %v5916_v56 }
0x1684   :  { %v3156_v2 = vpop.xlane.xlu1 %3155 }
0x1685   :  { %v3160_v3 = vsub.f32 %v3152_v48, %v3156_v2 }
0x1687   :  { %v3162_v5 = vmul.f32 1.442695, %v3160_v3 }
0x1689   :  { %5824 = vpow2.f32 %v3162_v5 }
0x1693   :  { %v5825_v8 = vpop.eup %5824 }
0x1694   :  { %v3166_v9 = vsel %vm417_vm2, %v5825_v8, 0.0 }
0x1695   :  { %3167 = vadd.xlane.f32.xlu0 %v3166_v9 }
0x16ab   :  { %3177 = vrot.lane.b32.xlu0 %v6476_v50, %s6876_s2 }
0x16af   :  { %3750 = vrot.lane.b32.xlu0 %v6504_v58, %s6877_s11 }
0x16b3   :  { %3911 = vrot.lane.b32.xlu0 %v6486_v39, %s6878_s6 }
0x16b7   :  { %3989 = vrot.lane.b32.xlu0 %v6493_v49, %s6878_s6 }
0x16bb   :  { %3909 = vrot.lane.b32.xlu0 %v6490_v54, %s6878_s6 }
0x1722   :  { %v3168_v10 = vpop.xlane.xlu0 %3167 }
0x1723   :  { %5826 = vrcp.f32 %v3168_v10 }
0x1726   :  { %v3178_v12 = vpop.permute.xlu0 %3177 }
0x1727   :  { %5503 = vmatpush3.msra.mxu0 %v3178_v12 }
0x1728   :  { %5512 = vmatprep.subr.mxu0 %v5027_v24 }
0x172a   :  { %v3751_v13 = vpop.permute.xlu0 %3750 }
0x172b   :  { %5538 = vmatpush3.msra.mxu1 %v3751_v13 }
0x172c   :  { %5547 = vmatprep.subr.mxu1 %v5916_v56 }
0x172d   :  { %v5827_v14 = vpop.eup %5826 }
0x172e   :  { %v3174_v11 = vmul.f32 %v5827_v14, %v5825_v8  ;;  %v3912_v38 = vpop.permute.xlu0 %3911 }
0x1730   :  { %5505 = vmatmul.mubr.msk.f32.vlgmr.msra.gmra.mrb[26].mxu0 %vm417_vm2, %v3174_v11  ;;  %v3326_v15 = vpop.f32.mrb[36].mxu1 }
0x1731   :  { %v5511_v39 = vpop.f32.mrb[37].mxu1  ;;  %5513 = vmatpush3.msra.mxu0 %v5027_v24 }
0x1732   :  { %5517 = vmatprep.subr.mxu0 %v5026_v63  ;;  %v3990_v44 = vpop.permute.xlu0 %3989 }
0x1734   :  { %v3566_v16 = vpop.f32.mrb[38].mxu1 }
0x1735   :  { %v3648_v17 = vmul.f32 0.35355338, %v3566_v16  ;;  %v5526_v49 = vpop.f32.mrb[39].mxu1 }
0x1736   :  { %v3910_v46 = vpop.permute.xlu0 %3909 }
0x1737   :  { %v3650_v18 = vadd.f32 %v6567_v47, %v3648_v17 }
0x1738   :  { %v3644_v54 = vpop.f32.mrb[40].mxu1 }
0x1739   :  { %v3649_v19 = vmul.f32 0.35355338, %v3644_v54  ;;  %v5531_v22 = vpop.f32.mrb[41].mxu1  ;;  %v3652_v20 = vsel %vm417_vm2, %v3650_v18, -inf }
0x173a   :  { %3653 = vmax.xlane.f32.xlu1 %v3652_v20 }
0x173b   :  { %v3651_v21 = vadd.f32 %v6547_v32, %v3649_v19 }
0x173d   :  { %v3655_v23 = vsel %vm417_vm2, %v3651_v21, -inf }
0x173e   :  { %3656 = vmax.xlane.f32.xlu1 %v3655_v23 }
0x17c7   :  { %v3654_v25 = vpop.xlane.xlu1 %3653 }
0x17c8   :  { %v3658_v26 = vsub.f32 %v3650_v18, %v3654_v25  ;;  %v5072_v25 = vld [vmem:[%s6812_s13 + $0x1] ss:$0 sm:$0xff] }
0x17ca   :  { %v3660_v1 = vmul.f32 1.442695, %v3658_v26 }
0x17cb   :  { %v3657_v27 = vpop.xlane.xlu1 %3656 }
0x17cc   :  { %5828 = vpow2.f32 %v3660_v1  ;;  %v3659_v28 = vsub.f32 %v3651_v21, %v3657_v27  ;;  %v5029_v21 = vld [vmem:[%s6875_s3 + $0x38] sm:$0xff] }
0x17ce   :  { %v3662_v29 = vmul.f32 1.442695, %v3659_v28 }
0x17d0   :  { %5830 = vpow2.f32 %v3662_v29 }
0x17d6   :  { %v5829_v30 = vpop.eup %5828 }
0x17d7   :  { %v3664_v6 = vsel %vm417_vm2, %v5829_v30, 0.0 }
0x17d8   :  { %3665 = vadd.xlane.f32.xlu1 %v3664_v6 }
0x17da   :  { %v5831_v31 = vpop.eup %5830 }
0x17db   :  { %v3667_v33 = vsel %vm417_vm2, %v5831_v31, 0.0 }
0x17dc   :  { %3668 = vadd.xlane.f32.xlu1 %v3667_v33 }
0x17ed   :  { %3674 = vrot.lane.b32.xlu1 %v6476_v50, %s6877_s11 }
0x17f1   :  { %3987 = vrot.lane.b32.xlu1 %v6501_v57, %s6878_s6 }
0x1803   :  { %v3249_v7 = vpop.f32.mrb[26].mxu0 }
0x1804   :  { %v5506_v34 = vpop.f32.mrb[27].mxu0  ;;  %5514 = vmatprep.mubr.msk.f32.mxu0 %vm417_vm2, %v3249_v7 }
0x1805   :  { %5515 = vmatmul.mubr.msk.f32.vlgmr.msra.gmra.mrb[28].mxu0 %vm417_vm2, %v3326_v15 }
0x1806   :  { %5519 = vmatprep.mubr.msk.f32.mxu0 %vm417_vm2, %v6562_v40  ;;  %5518 = vmatpush3.msra.mxu0 %v5026_v63 }
0x1807   :  { %5532 = vmatprep.subr.mxu0 %v5916_v56 }
0x180d   :  { %5520 = vmatmul.mubr.msk.f32.vlgmr.msra.gmra.mrb[28].mxu0 %vm417_vm2, %v6535_v0 }
0x180e   :  { %5534 = vmatprep.mubr.msk.f32.mxu0 %vm5917_vm1, %v5916_v56 }
0x1865   :  { %v3666_v35 = vpop.xlane.xlu1 %3665 }
0x1866   :  { %5832 = vrcp.f32 %v3666_v35 }
0x1869   :  { %v3669_v57 = vpop.xlane.xlu1 %3668 }
0x186a   :  { %5834 = vrcp.f32 %v3669_v57 }
0x186d   :  { %v3675_v37 = vpop.permute.xlu1 %3674 }
0x186e   :  { %5533 = vmatpush3.msra.mxu0 %v3675_v37 }
0x186f   :  { %5542 = vmatprep.subr.mxu0 %v5028_v36 }
0x1870   :  { %v5833_v40 = vpop.eup %5832 }
0x1871   :  { %v3672_v41 = vmul.f32 %v5833_v40, %v5829_v30  ;;  %v3988_v53 = vpop.permute.xlu1 %3987 }
0x1873   :  { %5535 = vmatmul.mubr.msk.f32.vlgmr.msra.gmra.mrb[30].mxu0 %vm417_vm2, %v3672_v41  ;;  %v5078_v41 = vld [vmem:[%s6815_s16 + $0x28] sm:$0xff] }
0x1874   :  { %v5835_v0 = vpop.eup %5834  ;;  %5543 = vmatpush3.msra.mxu0 %v5028_v36 }
0x1875   :  { %v3673_v45 = vmul.f32 %v5835_v0, %v5831_v31  ;;  %5552 = vmatprep.subr.mxu0 %v5916_v56 }
0x1877   :  { %5540 = vmatmul.mubr.msk.f32.vlgmr.msra.gmra.mrb[42].mxu1 %vm417_vm2, %v3673_v45  ;;  %v5080_v45 = vld [vmem:[%s6815_s16 + $0x38] sm:$0xff] }
0x1878   :  { %5548 = vmatpush3.xpose.msk.msra.mxu1 %vm417_vm2, %v3912_v38  ;;  %5549 = vmatprep.mubr.msk.f32.mxu1 %vm5917_vm1, %v5916_v56 }
0x1879   :  { %5557 = vmatprep.subr.mxu1 %v5916_v56 }
0x187b   :  { %5550 = vmatmul.mubr.msk.f32.vlgmr.msra.gmra.mrb[44].mxu1 %vm417_vm2, %v3910_v46 }
0x187c   :  { %5559 = vmatprep.mubr.msk.f32.mxu1 %vm5917_vm1, %v5916_v56 }
0x1946   :  { %v3746_v48 = vpop.f32.mrb[30].mxu0 }
0x1947   :  { %v5536_v4 = vpop.f32.mrb[31].mxu0  ;;  %5544 = vmatprep.mubr.msk.f32.mxu0 %vm417_vm2, %v3746_v48 }
0x194a   :  { %v3822_v51 = vpop.f32.mrb[42].mxu1 }
0x194b   :  { %v5541_v52 = vpop.f32.mrb[43].mxu1  ;;  %5545 = vmatmul.mubr.msk.f32.vlgmr.msra.gmra.mrb[28].mxu0 %vm417_vm2, %v3822_v51 }
0x194c   :  { %5553 = vmatpush3.xpose.msk.msra.mxu0 %vm417_vm2, %v3990_v44  ;;  %5554 = vmatprep.mubr.msk.f32.mxu0 %vm5917_vm1, %v5916_v56  ;;  %v5079_v44 = vld [vmem:[%s6815_s16 + $0x30] sm:$0xff] }
0x194d   :  { %5562 = vmatprep.subr.mxu0 %v5916_v56  ;;  %v5707_v46 = vpack.c.bf16 %v5080_v45, %v5079_v44 }
0x194e   :  { %v3983_v55 = vpop.f32.mrb[44].mxu1 }
0x194f   :  { %v4065_v59 = vmul.f32 0.35355338, %v3983_v55  ;;  %v5551_v60 = vpop.f32.mrb[45].mxu1  ;;  %5555 = vmatmul.mubr.msk.f32.vlgmr.msra.gmra.mrb[32].mxu0 %vm417_vm2, %v3988_v53 }
0x1950   :  { %5564 = vmatprep.mubr.msk.f32.mxu0 %vm5917_vm1, %v5916_v56  ;;  %v5075_v60 = vld [vmem:[%s6813_s14 + $0x1] ss:$0 sm:$0xff] }
0x1951   :  { %v4067_v61 = vadd.f32 %v6567_v47, %v4065_v59 }
0x1953   :  { %v4069_v62 = vsel %vm417_vm2, %v4067_v61, -inf }
0x1954   :  { %4070 = vmax.xlane.f32.xlu0 %v4069_v62 }
0x19e1   :  { %v4071_v2 = vpop.xlane.xlu0 %4070 }
0x19e2   :  { %v4075_v3 = vsub.f32 %v4067_v61, %v4071_v2 }
0x19e4   :  { %v4077_v5 = vmul.f32 1.442695, %v4075_v3  ;;  %v5076_v3 = vld [vmem:[%s6814_s15 + $0x1] ss:$0 sm:$0xff] }
0x19e6   :  { %5836 = vpow2.f32 %v4077_v5 }
0x19f0   :  { %v5837_v8 = vpop.eup %5836 }
0x19f1   :  { %v4081_v9 = vsel %vm417_vm2, %v5837_v8, 0.0 }
0x19f2   :  { %4082 = vadd.xlane.f32.xlu0 %v4081_v9 }
0x1a22   :  { %v4061_v10 = vpop.f32.mrb[32].mxu0 }
0x1a23   :  { %v4066_v12 = vmul.f32 0.35355338, %v4061_v10  ;;  %v5556_v13 = vpop.f32.mrb[33].mxu0 }
0x1a24   :  { %v5086_v13 = vld [vmem:[%s6817_s18 + $0x48] sm:$0xff] }
0x1a25   :  { %v4068_v14 = vadd.f32 %v6547_v32, %v4066_v12  ;;  %v5085_v12 = vld [vmem:[%s6817_s18 + $0x40] sm:$0xff] }
0x1a27   :  { %v4072_v11 = vsel %vm417_vm2, %v4068_v14, -inf }
0x1a28   :  { %4073 = vmax.xlane.f32.xlu1 %v4072_v11  ;;  %v5087_v11 = vld [vmem:[%s6817_s18 + $0x50] sm:$0xff] }
0x1a39   :  { %4167 = vrot.lane.b32.xlu1 %v6504_v58, %s6878_s6 }
0x1a7f   :  { %v4083_v32 = vpop.xlane.xlu0 %4082 }
0x1ab5   :  { %v4074_v47 = vpop.xlane.xlu1 %4073 }
0x1ab6   :  { %v4076_v15 = vsub.f32 %v4068_v14, %v4074_v47  ;;  %v5711_v14 = vpack.c.bf16 %v5086_v13, %v5085_v12  ;;  %v5088_v47 = vld [vmem:[%s6817_s18 + $0x58] sm:$0xff]  ;;  %v5099_v13 = vld [vmem:[%s6819_s20 + $0x1] ss:$0 sm:$0xff] }
0x1ab8   :  { %v4079_v39 = vmul.f32 1.442695, %v4076_v15  ;;  %v5715_v15 = vpack.c.bf16 %v5088_v47, %v5087_v11 }
0x1ab9   :  { %v4168_v16 = vpop.permute.xlu1 %4167 }
0x1aba   :  { %5838 = vpow2.f32 %v4079_v39  ;;  %5563 = vmatpush3.msra.mxu0 %v4168_v16  ;;  %v5089_v39 = vld [vmem:[%s6817_s18 + $0x60] sm:$0xff]  ;;  %v5090_v16 = vld [vmem:[%s6817_s18 + $0x68] sm:$0xff] }
0x1abb   :  { %5840 = vrcp.f32 %v4083_v32  ;;  %5567 = vmatprep.subr.mxu0 %v5029_v21  ;;  %v5092_v32 = vld [vmem:[%s6817_s18 + $0x78] sm:$0xff] }
0x1ac4   :  { %v5839_v17 = vpop.eup %5838 }
0x1ac5   :  { %v4084_v49 = vsel %vm417_vm2, %v5839_v17, 0.0  ;;  %v5841_v54 = vpop.eup %5840 }
0x1ac6   :  { %4085 = vadd.xlane.f32.xlu0 %v4084_v49  ;;  %v4089_v19 = vmul.f32 %v5841_v54, %v5837_v8  ;;  %v5091_v49 = vld [vmem:[%s6817_s18 + $0x70] sm:$0xff]  ;;  %v5082_v54 = vld [vmem:[%s6816_s17 + $0x1] ss:$0 sm:$0xff] }
0x1adc   :  { %4091 = vrot.lane.b32.xlu0 %v6476_v50, %s6878_s6 }
0x1b53   :  { %v4086_v18 = vpop.xlane.xlu0 %4085 }
0x1b54   :  { %5842 = vrcp.f32 %v4086_v18  ;;  %v5723_v18 = vpack.c.bf16 %v5092_v32, %v5091_v49 }
0x1b57   :  { %v4092_v58 = vpop.permute.xlu0 %4091 }
0x1b58   :  { %5558 = vmatpush3.msra.mxu1 %v4092_v58 }
0x1b59   :  { %5560 = vmatmul.mubr.msk.f32.vlgmr.msra.gmra.mrb[46].mxu1 %vm417_vm2, %v4089_v19 }
0x1b5e   :  { %v5843_v22 = vpop.eup %5842 }
0x1b5f   :  { %v4090_v20 = vmul.f32 %v5843_v22, %v5839_v17  ;;  %v5719_v17 = vpack.c.bf16 %v5090_v16, %v5089_v39 }
0x1b61   :  { %5565 = vmatmul.mubr.msk.f32.vlgmr.msra.gmra.mrb[34].mxu0 %vm417_vm2, %v4090_v20 }
0x1b62   :  { %5568 = vmatpush3.msra.mxu0 %v5029_v21 }
0x1b63   :  { %5712 = vmatprep.subr.bf16.mxu0 %v5711_v14 }
0x1c2c   :  { %v4163_v50 = vpop.f32.mrb[46].mxu1 }
0x1c2d   :  { %v5561_v23 = vpop.f32.mrb[47].mxu1  ;;  %5569 = vmatprep.mubr.msk.f32.mxu0 %vm417_vm2, %v4163_v50 }
0x1c34   :  { %v4239_v24 = vpop.f32.mrb[34].mxu0 }
0x1c35   :  { %v5566_v63 = vpop.f32.mrb[35].mxu0  ;;  %5570 = vmatmul.mubr.msk.f32.vlgmr.msra.gmra.mrb[28].mxu0 %vm417_vm2, %v4239_v24 }
0x1c36   :  { %5714 = vmatpush3.bf16.msra.mxu0 %v5711_v14 }
0x1c37   :  { %5716 = vmatprep.subr.bf16.mxu0 %v5715_v15 }
0x1c3a   :  { %5718 = vmatpush3.bf16.msra.mxu0 %v5715_v15  ;;  %v5100_v15 = vld [vmem:[%s6820_s21 + $0x1] ss:$0 sm:$0xff] }
0x1c3b   :  { %5720 = vmatprep.subr.bf16.mxu0 %v5719_v17 }
0x1c3e   :  { %5722 = vmatpush3.bf16.msra.mxu0 %v5719_v17 }
0x1c3f   :  { %5724 = vmatprep.subr.bf16.mxu0 %v5723_v18 }
0x1c42   :  { %5726 = vmatpush3.bf16.msra.mxu0 %v5723_v18 }
0x1d08   :  { %v5571_v26 = vpop.f32.mrb[28].mxu0 }
0x1d09   :  { %v4333_v1 = vadd.f32 %v5571_v26, %v5072_v25  ;;  %v4315_v27 = vpop.f32.mrb[29].mxu0 }
0x1d0a   :  { %v4332_v28 = vadd.f32 %v5072_v25, %v4315_v27 }
0x1d0b   :  { %v4335_v29 = vadd.f32 %v4333_v1, %v6454_v43 }
0x1d0c   :  { %v4334_v30 = vadd.f32 %v4332_v28, %v6452_v42  ;;  %v5077_v42 = vld [vmem:[%s6815_s16 + $0x20] sm:$0xff] }
0x1d0d   :  { %v4343_v6 = vsel %vm102_vm0, %v4335_v29, 0.0  ;;  %v5703_v0 = vpack.c.bf16 %v5078_v41, %v5077_v42 }
0x1d0e   :  { %4344 = vadd.xlane.f32.xlu0 %v4343_v6  ;;  %v4340_v31 = vsel %vm102_vm0, %v4334_v30, 0.0 }
0x1d0f   :  { %4341 = vadd.xlane.f32.xlu1 %v4340_v31  ;;  %5704 = vmatprep.subr.bf16.mxu1 %v5703_v0 }
0x1d10   :  { %5706 = vmatpush3.bf16.msra.mxu1 %v5703_v0 }
0x1d11   :  { %5708 = vmatprep.subr.bf16.mxu1 %v5707_v46 }
0x1d14   :  { %5710 = vmatpush3.bf16.msra.mxu1 %v5707_v46 }
0x1d9b   :  { %v4345_v33 = vpop.xlane.xlu0 %4344 }
0x1d9c   :  { %v4347_v7 = vmul.f32 0.03125, %v4345_v33  ;;  %v4342_v34 = vpop.xlane.xlu1 %4341 }
0x1d9d   :  { %v4346_v35 = vmul.f32 0.03125, %v4342_v34 }
0x1d9e   :  { %v4349_v57 = vsub.f32 %v4335_v29, %v4347_v7 }
0x1d9f   :  { %v4348_v36 = vsub.f32 %v4334_v30, %v4346_v35 }
0x1da0   :  { %v4351_v37 = vmul.f32 %v4349_v57, %v4349_v57 }
0x1da1   :  { %v4350_v38 = vmul.f32 %v4348_v36, %v4348_v36 }
0x1da2   :  { %v4355_v40 = vsel %vm102_vm0, %v4351_v37, 0.0 }
0x1da3   :  { %4356 = vadd.xlane.f32.xlu1 %v4355_v40  ;;  %v4352_v43 = vsel %vm102_vm0, %v4350_v38, 0.0 }
0x1da4   :  { %4353 = vadd.xlane.f32.xlu0 %v4352_v43 }
0x1e30   :  { %v4357_v48 = vpop.xlane.xlu1 %4356 }
0x1e31   :  { %v4359_v4 = vmul.f32 0.03125, %v4357_v48  ;;  %v4354_v51 = vpop.xlane.xlu0 %4353 }
0x1e32   :  { %v4358_v52 = vmul.f32 0.03125, %v4354_v51 }
0x1e33   :  { %v4361_v53 = vadd.f32 1e-12, %v4359_v4 }
0x1e34   :  { %v4360_v55 = vadd.f32 1e-12, %v4358_v52 }
0x1e35   :  { %5844 = vrsqrt.f32 %v4361_v53 }
0x1e36   :  { %5846 = vrsqrt.f32 %v4360_v55 }
0x1e3f   :  { %v5845_v59 = vpop.eup %5844 }
0x1e40   :  { %v5847_v61 = vpop.eup %5846  ;;  %v4365_v62 = vmul.f32 %v5845_v59, %v4349_v57  ;;  %v5094_v57 = vld [vmem:[%s6818_s19 + $0x1] ss:$0 sm:$0xff] }
0x1e41   :  { %v4364_v2 = vmul.f32 %v5847_v61, %v4348_v36 }
0x1e42   :  { %v4373_v5 = vmul.f32 %v5075_v60, %v4365_v62 }
0x1e43   :  { %v4372_v8 = vmul.f32 %v5075_v60, %v4364_v2  ;;  %v5921_v60 = vmov 0.0|0.0  }
0x1e44   :  { %v4381_v10 = vadd.f32 %v5076_v3, %v4373_v5  ;;  %5727 = vmatprep.subr.bf16.mxu1 %v5921_v60 }
0x1e45   :  { %v4380_v9 = vadd.f32 %v5076_v3, %v4372_v8 }
0x1e47   :  { %5580 = vmatprep.mubr.msk.f32.mxu1 %vm102_vm0, %v4380_v9 }
0x1e48   :  { %5581 = vmatmul.mubr.msk.f32.vlgmr.msra.gmra.mrb[48].mxu1 %vm102_vm0, %v4381_v10 }
0x1e49   :  { %5606 = vmatprep.mubr.msk.f32.mxu1 %vm5917_vm1, %v5916_v56 }
0x1f1b   :  { %v5582_v19 = vpop.f32.mrb[48].mxu1 }
0x1f1c   :  { %v4473_v58 = vadd.f32 %v5582_v19, %v5082_v54  ;;  %v4467_v22 = vpop.f32.mrb[49].mxu1  ;;  %v4723_v19 = vld [vmem:[%s6821_s22 + $0x8] sm:$0xff] }
0x1f1d   :  { %v4468_v20 = vadd.f32 %v5082_v54, %v4467_v22  ;;  %v4722_v54 = vld [vmem:[%s6821_s22] sm:$0xff] }
0x1f1e   :  { %v4479_v21 = vmul.f32 0.044715, %v4473_v58  ;;  %v4477_v7 = vmul.f32 0.5, %v4473_v58 }
0x1f1f   :  { %v4478_v50 = vmul.f32 0.044715, %v4468_v20  ;;  %v4476_v31 = vmul.f32 0.5, %v4468_v20 }
0x1f20   :  { %v4481_v23 = vmul.f32 %v4479_v21, %v4473_v58  ;;  %v4724_v21 = vld [vmem:[%s6821_s22 + $0x10] sm:$0xff] }
0x1f21   :  { %v4480_v24 = vmul.f32 %v4478_v50, %v4468_v20  ;;  %v4725_v50 = vld [vmem:[%s6821_s22 + $0x18] sm:$0xff] }
0x1f22   :  { %v4483_v63 = vmul.f32 %v4481_v23, %v4473_v58  ;;  %v5734_v23 = vpack.c.bf16 %v4725_v50, %v4724_v21 }
0x1f23   :  { %v4482_v25 = vmul.f32 %v4480_v24, %v4468_v20 }
0x1f24   :  { %v4485_v26 = vadd.f32 %v4483_v63, %v4473_v58 }
0x1f25   :  { %v4484_v1 = vadd.f32 %v4482_v25, %v4468_v20  ;;  %v5731_v20 = vpack.c.bf16 %v4723_v19, %v4722_v54  ;;  %v4807_v25 = vld [vmem:[%s6823_s24] sm:$0xff] }
0x1f26   :  { %v4487_v27 = vmul.f32 0.7978846, %v4485_v26  ;;  %v4808_v26 = vld [vmem:[%s6823_s24 + $0x8] sm:$0xff] }
0x1f27   :  { %v4486_v28 = vmul.f32 0.7978846, %v4484_v1  ;;  %v4809_v1 = vld [vmem:[%s6823_s24 + $0x10] sm:$0xff] }
0x1f28   :  { %5848 = vtanh.f32 %v4487_v27  ;;  %v5737_v27 = vpack.c.bf16 %v4808_v26, %v4807_v25 }
0x1f29   :  { %5850 = vtanh.f32 %v4486_v28  ;;  %v4810_v28 = vld [vmem:[%s6823_s24 + $0x18] sm:$0xff] }
0x1f32   :  { %v5849_v29 = vpop.eup %5848 }
0x1f33   :  { %v5851_v30 = vpop.eup %5850  ;;  %v4491_v6 = vadd.f32 1.0, %v5849_v29  ;;  %v5740_v29 = vpack.c.bf16 %v4810_v28, %v4809_v1 }
0x1f34   :  { %v4490_v33 = vadd.f32 1.0, %v5851_v30 }
0x1f35   :  { %v4493_v35 = vmul.f32 %v4491_v6, %v4477_v7  ;;  %v5105_v7 = vld [vmem:[%s6824_s25] ss:$0 sm:$0xff]  ;;  %s5922_s25 = smov [#allocation2]  }
0x1f36   :  { %v4492_v34 = vmul.f32 %v4490_v33, %v4476_v31  ;;  %s4933_s7 = sshll.u32 %s5922_s25, 4  ;;  %s4934_s7 = int_to_ptr.vmem [resolvable:$true] %s4933_s7 }
0x1f37   :  { %s5868_s17 = scalar_lea.vmem %s4934_s7, 32  ;;  %p5873_p1 = scmp.lt.s32.totalorder %s4934_s7, %s4934_s7 }
0x1f38   :  { %5599 = vmatprep.mubr.msk.f32.mxu0 %vm2265_vm3, %v4492_v34  ;;  %p5869_p0 = scmp.ne.s32.totalorder %s4934_s7, %s5868_s17  ;;  %p5874_p2 = scmp.lt.s32.totalorder %s5868_s17, %s5868_s17 }
0x1f39   :  { %5600 = vmatmul.mubr.msk.f32.vlgmr.msra.gmra.mrb[36].mxu0 %vm2265_vm3, %v4493_v35 }
0x1f3a   :  { %p5875_p3 = por %p5874_p2, %p5873_p1 }
0x1f3c   :  { %p5876_p4 = pnand %p5875_p3, %p5869_p0 }
0x200c   :  { %v5601_v36 = vpop.f32.mrb[36].mxu0 }
0x200d   :  { %v4589_v37 = vadd.f32 %v5601_v36, %v5094_v57  ;;  %v4583_v38 = vpop.f32.mrb[37].mxu0 }
0x200e   :  { %v4584_v40 = vadd.f32 %v5094_v57, %v4583_v38 }
0x200f   :  { %v4593_v43 = vadd.f32 %v4589_v37, %v4381_v10 }
0x2010   :  { %v4592_v42 = vadd.f32 %v4584_v40, %v4380_v9  ;;  %v4640_v9 = vlaneseq }
0x2011   :  { %v4601_v41 = vsel %vm102_vm0, %v4593_v43, 0.0 }
0x2012   :  { %4602 = vadd.xlane.f32.xlu1 %v4601_v41  ;;  %v4598_v0 = vsel %vm102_vm0, %v4592_v42, 0.0  ;;  %v4643_v10 = vshrl.u32 %v4640_v9, 7  ;;  %v4641_v16 = vand.u32 127, %v4640_v9 }
0x2013   :  { %4599 = vadd.xlane.f32.xlu0 %v4598_v0 }
0x2014   :  { %v4644_v17 = vmul.u32 8, %v4643_v10 }
0x2016   :  { %vm4645_vm4 = vcmp.eq.s32.totalorder %v4641_v16, %v4644_v17 }
0x2017   :  { %v5101_v22 = vsel %vm4645_vm4, 1.0, %v5916_v56 }
0x209f   :  { %v4603_v44 = vpop.xlane.xlu1 %4602 }
0x20a0   :  { %v4605_v45 = vmul.f32 0.03125, %v4603_v44  ;;  %v4600_v46 = vpop.xlane.xlu0 %4599 }
0x20a1   :  { %v4604_v48 = vmul.f32 0.03125, %v4600_v46 }
0x20a2   :  { %v4607_v4 = vsub.f32 %v4593_v43, %v4605_v45  ;;  %v4899_v45 = vld [vmem:[%s6879_s29] sm:$0x3] }
0x20a3   :  { %v4606_v51 = vsub.f32 %v4592_v42, %v4604_v48 }
0x20a4   :  { %v4609_v52 = vmul.f32 %v4607_v4, %v4607_v4 }
0x20a5   :  { %v4608_v53 = vmul.f32 %v4606_v51, %v4606_v51 }
0x20a6   :  { %v4613_v55 = vsel %vm102_vm0, %v4609_v52, 0.0 }
0x20a7   :  { %4614 = vadd.xlane.f32.xlu1 %v4613_v55  ;;  %v4610_v59 = vsel %vm102_vm0, %v4608_v53, 0.0 }
0x20a8   :  { %4611 = vadd.xlane.f32.xlu0 %v4610_v59 }
0x2134   :  { %v4615_v61 = vpop.xlane.xlu1 %4614 }
0x2135   :  { %v4617_v62 = vmul.f32 0.03125, %v4615_v61  ;;  %v4612_v2 = vpop.xlane.xlu0 %4611 }
0x2136   :  { %v4616_v3 = vmul.f32 0.03125, %v4612_v2 }
0x2137   :  { %v4619_v5 = vadd.f32 1e-12, %v4617_v62 }
0x2138   :  { %v4618_v8 = vadd.f32 1e-12, %v4616_v3 }
0x2139   :  { %5852 = vrsqrt.f32 %v4619_v5 }
0x213a   :  { %5854 = vrsqrt.f32 %v4618_v8 }
0x2143   :  { %v5853_v12 = vpop.eup %5852 }
0x2144   :  { %v5855_v14 = vpop.eup %5854  ;;  %v4623_v11 = vmul.f32 %v5853_v12, %v4607_v4 }
0x2145   :  { %v4622_v47 = vmul.f32 %v5855_v14, %v4606_v51 }
0x2146   :  { %v4631_v39 = vmul.f32 %v5099_v13, %v4623_v11 }
0x2147   :  { %v4630_v49 = vmul.f32 %v5099_v13, %v4622_v47 }
0x2148   :  { %v4639_v32 = vadd.f32 %v5100_v15, %v4631_v39 }
0x2149   :  { %v4638_v18 = vadd.f32 %v5100_v15, %v4630_v49 }
0x214b   :  { %v5728_v58 = vpack.c.bf16 %v4639_v32, %v4638_v18 }
0x214d   :  { %5729 = vmatpush3.bf16.msra.mxu1 %v5728_v58 }
0x214e   :  { %5730 = vmatprep.subr.bf16.mxu1 %v5921_v60 }
0x2150   :  { %5607 = vmatmul.mubr.msk.f32.vlgmr.msra.gmra.mrb[50].mxu1 %vm4648_vm5, %v5101_v22 }
0x2151   :  { %5732 = vmatpush3.bf16.msra.mxu1 %v5731_v20  ;;  %5617 = vmatprep.mubr.msk.f32.mxu1 %vm5917_vm1, %v5916_v56 }
0x2152   :  { %5733 = vmatprep.subr.bf16.mxu1 %v5921_v60 }
0x2155   :  { %5735 = vmatpush3.bf16.msra.mxu1 %v5734_v23 }
0x2156   :  { %5736 = vmatprep.subr.bf16.mxu1 %v5921_v60 }
0x2223   :  { %v4718_v24 = vpop.f32.mrb[50].mxu1 }
0x2224   :  { %v5608_v63 = vpop.f32.mrb[51].mxu1  ;;  %5618 = vmatmul.mubr.msk.f32.vlgmr.msra.gmra.mrb[52].mxu1 %vm102_vm0, %v4718_v24 }
0x2225   :  { %5628 = vmatprep.mubr.msk.f32.mxu1 %vm5917_vm1, %v5916_v56  ;;  %5738 = vmatpush3.bf16.msra.mxu1 %v5737_v27  ;;  %v5103_v56 = vld [vmem:[%s6822_s23] ss:$0 sm:$0xff] }
0x2226   :  { %5739 = vmatprep.subr.bf16.mxu1 %v5921_v60 }
0x2229   :  { %5741 = vmatpush3.bf16.msra.mxu1 %v5740_v29 }
0x22f7   :  { %v4802_v30 = vpop.f32.mrb[52].mxu1 }
0x22f8   :  { %v4803_v6 = vadd.f32 %v5103_v56, %v4802_v30  ;;  %v5619_v31 = vpop.f32.mrb[53].mxu1 }
0x22fa   :  { %5856 = vtanh.f32 %v4803_v6 }
0x2304   :  { %v5857_v33 = vpop.eup %5856 }
0x2305   :  { %5629 = vmatmul.mubr.msk.f32.vlgmr.msra.gmra.mrb[54].mxu1 %vm102_vm0, %v5857_v33 }
0x23d8   :  { %v4887_v34 = vpop.f32.mrb[54].mxu1 }
0x23d9   :  { %v4888_v35 = vadd.f32 %v5105_v7, %v4887_v34  ;;  %v5630_v57 = vpop.f32.mrb[55].mxu1 }
0x23db   :  { %v4891_v36 = vsub.f32 0.0, %v4888_v35  ;;  %v4903_v37 = vand.u32 2147483647, %v4888_v35  ;;  %v4900_v46 = vmax.f32 %v4888_v35, 0.0  ;;  %v4901_v48 = vmul.f32 %v4899_v45, %v4888_v35 }
0x23dd   :  { %v4892_v38 = vmul.f32 1.442695, %v4891_v36  ;;  %v4904_v40 = vsub.f32 0.0, %v4903_v37  ;;  %v4902_v52 = vsub.f32 %v4900_v46, %v4901_v48 }
0x23df   :  { %5858 = vpow2.f32 %v4892_v38  ;;  %v4905_v43 = vmul.f32 1.442695, %v4904_v40 }
0x23e1   :  { %5860 = vpow2.f32 %v4905_v43 }
0x23e9   :  { %v5859_v42 = vpop.eup %5858 }
0x23ea   :  { %v4894_v41 = vadd.f32 1.0, %v5859_v42 }
0x23eb   :  { %v5861_v0 = vpop.eup %5860 }
0x23ec   :  { %v4907_v44 = vadd.f32 1.0, %v5861_v0  ;;  %5862 = vrcp.f32 %v4894_v41 }
0x23ee   :  { %5864 = vlog2.f32 %v4907_v44 }
0x23f6   :  { %v5863_v4 = vpop.eup %5862 }
0x23f7   :  { %4898 = vst.msk [vmem:[#allocation2] sm:$0x3] %vm4897_vm6, %v5863_v4 }
0x23f8   :  { %v5865_v51 = vpop.eup %5864 }
0x23f9   :  { %v4909_v53 = vmul.f32 0.6931472, %v5865_v51 }
0x23fb   :  { %v4910_v55 = vadd.f32 %v4909_v53, %v4902_v52 }
0x23fd   :  { %v4911_v59 = vsel %vm4897_vm6, %v4910_v55, 0.0 }
0x23fe   :  { %4912 = vadd.xlane.f32.xlu0 %v4911_v59 }
0x23ff   :  { %5879 = shalt.err (!%p5876_p4)
}
0x2400   :  { %s6880_s6 = sld [smem:[#allocation22_spill]] }
0x2406   :  { %s5880_s8 = scalar_lea.hbm %s6880_s6, 32 }
0x2407   :  { %p5881_p5 = scmp.ne.s32.totalorder %s6880_s6, %s5880_s8  ;;  %p5884_p6 = scmp.lt.u32.totalorder %s5880_s8, %s6880_s6 }
0x2409   :  { %p5886_p7 = pnand %p5884_p6, %p5881_p5 }
0x240b   :  { %5889 = shalt.err (!%p5886_p7)
}
0x240c   :  { %4936 = dma.vmem_to_hbm [thread:$0]  %s4934_s7, 32, %s6880_s6, [#allocation3]   ;;  %vm4925_vm7 = vcmask 0  }
0x240d   :  { %s5923_s4 = smov [#allocation4]  }
0x240e   :  { %s4943_s0 = sshll.u32 %s5923_s4, 4  ;;  %s4944_s0 = int_to_ptr.vmem [resolvable:$true] %s4943_s0 }
0x240f   :  { %s5890_s27 = scalar_lea.vmem %s4944_s0, 16  ;;  %s5894_s22 = scalar_lea.vmem %s4944_s0, 32 }
0x2410   :  { %p5891_p8 = scmp.ne.s32.totalorder %s4944_s0, %s5890_s27  ;;  %p5895_p9 = scmp.lt.s32.totalorder %s4944_s0, %s4944_s0 }
0x2411   :  { %p5896_p10 = scmp.lt.s32.totalorder %s5894_s22, %s5890_s27 }
0x2413   :  { %p5897_p11 = por %p5896_p10, %p5895_p9 }
0x2415   :  { %p5898_p12 = pnand %p5897_p11, %p5891_p8 }
0x248b   :  { %v4913_v60 = vpop.xlane.xlu0 %4912 }
0x248c   :  { %v4914_v61 = vrot.slane %v4913_v60, 4 }
0x248e   :  { %v4915_v62 = vadd.f32 %v4914_v61, %v4913_v60 }
0x2490   :  { %v4916_v2 = vrot.slane %v4915_v62, 2 }
0x2492   :  { %v4917_v3 = vadd.f32 %v4916_v2, %v4915_v62 }
0x2494   :  { %v4918_v5 = vrot.slane %v4917_v3, 1 }
0x2496   :  { %v4919_v8 = vadd.f32 %v4918_v5, %v4917_v3 }
0x2498   :  { %5754 = vpush %v4919_v8 }
0x24c9   :  { %s5755_s15 = spop %5754 }
0x24ca   :  { %s4923_s26 = smul.f32 0.125, %s5755_s15 }
0x24cc   :  { %v4924_v9 = vstv %s4923_s26 }
0x24cd   :  { %4926 = vst.msk [vmem:[#allocation4] sm:$0x1] %vm4925_vm7, %v4924_v9 }
0x24ce   :  { %5901 = shalt.err (!%p5898_p12)
}
0x24cf   :  { %s6881_s10 = sld [smem:[#allocation23_spill]] }
0x24d5   :  { %s5902_s13 = scalar_lea.hbm %s6881_s10, 16 }
0x24d6   :  { %p5903_p13 = scmp.ne.s32.totalorder %s6881_s10, %s5902_s13  ;;  %p5906_p0 = scmp.lt.u32.totalorder %s5902_s13, %s6881_s10 }
0x24d8   :  { %p5908_p1 = pnand %p5906_p0, %p5903_p13 }
0x24da   :  { %5911 = shalt.err (!%p5908_p1)
}
0x24db   :  { %4946 = dma.vmem_to_hbm [thread:$0]  %s4944_s0, 16, %s6881_s10, [#allocation5]  }
0x24dc   :  { %5912 = dma.done.wait [#allocation3], 32  }
0x24dd   :  { %5913 = vsyncadd [#allocation3], 4294967264 }
0x24de   :  { %5914 = dma.done.wait [#allocation5], 16  }
0x24df   :  { %5915 = vsyncadd [#allocation5], 4294967280 }
0x24e0   :  { %4953 = vsyncpa [#allocation3], 1 }
0x24e1   :  { %4954 = vsyncpa [#allocation5], 1 }

</bundles_post_ra>
